<compile_context>
chip_gen: v6e
topology: v6e:2x2x1
jax: 0.10.0
libtpu: 0.0.40
codegen_flags: <defaults>
</compile_context>

<pallas_src>
import functools

import jax
import jax.numpy as jnp
from jax import lax
from jax.experimental import pallas as pl
from jax.experimental.pallas import tpu as pltpu


def _upsample_kernel(x_ref, xtop_ref, xbot_ref, wf_ref, b_ref, a_ref, o_ref,
                     xs_ref, col_ref, *, h_total):
    # x_ref   : (1, tH, W, C)       row tile of the NHWC input
    # xtop_ref: (1, 1, W, C)        row above the tile (clamped at top edge)
    # xbot_ref: (1, 1, W, C)        row below the tile (clamped at bottom edge)
    # wf_ref  : (9*C, Co) bf16      fused depthwise*pointwise weights, rows in
    #                               (ky, kx, c) im2col order, cols permuted to
    #                               (dy, dx, c) pixel-shuffle order
    # b_ref   : (1, Co) f32         fused bias (dw_b @ pw + pw_b), permuted
    # a_ref   : (1, Co) f32         PReLU alpha per permuted column
    # o_ref   : (1, tH, r, W, r*C)  pixel-shuffle-ready output layout
    # xs_ref  : (tH+2, W+2, C) bf16 zero-padded input tile (VMEM scratch)
    # col_ref : (tH*W, 9*C)   bf16  im2col matrix (VMEM scratch)
    i = pl.program_id(1)
    n_i = pl.num_programs(1)
    tH, W, C = x_ref.shape[1], x_ref.shape[2], x_ref.shape[3]
    r = o_ref.shape[2]
    rC = o_ref.shape[4]

    # ---- build the zero-padded tile in VMEM (fused padding, bf16, cast once) ----
    zero_row = jnp.zeros((W, C), jnp.bfloat16)
    top = jnp.where(i > 0, xtop_ref[0, 0].astype(jnp.bfloat16), zero_row)
    bot = jnp.where(i < n_i - 1, xbot_ref[0, 0].astype(jnp.bfloat16), zero_row)

    x_tile = x_ref[0].astype(jnp.bfloat16)
    if h_total % tH:
        # Remainder tile: rows past the image bottom are padded garbage ->
        # force them to zero so the last valid row sees zero padding below.
        valid = h_total - i * tH
        row_ids = lax.broadcasted_iota(jnp.int32, (tH, W, C), 0)
        x_tile = jnp.where(row_ids < valid, x_tile, jnp.zeros_like(x_tile))

    xs_ref[:, 0, :] = jnp.zeros((tH + 2, C), jnp.bfloat16)       # left border
    xs_ref[:, W + 1, :] = jnp.zeros((tH + 2, C), jnp.bfloat16)   # right border
    xs_ref[0, 1:W + 1, :] = top
    xs_ref[tH + 1, 1:W + 1, :] = bot
    xs_ref[1:tH + 1, 1:W + 1, :] = x_tile

    # ---- im2col build (one pass of the 9 shifted-patch copies) ----
    for ky in range(3):
        for kx in range(3):
            j = ky * 3 + kx
            col_ref[:, j * C:(j + 1) * C] = (
                xs_ref[ky:ky + tH, kx:kx + W, :].reshape(tH * W, C))

    # ---- single MXU matmul with K = 9C, f32 accumulation ----
    acc = jnp.dot(col_ref[...], wf_ref[...], preferred_element_type=jnp.float32)
    acc = acc + b_ref[...]
    acc = jnp.where(acc >= 0.0, acc, a_ref[...] * acc)           # PReLU (f32)

    # ---- fused PixelShuffle: column group dy -> output sub-row dy ----
    for dy in range(r):
        o_ref[0, :, dy, :, :] = (
            acc[:, dy * rC:(dy + 1) * rC].reshape(tH, W, rC).astype(o_ref.dtype))


def _vmem_config():
    """(vmem_limit_bytes, per-step tile budget, min total grid steps) per chip."""
    try:
        phys = int(pltpu.get_tpu_info().vmem_capacity_bytes)
    except Exception:
        phys = None
    if phys is None:
        # Unknown generation: conservative settings that fit every chip.
        return 40 * 1024 * 1024, 20 * 1024 * 1024, 4
    if phys <= 64 * 1024 * 1024:
        # v7x-class: 64 MiB VMEM per TC, 2 TCs -> smaller scoped limit and
        # enough grid steps to keep both cores busy.
        return 38 * 1024 * 1024, 22 * 1024 * 1024, 8
    # v5e / v6e: 128 MiB physical VMEM -> big row tiles, fewer grid steps.
    return 80 * 1024 * 1024, 32 * 1024 * 1024, 1


def _choose_tile_h(N, H, W, C, Co, in_isz, out_isz, budget_bytes, min_steps):
    """Largest row tile whose real per-step working set fits the budget.

    Counts the double-buffered input/halo/output blocks, bf16 padded scratch,
    bf16 im2col scratch (x2 margin for transient relayout copies during the
    build), the f32 matmul result and the resident weights.
    """
    def fits(th):
        in_blk = th * W * C * in_isz
        halo_blk = 2 * W * C * in_isz
        out_blk = th * W * Co * out_isz
        xs = (th + 2) * (W + 2) * C * 2
        col = th * W * 9 * C * 2
        acc = th * W * Co * 4
        wts = 9 * C * Co * 2 + 2 * Co * 4
        return (2 * (in_blk + halo_blk + out_blk) + xs + 2 * col + acc
                + 2 * wts) <= budget_bytes

    best = None
    for th in range(H, 0, -1):
        if not fits(th):
            continue
        if best is None:
            best = th
        if N * pl.cdiv(H, th) >= min_steps:
            return th
    return best if best is not None else 1


def upsample_block_nhwc(x_nhwc, params, scale_factor, tile_h=None,
                        out_dtype=None):
    """Fused UpsampleBlock forward in NHWC: (N,H,W,C) -> (N, H*r, W*r, C)."""
    dww, dwb, pww, pwb, alpha = params
    N, H, W, C = x_nhwc.shape
    r = scale_factor
    Co = C * r * r
    rC = r * C
    # TODO(synk): expose bf16 output as a memory-bandwidth knob for callers
    # that can tolerate it; default keeps the module's dtype semantics.
    out_dtype = x_nhwc.dtype if out_dtype is None else out_dtype

    # Permute pointwise columns from PyTorch pre-shuffle order (c*r^2 + dy*r + dx)
    # to (dy*r*C + dx*C + c) so the in-kernel store IS the pixel shuffle.
    j = jnp.arange(Co)
    dy, dx, c = j // rC, (j % rC) // C, j % C
    old = c * (r * r) + dy * r + dx
    pww_p = pww[:, old]                                          # (C, Co)
    bias_p = (dwb @ pww + pwb)[old].astype(jnp.float32)          # fused bias
    alpha_p = alpha[c].astype(jnp.float32)                       # PReLU per column
    # fused depthwise*pointwise weights, im2col row order (ky, kx, c), bf16
    wf = (dww[:, :, :, None] * pww_p[None, None, :, :]).reshape(9 * C, Co)
    wf = wf.astype(jnp.bfloat16)

    vmem_limit, budget, min_steps = _vmem_config()
    if tile_h is None:
        tile_h = _choose_tile_h(N, H, W, C, Co,
                                jnp.dtype(x_nhwc.dtype).itemsize,
                                jnp.dtype(out_dtype).itemsize,
                                budget, min_steps)
    tile_h = int(min(tile_h, H))
    n_tiles = pl.cdiv(H, tile_h)   # non-divisor H -> masked remainder tile

    kernel = functools.partial(_upsample_kernel, h_total=H)

    out = pl.pallas_call(
        kernel,
        out_shape=jax.ShapeDtypeStruct((N, H, r, W, rC), out_dtype),
        grid=(N, n_tiles),
        in_specs=[
            pl.BlockSpec((1, tile_h, W, C), lambda n, i: (n, i, 0, 0)),
            pl.BlockSpec((1, 1, W, C),
                         lambda n, i: (n, jnp.maximum(i * tile_h - 1, 0), 0, 0)),
            pl.BlockSpec((1, 1, W, C),
                         lambda n, i: (n, jnp.minimum(i * tile_h + tile_h, H - 1),
                                       0, 0)),
            pl.BlockSpec((9 * C, Co), lambda n, i: (0, 0)),
            pl.BlockSpec((1, Co), lambda n, i: (0, 0)),
            pl.BlockSpec((1, Co), lambda n, i: (0, 0)),
        ],
        out_specs=pl.BlockSpec((1, tile_h, r, W, rC),
                               lambda n, i: (n, i, 0, 0, 0)),
        scratch_shapes=[
            pltpu.VMEM((tile_h + 2, W + 2, C), jnp.bfloat16),    # padded tile
            pltpu.VMEM((tile_h * W, 9 * C), jnp.bfloat16),       # im2col
        ],
        compiler_params=pltpu.CompilerParams(
            dimension_semantics=("parallel", "parallel"),
            vmem_limit_bytes=vmem_limit,
        ),
    )(x_nhwc, x_nhwc, x_nhwc, wf,
      bias_p.reshape(1, Co), alpha_p.reshape(1, Co))

    # (N, H, r, W, r*C) -> (N, H*r, W*r, C): contiguous reshape, i.e. free.
    return out.reshape(N, H * r, W * r, C)


def upsample_block(x_nchw, params, scale_factor, tile_h=None):
    """NCHW wrapper matching the PyTorch module interface."""
    x_nhwc = jnp.transpose(x_nchw, (0, 2, 3, 1))
    y = upsample_block_nhwc(x_nhwc, params, scale_factor, tile_h)
    return jnp.transpose(y, (0, 3, 1, 2))


def reference_forward(x, params, r):
    """Pure-JAX reference mirroring the PyTorch module (NCHW)."""
    dww, dwb, pww, pwb, alpha = params
    N, C, H, W = x.shape
    Co = C * r * r
    w_dw = jnp.transpose(dww, (2, 0, 1)).reshape(C, 1, 3, 3)
    y = jax.lax.conv_general_dilated(
        x, w_dw, (1, 1), ((1, 1), (1, 1)),
        feature_group_count=C, dimension_numbers=("NCHW", "OIHW", "NCHW"))
    y = y + dwb.reshape(1, C, 1, 1)
    w_pw = jnp.transpose(pww, (1, 0)).reshape(Co, C, 1, 1)
    z = jax.lax.conv_general_dilated(
        y, w_pw, (1, 1), ((0, 0), (0, 0)),
        dimension_numbers=("NCHW", "OIHW", "NCHW"))
    z = z + pwb.reshape(1, Co, 1, 1)
    z = z.reshape(N, C, r, r, H, W).transpose(0, 1, 4, 2, 5, 3).reshape(
        N, C, H * r, W * r)
    a = alpha.reshape(1, C, 1, 1)
    return jnp.where(z >= 0, z, a * z)


if __name__ == "__main__":
    N, C, H, W = 2, 4, 16, 16
    r = 2
    Co = C * r * r

    key = jax.random.PRNGKey(0)
    k_x, k_dww, k_dwb, k_pww, k_pwb = jax.random.split(key, 5)

    x = jax.random.normal(k_x, (N, C, H, W), jnp.float32)
    dww = 0.1 * jax.random.normal(k_dww, (3, 3, C), jnp.float32)   # depthwise weight
    dwb = 0.1 * jax.random.normal(k_dwb, (C,), jnp.float32)        # depthwise bias
    pww = 0.1 * jax.random.normal(k_pww, (C, Co), jnp.float32)     # pointwise weight
    pwb = 0.1 * jax.random.normal(k_pwb, (Co,), jnp.float32)       # pointwise bias
    alpha = jnp.full((C,), 0.25, jnp.float32)                      # PReLU default
    params = (dww, dwb, pww, pwb, alpha)

    ref = jax.block_until_ready(reference_forward(x, params, r))

    # None -> generation-aware auto tile; 8 -> interior halos (grid (2,2));
    # 6 -> non-divisor H exercising the masked remainder tile.
    for th in (None, 8, 6):
        out = jax.block_until_ready(upsample_block(x, params, r, tile_h=th))
        assert out.shape == (N, C, H * r, W * r), out.shape
        err = float(jnp.max(jnp.abs(out - ref)))
        # bf16 MXU operands with f32 accumulation -> slightly looser tolerance.
        assert err < 2e-2, (th, err)

    print("KERNEL_OK")
</pallas_src>

<mosaic_0001>
module attributes {stable_mosaic.version = 11 : i64} {
  func.func @_upsample_kernel(%arg0: i32, %arg1: i32, %arg2: memref<1x15x16x4xf32, #tpu.memory_space<vmem>>, %arg3: memref<1x1x16x4xf32, #tpu.memory_space<vmem>>, %arg4: memref<1x1x16x4xf32, #tpu.memory_space<vmem>>, %arg5: memref<36x16xbf16, #tpu.memory_space<vmem>>, %arg6: memref<1x16xf32, #tpu.memory_space<vmem>>, %arg7: memref<1x16xf32, #tpu.memory_space<vmem>>, %arg8: memref<1x15x2x16x8xf32, #tpu.memory_space<vmem>>, %arg9: memref<17x18x4xbf16, #tpu.memory_space<vmem>>, %arg10: memref<240x36xbf16, #tpu.memory_space<vmem>>) attributes {dimension_semantics = [#tpu.dimension_semantics<parallel>, #tpu.dimension_semantics<parallel>], iteration_bounds = array<i64: 2, 2>, scalar_prefetch = 0 : i64, scratch_operands = 2 : i64, tpu.core_type = #tpu.core_type<tc>, window_params = [{transform_indices = @transform_0, window_bounds = array<i64: 1, 15, 16, 4>}, {transform_indices = @transform_1, window_bounds = array<i64: 1, 1, 16, 4>}, {transform_indices = @transform_2, window_bounds = array<i64: 1, 1, 16, 4>}, {pipeline_mode = #tpu.pipeline_mode<synchronous>, transform_indices = @transform_3, window_bounds = array<i64: 36, 16>}, {pipeline_mode = #tpu.pipeline_mode<synchronous>, transform_indices = @transform_4, window_bounds = array<i64: 1, 16>}, {pipeline_mode = #tpu.pipeline_mode<synchronous>, transform_indices = @transform_5, window_bounds = array<i64: 1, 16>}, {transform_indices = @transform_6, window_bounds = array<i64: 1, 15, 2, 16, 8>}]} {
    %cst = arith.constant 0.000000e+00 : bf16
    %0 = vector.broadcast %cst : bf16 to vector<16x4xbf16>
    %c0_i32 = arith.constant 0 : i32
    %1 = arith.cmpi sgt, %arg1, %c0_i32 : i32
    %c0 = arith.constant 0 : index
    %c0_0 = arith.constant 0 : index
    %c0_1 = arith.constant 0 : index
    %c0_2 = arith.constant 0 : index
    %2 = vector.load %arg3[%c0, %c0_0, %c0_1, %c0_2] : memref<1x1x16x4xf32, #tpu.memory_space<vmem>>, vector<1x1x16x4xf32>
    %3 = vector.shape_cast %2 : vector<1x1x16x4xf32> to vector<16x4xf32>
    %4 = arith.truncf %3 : vector<16x4xf32> to vector<16x4xbf16>
    %5 = arith.select %1, %4, %0 : vector<16x4xbf16>
    %c1_i32 = arith.constant 1 : i32
    %6 = arith.cmpi slt, %arg1, %c1_i32 : i32
    %c0_3 = arith.constant 0 : index
    %c0_4 = arith.constant 0 : index
    %c0_5 = arith.constant 0 : index
    %c0_6 = arith.constant 0 : index
    %7 = vector.load %arg4[%c0_3, %c0_4, %c0_5, %c0_6] : memref<1x1x16x4xf32, #tpu.memory_space<vmem>>, vector<1x1x16x4xf32>
    %8 = vector.shape_cast %7 : vector<1x1x16x4xf32> to vector<16x4xf32>
    %9 = arith.truncf %8 : vector<16x4xf32> to vector<16x4xbf16>
    %10 = arith.select %6, %9, %0 : vector<16x4xbf16>
    %c0_7 = arith.constant 0 : index
    %c0_8 = arith.constant 0 : index
    %c0_9 = arith.constant 0 : index
    %c0_10 = arith.constant 0 : index
    %11 = vector.load %arg2[%c0_7, %c0_8, %c0_9, %c0_10] : memref<1x15x16x4xf32, #tpu.memory_space<vmem>>, vector<1x15x16x4xf32>
    %12 = vector.shape_cast %11 : vector<1x15x16x4xf32> to vector<15x16x4xf32>
    %13 = arith.truncf %12 : vector<15x16x4xf32> to vector<15x16x4xbf16>
    %c15_i32 = arith.constant 15 : i32
    %14 = arith.muli %arg1, %c15_i32 : i32
    %c16_i32 = arith.constant 16 : i32
    %15 = arith.subi %c16_i32, %14 : i32
    %16 = tpu.iota {dimensions = array<i32: 0>} : vector<15x16x4xi32>
    %17 = vector.broadcast %15 : i32 to vector<15x16x4xi32>
    %18 = arith.cmpi slt, %16, %17 : vector<15x16x4xi32>
    %cst_11 = arith.constant 0.000000e+00 : bf16
    %19 = vector.broadcast %cst_11 : bf16 to vector<15x16x4xbf16>
    %20 = arith.select %18, %13, %19 : vector<15x16x4xi1>, vector<15x16x4xbf16>
    %cst_12 = arith.constant 0.000000e+00 : bf16
    %21 = vector.broadcast %cst_12 : bf16 to vector<17x4xbf16>
    %c0_13 = arith.constant 0 : index
    %c0_14 = arith.constant 0 : index
    %c0_15 = arith.constant 0 : index
    %22 = vector.load %arg9[%c0_13, %c0_14, %c0_15] : memref<17x18x4xbf16, #tpu.memory_space<vmem>>, vector<17x1x4xbf16>
    %23 = vector.shape_cast %22 : vector<17x1x4xbf16> to vector<17x4xbf16>
    %24 = vector.shape_cast %21 : vector<17x4xbf16> to vector<17x1x4xbf16>
    tpu.vector_store %arg9[%c0_13, %c0_14, %c0_15], %24 {strides = array<i32>} : memref<17x18x4xbf16, #tpu.memory_space<vmem>>, vector<17x1x4xbf16>,
    %cst_16 = arith.constant 0.000000e+00 : bf16
    %25 = vector.broadcast %cst_16 : bf16 to vector<17x4xbf16>
    %c0_17 = arith.constant 0 : index
    %c17 = arith.constant 17 : index
    %c0_18 = arith.constant 0 : index
    %26 = vector.load %arg9[%c0_17, %c17, %c0_18] : memref<17x18x4xbf16, #tpu.memory_space<vmem>>, vector<17x1x4xbf16>
    %27 = vector.shape_cast %26 : vector<17x1x4xbf16> to vector<17x4xbf16>
    %28 = vector.shape_cast %25 : vector<17x4xbf16> to vector<17x1x4xbf16>
    tpu.vector_store %arg9[%c0_17, %c17, %c0_18], %28 {strides = array<i32>} : memref<17x18x4xbf16, #tpu.memory_space<vmem>>, vector<17x1x4xbf16>,
    %c0_19 = arith.constant 0 : index
    %c1 = arith.constant 1 : index
    %c0_20 = arith.constant 0 : index
    %29 = vector.load %arg9[%c0_19, %c1, %c0_20] : memref<17x18x4xbf16, #tpu.memory_space<vmem>>, vector<1x16x4xbf16>
    %30 = vector.shape_cast %29 : vector<1x16x4xbf16> to vector<16x4xbf16>
    %31 = vector.shape_cast %5 : vector<16x4xbf16> to vector<1x16x4xbf16>
    tpu.vector_store %arg9[%c0_19, %c1, %c0_20], %31 {strides = array<i32>} : memref<17x18x4xbf16, #tpu.memory_space<vmem>>, vector<1x16x4xbf16>,
    %c16 = arith.constant 16 : index
    %c1_21 = arith.constant 1 : index
    %c0_22 = arith.constant 0 : index
    %32 = vector.load %arg9[%c16, %c1_21, %c0_22] : memref<17x18x4xbf16, #tpu.memory_space<vmem>>, vector<1x16x4xbf16>
    %33 = vector.shape_cast %32 : vector<1x16x4xbf16> to vector<16x4xbf16>
    %34 = vector.shape_cast %10 : vector<16x4xbf16> to vector<1x16x4xbf16>
    tpu.vector_store %arg9[%c16, %c1_21, %c0_22], %34 {strides = array<i32>} : memref<17x18x4xbf16, #tpu.memory_space<vmem>>, vector<1x16x4xbf16>,
    %c1_23 = arith.constant 1 : index
    %c1_24 = arith.constant 1 : index
    %c0_25 = arith.constant 0 : index
    %35 = vector.load %arg9[%c1_23, %c1_24, %c0_25] : memref<17x18x4xbf16, #tpu.memory_space<vmem>>, vector<15x16x4xbf16>
    tpu.vector_store %arg9[%c1_23, %c1_24, %c0_25], %20 {strides = array<i32>} : memref<17x18x4xbf16, #tpu.memory_space<vmem>>, vector<15x16x4xbf16>,
    %c0_26 = arith.constant 0 : index
    %c0_27 = arith.constant 0 : index
    %c0_28 = arith.constant 0 : index
    %36 = vector.load %arg9[%c0_26, %c0_27, %c0_28] : memref<17x18x4xbf16, #tpu.memory_space<vmem>>, vector<15x16x4xbf16>
    %37 = vector.shape_cast %36 : vector<15x16x4xbf16> to vector<240x4xbf16>
    %c0_29 = arith.constant 0 : index
    %c0_30 = arith.constant 0 : index
    %38 = vector.load %arg10[%c0_29, %c0_30] : memref<240x36xbf16, #tpu.memory_space<vmem>>, vector<240x4xbf16>
    tpu.vector_store %arg10[%c0_29, %c0_30], %37 {strides = array<i32>} : memref<240x36xbf16, #tpu.memory_space<vmem>>, vector<240x4xbf16>,
    %c0_31 = arith.constant 0 : index
    %c1_32 = arith.constant 1 : index
    %c0_33 = arith.constant 0 : index
    %39 = vector.load %arg9[%c0_31, %c1_32, %c0_33] : memref<17x18x4xbf16, #tpu.memory_space<vmem>>, vector<15x16x4xbf16>
    %40 = vector.shape_cast %39 : vector<15x16x4xbf16> to vector<240x4xbf16>
    %c0_34 = arith.constant 0 : index
    %c4 = arith.constant 4 : index
    %41 = vector.load %arg10[%c0_34, %c4] : memref<240x36xbf16, #tpu.memory_space<vmem>>, vector<240x4xbf16>
    tpu.vector_store %arg10[%c0_34, %c4], %40 {strides = array<i32>} : memref<240x36xbf16, #tpu.memory_space<vmem>>, vector<240x4xbf16>,
    %c0_35 = arith.constant 0 : index
    %c2 = arith.constant 2 : index
    %c0_36 = arith.constant 0 : index
    %42 = vector.load %arg9[%c0_35, %c2, %c0_36] : memref<17x18x4xbf16, #tpu.memory_space<vmem>>, vector<15x16x4xbf16>
    %43 = vector.shape_cast %42 : vector<15x16x4xbf16> to vector<240x4xbf16>
    %c0_37 = arith.constant 0 : index
    %c8 = arith.constant 8 : index
    %44 = vector.load %arg10[%c0_37, %c8] : memref<240x36xbf16, #tpu.memory_space<vmem>>, vector<240x4xbf16>
    tpu.vector_store %arg10[%c0_37, %c8], %43 {strides = array<i32>} : memref<240x36xbf16, #tpu.memory_space<vmem>>, vector<240x4xbf16>,
    %c1_38 = arith.constant 1 : index
    %c0_39 = arith.constant 0 : index
    %c0_40 = arith.constant 0 : index
    %45 = vector.load %arg9[%c1_38, %c0_39, %c0_40] : memref<17x18x4xbf16, #tpu.memory_space<vmem>>, vector<15x16x4xbf16>
    %46 = vector.shape_cast %45 : vector<15x16x4xbf16> to vector<240x4xbf16>
    %c0_41 = arith.constant 0 : index
    %c12 = arith.constant 12 : index
    %47 = vector.load %arg10[%c0_41, %c12] : memref<240x36xbf16, #tpu.memory_space<vmem>>, vector<240x4xbf16>
    tpu.vector_store %arg10[%c0_41, %c12], %46 {strides = array<i32>} : memref<240x36xbf16, #tpu.memory_space<vmem>>, vector<240x4xbf16>,
    %c1_42 = arith.constant 1 : index
    %c1_43 = arith.constant 1 : index
    %c0_44 = arith.constant 0 : index
    %48 = vector.load %arg9[%c1_42, %c1_43, %c0_44] : memref<17x18x4xbf16, #tpu.memory_space<vmem>>, vector<15x16x4xbf16>
    %49 = vector.shape_cast %48 : vector<15x16x4xbf16> to vector<240x4xbf16>
    %c0_45 = arith.constant 0 : index
    %c16_46 = arith.constant 16 : index
    %50 = vector.load %arg10[%c0_45, %c16_46] : memref<240x36xbf16, #tpu.memory_space<vmem>>, vector<240x4xbf16>
    tpu.vector_store %arg10[%c0_45, %c16_46], %49 {strides = array<i32>} : memref<240x36xbf16, #tpu.memory_space<vmem>>, vector<240x4xbf16>,
    %c1_47 = arith.constant 1 : index
    %c2_48 = arith.constant 2 : index
    %c0_49 = arith.constant 0 : index
    %51 = vector.load %arg9[%c1_47, %c2_48, %c0_49] : memref<17x18x4xbf16, #tpu.memory_space<vmem>>, vector<15x16x4xbf16>
    %52 = vector.shape_cast %51 : vector<15x16x4xbf16> to vector<240x4xbf16>
    %c0_50 = arith.constant 0 : index
    %c20 = arith.constant 20 : index
    %53 = vector.load %arg10[%c0_50, %c20] : memref<240x36xbf16, #tpu.memory_space<vmem>>, vector<240x4xbf16>
    tpu.vector_store %arg10[%c0_50, %c20], %52 {strides = array<i32>} : memref<240x36xbf16, #tpu.memory_space<vmem>>, vector<240x4xbf16>,
    %c2_51 = arith.constant 2 : index
    %c0_52 = arith.constant 0 : index
    %c0_53 = arith.constant 0 : index
    %54 = vector.load %arg9[%c2_51, %c0_52, %c0_53] : memref<17x18x4xbf16, #tpu.memory_space<vmem>>, vector<15x16x4xbf16>
    %55 = vector.shape_cast %54 : vector<15x16x4xbf16> to vector<240x4xbf16>
    %c0_54 = arith.constant 0 : index
    %c24 = arith.constant 24 : index
    %56 = vector.load %arg10[%c0_54, %c24] : memref<240x36xbf16, #tpu.memory_space<vmem>>, vector<240x4xbf16>
    tpu.vector_store %arg10[%c0_54, %c24], %55 {strides = array<i32>} : memref<240x36xbf16, #tpu.memory_space<vmem>>, vector<240x4xbf16>,
    %c2_55 = arith.constant 2 : index
    %c1_56 = arith.constant 1 : index
    %c0_57 = arith.constant 0 : index
    %57 = vector.load %arg9[%c2_55, %c1_56, %c0_57] : memref<17x18x4xbf16, #tpu.memory_space<vmem>>, vector<15x16x4xbf16>
    %58 = vector.shape_cast %57 : vector<15x16x4xbf16> to vector<240x4xbf16>
    %c0_58 = arith.constant 0 : index
    %c28 = arith.constant 28 : index
    %59 = vector.load %arg10[%c0_58, %c28] : memref<240x36xbf16, #tpu.memory_space<vmem>>, vector<240x4xbf16>
    tpu.vector_store %arg10[%c0_58, %c28], %58 {strides = array<i32>} : memref<240x36xbf16, #tpu.memory_space<vmem>>, vector<240x4xbf16>,
    %c2_59 = arith.constant 2 : index
    %c2_60 = arith.constant 2 : index
    %c0_61 = arith.constant 0 : index
    %60 = vector.load %arg9[%c2_59, %c2_60, %c0_61] : memref<17x18x4xbf16, #tpu.memory_space<vmem>>, vector<15x16x4xbf16>
    %61 = vector.shape_cast %60 : vector<15x16x4xbf16> to vector<240x4xbf16>
    %c0_62 = arith.constant 0 : index
    %c32 = arith.constant 32 : index
    %62 = vector.load %arg10[%c0_62, %c32] : memref<240x36xbf16, #tpu.memory_space<vmem>>, vector<240x4xbf16>
    tpu.vector_store %arg10[%c0_62, %c32], %61 {strides = array<i32>} : memref<240x36xbf16, #tpu.memory_space<vmem>>, vector<240x4xbf16>,
    %c0_63 = arith.constant 0 : index
    %c0_64 = arith.constant 0 : index
    %63 = vector.load %arg10[%c0_63, %c0_64] : memref<240x36xbf16, #tpu.memory_space<vmem>>, vector<240x36xbf16>
    %c0_65 = arith.constant 0 : index
    %c0_66 = arith.constant 0 : index
    %64 = vector.load %arg5[%c0_65, %c0_66] : memref<36x16xbf16, #tpu.memory_space<vmem>>, vector<36x16xbf16>
    %cst_67 = arith.constant dense<0.000000e+00> : vector<240x16xf32>
    %65 = tpu.matmul %63, %64, %cst_67 {dimension_numbers = #tpu.dot_dimension_numbers<[1], [0], [0], [1], [0, 0, 1, 1], [], []>} : vector<240x36xbf16>, vector<36x16xbf16>, vector<240x16xf32> -> vector<240x16xf32>
    %c0_68 = arith.constant 0 : index
    %c0_69 = arith.constant 0 : index
    %66 = vector.load %arg6[%c0_68, %c0_69] : memref<1x16xf32, #tpu.memory_space<vmem>>, vector<1x16xf32>
    %67 = vector.broadcast %66 : vector<1x16xf32> to vector<240x16xf32>
    %68 = arith.addf %65, %67 : vector<240x16xf32>
    %cst_70 = arith.constant 0.000000e+00 : f32
    %69 = vector.broadcast %cst_70 : f32 to vector<240x16xf32>
    %70 = arith.cmpf oge, %68, %69 : vector<240x16xf32>
    %c0_71 = arith.constant 0 : index
    %c0_72 = arith.constant 0 : index
    %71 = vector.load %arg7[%c0_71, %c0_72] : memref<1x16xf32, #tpu.memory_space<vmem>>, vector<1x16xf32>
    %72 = vector.broadcast %71 : vector<1x16xf32> to vector<240x16xf32>
    %73 = arith.mulf %72, %68 : vector<240x16xf32>
    %74 = arith.select %70, %68, %73 : vector<240x16xi1>, vector<240x16xf32>
    %75 = vector.extract_strided_slice %74 {offsets = [0, 0], sizes = [240, 8], strides = [1, 1]} : vector<240x16xf32> to vector<240x8xf32>
    %76 = vector.shape_cast %75 : vector<240x8xf32> to vector<15x16x8xf32>
    %c0_73 = arith.constant 0 : index
    %c0_74 = arith.constant 0 : index
    %c0_75 = arith.constant 0 : index
    %c0_76 = arith.constant 0 : index
    %c0_77 = arith.constant 0 : index
    %77 = vector.load %arg8[%c0_73, %c0_74, %c0_75, %c0_76, %c0_77] : memref<1x15x2x16x8xf32, #tpu.memory_space<vmem>>, vector<1x15x1x16x8xf32>
    %78 = vector.shape_cast %77 : vector<1x15x1x16x8xf32> to vector<15x16x8xf32>
    %79 = vector.shape_cast %76 : vector<15x16x8xf32> to vector<1x15x1x16x8xf32>
    tpu.vector_store %arg8[%c0_73, %c0_74, %c0_75, %c0_76, %c0_77], %79 {strides = array<i32>} : memref<1x15x2x16x8xf32, #tpu.memory_space<vmem>>, vector<1x15x1x16x8xf32>,
    %80 = vector.extract_strided_slice %74 {offsets = [0, 8], sizes = [240, 8], strides = [1, 1]} : vector<240x16xf32> to vector<240x8xf32>
    %81 = vector.shape_cast %80 : vector<240x8xf32> to vector<15x16x8xf32>
    %c0_78 = arith.constant 0 : index
    %c0_79 = arith.constant 0 : index
    %c1_80 = arith.constant 1 : index
    %c0_81 = arith.constant 0 : index
    %c0_82 = arith.constant 0 : index
    %82 = vector.load %arg8[%c0_78, %c0_79, %c1_80, %c0_81, %c0_82] : memref<1x15x2x16x8xf32, #tpu.memory_space<vmem>>, vector<1x15x1x16x8xf32>
    %83 = vector.shape_cast %82 : vector<1x15x1x16x8xf32> to vector<15x16x8xf32>
    %84 = vector.shape_cast %81 : vector<15x16x8xf32> to vector<1x15x1x16x8xf32>
    tpu.vector_store %arg8[%c0_78, %c0_79, %c1_80, %c0_81, %c0_82], %84 {strides = array<i32>} : memref<1x15x2x16x8xf32, #tpu.memory_space<vmem>>, vector<1x15x1x16x8xf32>,
    return
  }
  func.func @transform_0(%arg0: i32, %arg1: i32) -> (i32, i32, i32, i32) {
    %c0_i32 = arith.constant 0 : i32
    %c0_i32_0 = arith.constant 0 : i32
    %c0_i32_1 = arith.constant 0 : i32
    return %arg0, %arg1, %c0_i32, %c0_i32_0 : i32, i32, i32, i32
  }
  func.func @transform_1(%arg0: i32, %arg1: i32) -> (i32, i32, i32, i32) {
    %c15_i32 = arith.constant 15 : i32
    %0 = arith.muli %arg1, %c15_i32 : i32
    %c1_i32 = arith.constant 1 : i32
    %1 = arith.subi %0, %c1_i32 : i32
    %c0_i32 = arith.constant 0 : i32
    %2 = arith.maxsi %1, %c0_i32 : i32
    %c0_i32_0 = arith.constant 0 : i32
    %c0_i32_1 = arith.constant 0 : i32
    %c0_i32_2 = arith.constant 0 : i32
    return %arg0, %2, %c0_i32_0, %c0_i32_1 : i32, i32, i32, i32
  }
  func.func @transform_2(%arg0: i32, %arg1: i32) -> (i32, i32, i32, i32) {
    %c15_i32 = arith.constant 15 : i32
    %0 = arith.muli %arg1, %c15_i32 : i32
    %c15_i32_0 = arith.constant 15 : i32
    %1 = arith.addi %0, %c15_i32_0 : i32
    %c15_i32_1 = arith.constant 15 : i32
    %2 = arith.minsi %1, %c15_i32_1 : i32
    %c0_i32 = arith.constant 0 : i32
    %c0_i32_2 = arith.constant 0 : i32
    %c0_i32_3 = arith.constant 0 : i32
    return %arg0, %2, %c0_i32, %c0_i32_2 : i32, i32, i32, i32
  }
  func.func @transform_3(%arg0: i32, %arg1: i32) -> (i32, i32) {
    %c0_i32 = arith.constant 0 : i32
    %c0_i32_0 = arith.constant 0 : i32
    %c0_i32_1 = arith.constant 0 : i32
    return %c0_i32, %c0_i32_0 : i32, i32
  }
  func.func @transform_4(%arg0: i32, %arg1: i32) -> (i32, i32) {
    %c0_i32 = arith.constant 0 : i32
    %c0_i32_0 = arith.constant 0 : i32
    %c0_i32_1 = arith.constant 0 : i32
    return %c0_i32, %c0_i32_0 : i32, i32
  }
  func.func @transform_5(%arg0: i32, %arg1: i32) -> (i32, i32) {
    %c0_i32 = arith.constant 0 : i32
    %c0_i32_0 = arith.constant 0 : i32
    %c0_i32_1 = arith.constant 0 : i32
    return %c0_i32, %c0_i32_0 : i32, i32
  }
  func.func @transform_6(%arg0: i32, %arg1: i32) -> (i32, i32, i32, i32, i32) {
    %c0_i32 = arith.constant 0 : i32
    %c0_i32_0 = arith.constant 0 : i32
    %c0_i32_1 = arith.constant 0 : i32
    %c0_i32_2 = arith.constant 0 : i32
    return %arg0, %arg1, %c0_i32, %c0_i32_0, %c0_i32_1 : i32, i32, i32, i32, i32
  }
}

</mosaic_0001>

<bundles_post_ra>
// kernel: tpu_custom_call.1
= control target key start
LH: loop header
LB: loop body
LE: loop exit
PB: predicated region body
PF: predicated region fallthrough
CT: control target
= control target key end

     0   :  { %s5884_s21 = smov 0   ;;  %s5886_s22 = smov 0   ;;  %s7798_s0 = inlined_call_operand.vmem [shape: f32[2,16,16,4], index: 0, kind: input, shape index: {}]   ;;  %s7799_s1 = inlined_call_operand.vmem [shape: f32[2,16,16,4], index: 1, kind: input, shape index: {}]   ;;  %s7800_s2 = inlined_call_operand.vmem [shape: f32[2,16,16,4], index: 2, kind: input, shape index: {}]   ;;  %s7801_s3 = inlined_call_operand.vmem [shape: bf16[36,16], index: 3, kind: input, shape index: {}]   ;;  %s7802_s4 = inlined_call_operand.vmem [shape: f32[1,16], index: 4, kind: input, shape index: {}]   ;;  %s7803_s5 = inlined_call_operand.vmem [shape: f32[1,16], index: 5, kind: input, shape index: {}]   ;;  %s7804_s6 = inlined_call_operand.vmem [shape: f32[2,16,2,16,8], index: 6, kind: output, shape index: {}]  }
   0x1   :  { %s5888_s23 = smov 0   ;;  %s5890_s24 = smov 0  }
   0x2   :  { %s5892_s25 = smov 0   ;;  %s5894_s26 = smov 0  }
   0x3   :  { %s5896_s27 = smov 0  }
   0x4 LB: > { %s25_s28 = sadd.s32 1, %s5796_s25  ;;  %s28_s29 = sadd.s32 1, %s5800_s26  ;;  %s5804_s27 = sphi %s5896_s27, %s16_s27   ;;  %s5800_s26 = sphi %s5894_s26, %s7829_s26   ;;  %s5796_s25 = sphi %s5892_s25, %s7828_s25   ;;  %s5792_s24 = sphi %s5890_s24, %s7827_s24   ;;  %s5788_s23 = sphi %s5888_s23, %s7826_s23   ;;  %s5784_s22 = sphi %s5886_s22, %s7825_s22   ;;  %s5780_s21 = sphi %s5884_s21, %s7824_s21  }
   0x5   : > { %p26_p0 = scmp.ge.s32.totalorder %s25_s28, 2  ;;  %s5282_s30 = sadd.s32 4294967295, %s5804_s27  }
   0x6   : > { %p210_p1 = scmp.ne.s32.totalorder %s5784_s22, %s5780_s21  ;;  %p211_p2 = scmp.eq.s32.totalorder %s5282_s30, 3 }
   0x7   : > { %s7831_s28 = smov (%p26_p0, %s25_s28), 0  ;;  %s7833_s29 = smov (!%p26_p0, %s28_s29), %s5800_s26 }
   0x8   : > { %s196_s7 = ssub.s32 %s5796_s25, %s7831_s28  ;;  %p30_p3 = scmp.ge.s32.totalorder %s7833_s29, 2 }
   0x9   : > { %p5288_p4 = scmp.ge.s32.totalorder %s5804_s27, 1  ;;  %p5930_p5 = por %p211_p2, %p210_p1 }
   0xa   : > { %p308_p6 = scmp.lt.s32.totalorder %s5804_s27, 5  ;;  %s7835_s29 = smov (%p30_p3, %s7833_s29), 0 }
   0xb   : > { %s195_s9 = ssub.s32 %s5800_s26, %s7835_s29  ;;  %s200_s11 = sadd.s32 1, %s5784_s22 }
   0xc   : > { %p309_p7 = pnand %p5288_p4, %p308_p6  ;;  %s197_s10 = sor.u32 %s196_s7, %s195_s9 }
   0xd   : > { %p198_p8 = scmp.eq.s32.totalorder %s197_s10, 0  ;;  %s5944_s13 = smul.u32 (!%p309_p7), 15, %s5788_s23 }
   0xe   : > { %312 = sbr.rel (%p309_p7) target bundleno = 1144 (0x478), region = 44  ;;  %p379_p9 = scmp.lt.s32.totalorder (!%p309_p7), %s5792_s24, 1 }
   0xf   : > { %s5941_s12 = scalar_select %p198_p8, %s5784_s22, %s200_s11  }
  0x10   : > { %p381_p10 = scmp.lt.s32.totalorder (!%p309_p7), %s5944_s13, 15  ;;  %s5960_s16 = ssub.s32 (!%p309_p7), 16, %s5944_s13 }
  0x11   : > { %s5838_s10 = smov (!%p309_p7), 4   ;;  %s6144_s11 = sadd.s32 (!%p309_p7), 4294967295, %s5944_s13 }
  0x12   : > { %p396_p11 = scmp.gt.s32.totalorder (!%p309_p7), %s6144_s11, 0  ;;  %p5293_p12 = scmp.lt.s32.totalorder (!%p309_p7), %s6144_s11, 15 }
  0x13   : > { %vm530_vm0 = vcmask 24576   ;;  %vm531_vm1 = vsmask.f32 256  ;;  %v539_v1 = vld [vmem:[#allocation2 + $0x18] sm:$0x1]  ;;  %s380_s14 = scalar_select %p379_p9, %s5792_s24, 1  ;;  %v5981_v15 = vstv %s5960_s16 }
  0x14   : > { %vm5949_vm2 = vmand %vm530_vm0, %vm531_vm1  ;;  %vm584_vm3 = vsmask.f32 7938  ;;  %v536_v3 = vld [vmem:[#allocation2 + $0xc] sm:$0x1]  ;;  %v542_v4 = vld [vmem:[#allocation2 + $0x24] sm:$0x1] }
  0x15   : > { %v540_v2 = vsel %vm5949_vm2, 0, %v539_v1  ;;  %s5957_s15 = sshll.u32 %s380_s14, 5  ;;  %v537_v5 = vsel %vm5949_vm2, 0, %v536_v3  ;;  %v543_v6 = vsel %vm5949_vm2, 0, %v542_v4  ;;  %v589_v7 = vld [vmem:[#allocation2 + $0x14] sm:$0x1]  ;;  %vm5969_vm4 = vmand %vm530_vm0, %vm584_vm3 }
  0x16   : > { %541 = vst [vmem:[#allocation2 + $0x18] sm:$0x1] %v540_v2  ;;  %s382_s17 = scalar_select %p381_p10, %s5944_s13, 15  ;;  %538 = vst [vmem:[#allocation2 + $0xc] sm:$0x1] %v537_v5  ;;  %v590_v9 = vsel %vm5969_vm4, 0, %v589_v7 }
  0x17   : > { %544 = vst [vmem:[#allocation2 + $0x24] sm:$0x1] %v543_v6  ;;  %v545_v10 = vld [vmem:[#allocation2 + $0x30] sm:$0x1]  ;;  %v592_v11 = vld [vmem:[#allocation2 + $0x20] sm:$0x1] }
  0x18   : > { %s5289_s18 = sshll.u32 %s382_s17, 1  ;;  %591 = vst [vmem:[#allocation2 + $0x14] sm:$0x1] %v590_v9  ;;  %v546_v12 = vsel %vm5949_vm2, 0, %v545_v10  ;;  %v593_v13 = vsel %vm5969_vm4, 0, %v592_v11  ;;  %vm501_vm5 = vcmp.gt.s32.totalorder %v5981_v15, 1 }
  0x19   : > { %v548_v14 = vld [vmem:[#allocation2 + $0x3c] sm:$0x1]  ;;  %s385_s19 = sadd.s32 %s5957_s15, %s5289_s18  ;;  %547 = vst [vmem:[#allocation2 + $0x30] sm:$0x1] %v546_v12  ;;  %594 = vst [vmem:[#allocation2 + $0x20] sm:$0x1] %v593_v13 }
  0x1a   : > { %v549_v16 = vsel %vm5949_vm2, 0, %v548_v14  ;;  %v595_v17 = vld [vmem:[#allocation2 + $0x2c] sm:$0x1]  ;;  %v551_v18 = vld [vmem:[#allocation2 + $0x48] sm:$0x1]  ;;  %s5291_s20 = sshll.u32 %s385_s19, 3 }
  0x1b   : > { %550 = vst [vmem:[#allocation2 + $0x3c] sm:$0x1] %v549_v16  ;;  %v596_v19 = vsel %vm5969_vm4, 0, %v595_v17  ;;  %v552_v20 = vsel %vm5949_vm2, 0, %v551_v18  ;;  %v598_v21 = vld [vmem:[#allocation2 + $0x38] sm:$0x1]  ;;  %s5992_s9 = scalar_lea.vmem %s7798_s0, %s5291_s20 }
  0x1c   : > { %597 = vst [vmem:[#allocation2 + $0x2c] sm:$0x1] %v596_v19  ;;  %553 = vst [vmem:[#allocation2 + $0x48] sm:$0x1] %v552_v20  ;;  %v599_v22 = vsel %vm5969_vm4, 0, %v598_v21  ;;  %v454_v24 = vld [vmem:[%s5992_s9 + $0x10] sm:$0xff] }
  0x1d   : > { %v554_v23 = vld [vmem:[#allocation2 + $0x54] sm:$0x1]  ;;  %v455_v25 = vld [vmem:[%s5992_s9 + $0x18] sm:$0xff]  ;;  %v452_v26 = vld [vmem:[%s5992_s9] sm:$0xff]  ;;  %600 = vst [vmem:[#allocation2 + $0x38] sm:$0x1] %v599_v22 }
  0x1e   : > { %v555_v27 = vsel %vm5949_vm2, 0, %v554_v23  ;;  %v483_v28 = vpack.c.bf16 %v455_v25, %v454_v24  ;;  %v453_v29 = vld [vmem:[%s5992_s9 + $0x8] sm:$0xff]  ;;  %vm500_vm6 = vcmp.gt.s32.totalorder %v5981_v15, 0  ;;  %v456_v30 = vld [vmem:[%s5992_s9 + $0x20] sm:$0xff]  ;;  %vm642_vm7 = vsmask.f32 4368 }
  0x1f   : > { %556 = vst [vmem:[#allocation2 + $0x54] sm:$0x1] %v555_v27  ;;  %vm664_vm8 = vcmask 27648   ;;  %v482_v31 = vpack.c.bf16 %v453_v29, %v452_v26  ;;  %v457_v32 = vld [vmem:[%s5992_s9 + $0x28] sm:$0xff]  ;;  %vm502_vm9 = vcmp.gt.s32.totalorder %v5981_v15, 2  ;;  %v458_v33 = vld [vmem:[%s5992_s9 + $0x30] sm:$0xff]  ;;  %vm6017_vm12 = vmor %vm531_vm1, %vm642_vm7 }
  0x20   : > { %v516_v34 = vsel %vm501_vm5, %v483_v28, 0  ;;  %v484_v35 = vpack.c.bf16 %v457_v32, %v456_v30  ;;  %v459_v36 = vld [vmem:[%s5992_s9 + $0x38] sm:$0xff]  ;;  %vm503_vm10 = vcmp.gt.s32.totalorder %v5981_v15, 3  ;;  %v460_v37 = vld [vmem:[%s5992_s9 + $0x40] sm:$0xff]  ;;  %vm504_vm11 = vcmp.gt.s32.totalorder %v5981_v15, 4  ;;  %v461_v42 = vld [vmem:[%s5992_s9 + $0x48] sm:$0xff] }
  0x21   : > { %v5313_v38 = vcombine.low %v516_v34, %v516_v34  ;;  %v5314_v39 = vcombine.high %v516_v34, %v516_v34  ;;  %v515_v40 = vsel %vm500_vm6, %v482_v31, 0  ;;  %v485_v41 = vpack.c.bf16 %v459_v36, %v458_v33  ;;  %vm6023_vm13 = vmand %vm664_vm8, %vm584_vm3  ;;  %v1090_v61 = vld [vmem:[#allocation2 + $0x18] sm:$0xf]  ;;  %v1083_v6 = vld [vmem:[#allocation2 + $0xc] sm:$0xf]  ;;  %s6168_s14 = scalar_select %p396_p11, %s6144_s11, 0 }
  0x22   : > { %v5311_v43 = vcombine.low %v515_v40, %v515_v40  ;;  %v5312_v44 = vcombine.high %v515_v40, %v515_v40  ;;  %v517_v45 = vsel %vm502_vm9, %v484_v35, 0  ;;  %v486_v46 = vpack.c.bf16 %v461_v42, %v460_v37  ;;  %v1087_v18 = vld [vmem:[#allocation2 + $0x14] sm:$0x1]  ;;  %v1097_v22 = vld [vmem:[#allocation2 + $0x24] sm:$0xf]  ;;  %v6058_v42 = vld [vmem:[%s5992_s9 + $0x58] sm:$0xff] }
  0x23   : > { %v800_v47 = vshrl.u32 %v5313_v38, 16  ;;  %v803_v48 = vshll.u32 %v5313_v38, 16  ;;  %v808_v49 = vshrl.u32 %v5314_v39, 16  ;;  %v811_v50 = vshll.u32 %v5314_v39, 16  ;;  %v1094_v28 = vld [vmem:[#allocation2 + $0x20] sm:$0x1] }
  0x24   : > { %v783_v51 = vshrl.u32 %v5311_v43, 16  ;;  %v786_v52 = vshll.u32 %v5311_v43, 16  ;;  %v791_v53 = vshrl.u32 %v5312_v44, 16  ;;  %v794_v54 = vshll.u32 %v5312_v44, 16  ;;  %s7837_s14 = smov (!%p5293_p12, %s6168_s14), 15  ;;  %p436_p13 = scmp.gt.s32.totalorder %s5788_s23, 0 }
  0x25   : > { %v802_v56 = vrot.slane %v800_v47, 7  ;;  %v810_v57 = vrot.slane %v808_v49, 7  ;;  %v5315_v58 = vcombine.low %v517_v45, %v517_v45  ;;  %v5316_v59 = vcombine.high %v517_v45, %v517_v45  ;;  %s5298_s17 = sshll.u32 %s7837_s14, 1  ;;  %s5839_s14 = smov 8  }
  0x26   : > { %v785_v62 = vrot.slane %v783_v51, 7  ;;  %v793_v63 = vrot.slane %v791_v53, 7  ;;  %v518_v1 = vsel %vm503_vm10, %v485_v41, 0  ;;  %v519_v2 = vsel %vm504_vm11, %v486_v46, 0  ;;  %v6055_v41 = vld [vmem:[%s5992_s9 + $0x50] sm:$0xff]  ;;  %s6221_s18 = sadd.s32 %s5298_s17, %s5957_s15  ;;  %s5841_s17 = smov 16  }
  0x27   : > { %v805_v3 = vor.u32 %v803_v48, %v802_v56  ;;  %v806_v4 = vrot.slane %v802_v56, 4  ;;  %v813_v5 = vor.u32 %v811_v50, %v810_v57  ;;  %v817_v7 = vshrl.u32 %v5315_v58, 16  ;;  %v1104_v48 = vld [vmem:[#allocation2 + $0x30] sm:$0xf]  ;;  %s5300_s19 = sshll.u32 %s6221_s18, 3  ;;  %s5843_s20 = smov 20  }
  0x28   : > { %v788_v9 = vor.u32 %v786_v52, %v785_v62  ;;  %v789_v10 = vrot.slane %v785_v62, 4  ;;  %v796_v11 = vor.u32 %v794_v54, %v793_v63  ;;  %v820_v12 = vshll.u32 %v5315_v58, 16  ;;  %s406_s7 = scalar_lea.vmem %s7799_s1, %s5300_s19  ;;  %s5845_s19 = smov 28  }
  0x29   : > { %v814_v13 = vsel %vm6017_vm12, %v806_v4, %v813_v5  ;;  %v1091_v14 = vsel %vm6023_vm13, %v805_v3, %v1090_v61  ;;  %v819_v16 = vrot.slane %v817_v7, 7  ;;  %v825_v17 = vshrl.u32 %v5316_v59, 16  ;;  %s440_s11 = scalar_select %p436_p13, 1, 0 }
  0x2a   : > { %1092 = vst [vmem:[#allocation2 + $0x18] sm:$0xf] %v1091_v14  ;;  %1093 = vst.msk [vmem:[#allocation2 + $0x1c] sm:$0xf] %vm664_vm8, %v814_v13  ;;  %v797_v19 = vsel %vm6017_vm12, %v789_v10, %v796_v11  ;;  %v1084_v20 = vsel %vm6023_vm13, %v788_v9, %v1083_v6  ;;  %v828_v21 = vshll.u32 %v5316_v59, 16  ;;  %v798_v23 = vrot.slane %v793_v63, 4 }
  0x2b   : > { %1085 = vst [vmem:[#allocation2 + $0xc] sm:$0xf] %v1084_v20  ;;  %1086 = vst.msk [vmem:[#allocation2 + $0x10] sm:$0xf] %vm664_vm8, %v797_v19  ;;  %v822_v24 = vor.u32 %v820_v12, %v819_v16  ;;  %v823_v25 = vrot.slane %v819_v16, 4  ;;  %v6041_v26 = vrot.slane %v825_v17, 7  ;;  %v5317_v27 = vcombine.low %v518_v1, %v518_v1 }
  0x2c   : > { %vm1293_vm14 = vsmask.f32 3328  ;;  %vm1294_vm15 = vsmask.f32 7440  ;;  %v1088_v29 = vsel %vm5949_vm2, %v798_v23, %v1087_v18  ;;  %v5318_v30 = vcombine.high %v518_v1, %v518_v1  ;;  %s5847_s30 = smov 32   ;;  %p444_p1 = scmp.lt.s32.totalorder %s5788_s23, 1 }
  0x2d   : > { %v815_v31 = vrot.slane %v810_v57, 4  ;;  %v6045_v32 = vcombine.low %v519_v2, %v519_v2  ;;  %v830_v33 = vor.u32 %v828_v21, %v6041_v26  ;;  %v1098_v34 = vsel %vm6023_vm13, %v822_v24, %v1097_v22  ;;  %1089 = vst [vmem:[#allocation2 + $0x14] sm:$0x1] %v1088_v29  ;;  %vm6080_vm1 = vmor %vm1293_vm14, %vm1294_vm15  ;;  %p4766_p2 = scmp.lt.s32.totalorder (%p5930_p5), %s5960_s16, 15 }
  0x2e   : > { %v834_v35 = vshrl.u32 %v5317_v27, 16  ;;  %v837_v36 = vshll.u32 %v5317_v27, 16  ;;  %1099 = vst [vmem:[#allocation2 + $0x24] sm:$0xf] %v1098_v34  ;;  %v842_v37 = vshrl.u32 %v5318_v30, 16  ;;  %v845_v38 = vshll.u32 %v5318_v30, 16 }
  0x2f   : > { %v1095_v39 = vsel %vm5949_vm2, %v815_v31, %v1094_v28  ;;  %v6052_v40 = vcombine.high %v519_v2, %v519_v2  ;;  %v831_v43 = vsel %vm6017_vm12, %v823_v25, %v830_v33  ;;  %v851_v45 = vshrl.u32 %v6045_v32, 16 }
  0x30   : > { %v836_v44 = vrot.slane %v834_v35, 7  ;;  %1096 = vst [vmem:[#allocation2 + $0x20] sm:$0x1] %v1095_v39  ;;  %v854_v46 = vshll.u32 %v6045_v32, 16  ;;  %1100 = vst.msk [vmem:[#allocation2 + $0x28] sm:$0xf] %vm664_vm8, %v831_v43  ;;  %v487_v58 = vpack.c.bf16 %v6058_v42, %v6055_v41 }
  0x31   : > { %v6065_v47 = vrot.slane %v842_v37, 7  ;;  %v859_v49 = vshrl.u32 %v6052_v40, 16  ;;  %v862_v50 = vshll.u32 %v6052_v40, 16  ;;  %v832_v51 = vrot.slane %v6041_v26, 4  ;;  %v1254_v52 = vld [vmem:[#allocation2 + $0x18] sm:$0xf] }
  0x32   : > { %v1255_v53 = vld [vmem:[#allocation2 + $0x1c] sm:$0xf]  ;;  %v839_v54 = vor.u32 %v837_v36, %v836_v44  ;;  %v840_v56 = vrot.slane %v836_v44, 4  ;;  %v6070_v57 = vrot.slane %v851_v45, 7  ;;  %v1345_v59 = vshrl.u32 %v1254_v52, 16 }
  0x33   : > { %v1348_v61 = vshll.u32 %v1254_v52, 16  ;;  %v1354_v62 = vshll.u32 %v1255_v53, 16  ;;  %v1358_v63 = vshrl.u32 %v1255_v53, 16  ;;  %v1251_v1 = vld [vmem:[#allocation2 + $0xc] sm:$0xf]  ;;  %v847_v5 = vor.u32 %v845_v38, %v6065_v47 }
  0x34   : > { %v1252_v2 = vld [vmem:[#allocation2 + $0x10] sm:$0xf]  ;;  %v1321_v3 = vshrl.u32 %v1251_v1, 16  ;;  %v1324_v4 = vshll.u32 %v1251_v1, 16  ;;  %v1105_v6 = vsel %vm6023_vm13, %v839_v54, %v1104_v48  ;;  %v1347_v7 = vrot.slane %v1345_v59, 4 }
  0x35   : > { %v1350_v9 = vrot.slane %v1348_v61, 5  ;;  %v1356_v10 = vrot.slane %v1354_v62, 5  ;;  %v1360_v11 = vrot.slane %v1358_v63, 4  ;;  %v1253_v12 = vld [vmem:[#allocation2 + $0x14] sm:$0x1]  ;;  %v1330_v16 = vshll.u32 %v1252_v2, 16 }
  0x36   : > { %1106 = vst [vmem:[#allocation2 + $0x30] sm:$0xf] %v1105_v6  ;;  %v1323_v13 = vrot.slane %v1321_v3, 4  ;;  %v1326_v14 = vrot.slane %v1324_v4, 5  ;;  %v1334_v17 = vshrl.u32 %v1252_v2, 16  ;;  %vm505_vm0 = vcmp.gt.s32.totalorder %v5981_v15, 5 }
  0x37   : > { %v1257_v18 = vld [vmem:[#allocation2 + $0x24] sm:$0xf]  ;;  %v1351_v19 = vor.u32 %v1350_v9, %v1347_v7  ;;  %v1340_v22 = vshll.u32 %v1253_v12, 16  ;;  %v1332_v25 = vrot.slane %v1330_v16, 5  ;;  %v1258_v28 = vld [vmem:[#allocation2 + $0x28] sm:$0xf]  ;;  %v848_v29 = vsel %vm6017_vm12, %v840_v56, %v847_v5 }
  0x38   : > { %v1369_v20 = vshrl.u32 %v1257_v18, 16  ;;  %v1372_v21 = vshll.u32 %v1257_v18, 16  ;;  %v1327_v24 = vor.u32 %v1326_v14, %v1323_v13  ;;  %v1336_v27 = vrot.slane %v1334_v17, 4  ;;  %1107 = vst.msk [vmem:[#allocation2 + $0x34] sm:$0xf] %vm664_vm8, %v848_v29 }
  0x39   : > { %v1352_v30 = vrot.slane %v1351_v19, 4  ;;  %v1378_v34 = vshll.u32 %v1258_v28, 16  ;;  %v1256_v35 = vld [vmem:[#allocation2 + $0x20] sm:$0x1]  ;;  %v1382_v37 = vshrl.u32 %v1258_v28, 16  ;;  %v1342_v39 = vrot.slane %v1340_v22, 5 }
  0x3a   : > { %v1371_v31 = vrot.slane %v1369_v20, 4  ;;  %v1374_v33 = vrot.slane %v1372_v21, 5  ;;  %v1328_v36 = vrot.slane %v1327_v24, 4  ;;  %v1337_v38 = vor.u32 %v1336_v27, %v1332_v25  ;;  %v1111_v61 = vld [vmem:[#allocation2 + $0x3c] sm:$0xf]  ;;  %v464_v20 = vld [vmem:[%s5992_s9 + $0x60] sm:$0xff] }
  0x3b   : > { %v1357_v43 = vsel %vm6080_vm1, %v1352_v30, %v1356_v10  ;;  %v1380_v45 = vrot.slane %v1378_v34, 5  ;;  %v1361_v48 = vor.u32 %v1360_v11, %v1356_v10  ;;  %v1364_v56 = vshll.u32 %v1256_v35, 16  ;;  %v1101_v3 = vld [vmem:[#allocation2 + $0x2c] sm:$0x1]  ;;  %v601_v22 = vld [vmem:[#allocation2 + $0x44] sm:$0x1] }
  0x3c   : > { %v1375_v44 = vor.u32 %v1374_v33, %v1371_v31  ;;  %1664 = vrot.lane.b32.xlu0 %v1357_v43, %s5838_s10  ;;  %v1333_v52 = vsel %vm6080_vm1, %v1328_v36, %v1332_v25  ;;  %v1338_v53 = vrot.slane %v1337_v38, 4  ;;  %v856_v59 = vor.u32 %v854_v46, %v6070_v57  ;;  %v465_v21 = vld [vmem:[%s5992_s9 + $0x68] sm:$0xff]  ;;  %v466_v27 = vld [vmem:[%s5992_s9 + $0x70] sm:$0xff]  ;;  %v467_v28 = vld [vmem:[%s5992_s9 + $0x78] sm:$0xff] }
  0x3d   : > { %v1260_v54 = vld [vmem:[#allocation2 + $0x30] sm:$0xf]  ;;  %1660 = vrot.lane.b32.xlu1 %v1333_v52, %s5838_s10  ;;  %v1362_v2 = vrot.slane %v1361_v48, 4  ;;  %v1366_v5 = vrot.slane %v1364_v56, 5  ;;  %v857_v6 = vrot.slane %v6070_v57, 4  ;;  %v6101_v7 = vrot.slane %v859_v49, 7 }
  0x3e   : > { %v1376_v62 = vrot.slane %v1375_v44, 4  ;;  %v1393_v63 = vshrl.u32 %v1260_v54, 16  ;;  %v1396_v1 = vshll.u32 %v1260_v54, 16  ;;  %v1343_v4 = vsel %vm6080_vm1, %v1338_v53, %v1342_v39  ;;  %v557_v33 = vld [vmem:[#allocation2 + $0x60] sm:$0x1] }
  0x3f   : > { %vm506_vm3 = vcmp.gt.s32.totalorder %v5981_v15, 6  ;;  %vm507_vm5 = vcmp.gt.s32.totalorder %v5981_v15, 7  ;;  %v1112_v10 = vsel %vm6023_vm13, %v856_v59, %v1111_v61  ;;  %v1261_v11 = vld [vmem:[#allocation2 + $0x34] sm:$0xf]  ;;  %v1367_v57 = vsel %vm6080_vm1, %v1362_v2, %v1366_v5  ;;  %v1118_v36 = vld [vmem:[#allocation2 + $0x48] sm:$0xf] }
  0x40   : > { %v1381_v32 = vsel %vm6080_vm1, %v1376_v62, %v1380_v45  ;;  %v1395_v46 = vrot.slane %v1393_v63, 4  ;;  %v1398_v9 = vrot.slane %v1396_v1, 5  ;;  %v864_v49 = vor.u32 %v862_v50, %v6101_v7  ;;  %1113 = vst [vmem:[#allocation2 + $0x3c] sm:$0xf] %v1112_v10  ;;  %v1108_v50 = vld [vmem:[#allocation2 + $0x38] sm:$0x1] }
  0x41   : > { %1668 = vrot.lane.b32.xlu0 %v1381_v32, %s5838_s10  ;;  %v1102_v12 = vsel %vm5949_vm2, %v832_v51, %v1101_v3  ;;  %v1384_v13 = vrot.slane %v1382_v37, 4  ;;  %1662 = vrot.lane.b32.xlu1 %v1343_v4, %s5838_s10  ;;  %v1402_v16 = vshll.u32 %v1261_v11, 16  ;;  %v1406_v17 = vshrl.u32 %v1261_v11, 16 }
  0x42   : > { %v1399_v14 = vor.u32 %v1398_v9, %v1395_v46  ;;  %1103 = vst [vmem:[#allocation2 + $0x2c] sm:$0x1] %v1102_v12  ;;  %v520_v40 = vsel %vm505_vm0, %v487_v58, 0  ;;  %v865_v26 = vsel %vm6017_vm12, %v857_v6, %v864_v49  ;;  %v849_v41 = vrot.slane %v6065_v47, 4 }
  0x43   : > { %v1385_v51 = vor.u32 %v1384_v13, %v1380_v45  ;;  %v5321_v18 = vcombine.low %v520_v40, %v520_v40  ;;  %v5322_v19 = vcombine.high %v520_v40, %v520_v40  ;;  %v1404_v25 = vrot.slane %v1402_v16, 5  ;;  %1114 = vst.msk [vmem:[#allocation2 + $0x40] sm:$0xf] %vm664_vm8, %v865_v26 }
  0x44   : > { %v1400_v24 = vrot.slane %v1399_v14, 4  ;;  %v1408_v42 = vrot.slane %v1406_v17, 4  ;;  %v1109_v37 = vsel %vm5949_vm2, %v849_v41, %v1108_v50  ;;  %v488_v43 = vpack.c.bf16 %v465_v21, %v464_v20 }
  0x45   : > { %v1386_v58 = vrot.slane %v1385_v51, 4  ;;  %v868_v29 = vshrl.u32 %v5321_v18, 16  ;;  %v871_v30 = vshll.u32 %v5321_v18, 16  ;;  %v876_v31 = vshrl.u32 %v5322_v19, 16  ;;  %1666 = vrot.lane.b32.xlu1 %v1367_v57, %s5838_s10  ;;  %1110 = vst [vmem:[#allocation2 + $0x38] sm:$0x1] %v1109_v37 }
  0x46   : > { %v1405_v34 = vsel %vm6080_vm1, %v1400_v24, %v1404_v25  ;;  %v879_v35 = vshll.u32 %v5322_v19, 16  ;;  %v1409_v47 = vor.u32 %v1408_v42, %v1404_v25  ;;  %v602_v44 = vsel %vm5969_vm4, 0, %v601_v22  ;;  %v1125_v24 = vld [vmem:[#allocation2 + $0x54] sm:$0xf] }
  0x47   : > { %1672 = vrot.lane.b32.xlu0 %v1405_v34, %s5838_s10  ;;  %v870_v38 = vrot.slane %v868_v29, 7  ;;  %v6139_v39 = vrot.slane %v876_v31, 7  ;;  %v1263_v45 = vld [vmem:[#allocation2 + $0x3c] sm:$0xf]  ;;  %603 = vst [vmem:[#allocation2 + $0x44] sm:$0x1] %v602_v44  ;;  %v489_v53 = vpack.c.bf16 %v467_v28, %v466_v27 }
  0x48   : > { %v6146_v48 = vrot.slane %v1409_v47, 4  ;;  %v866_v52 = vrot.slane %v6101_v7, 4  ;;  %v558_v54 = vsel %vm5949_vm2, 0, %v557_v33  ;;  %v1417_v56 = vshrl.u32 %v1263_v45, 16  ;;  %v468_v44 = vld [vmem:[%s5992_s9 + $0x80] sm:$0xff] }
  0x49   : > { %v1420_v59 = vshll.u32 %v1263_v45, 16  ;;  %v1259_v61 = vld [vmem:[#allocation2 + $0x2c] sm:$0x1]  ;;  %v873_v62 = vor.u32 %v871_v30, %v870_v38  ;;  %v874_v63 = vrot.slane %v870_v38, 4  ;;  %559 = vst [vmem:[#allocation2 + $0x60] sm:$0x1] %v558_v54  ;;  %v881_v2 = vor.u32 %v879_v35, %v6139_v39 }
  0x4a   : > { %v1388_v1 = vshll.u32 %v1259_v61, 16  ;;  %v521_v3 = vsel %vm506_vm3, %v488_v43, 0  ;;  %v522_v4 = vsel %vm507_vm5, %v489_v53, 0  ;;  %v1264_v5 = vld [vmem:[#allocation2 + $0x40] sm:$0xf]  ;;  %v1419_v6 = vrot.slane %v1417_v56, 4 }
  0x4b   : > { %v1422_v7 = vrot.slane %v1420_v59, 5  ;;  %v1119_v32 = vsel %vm6023_vm13, %v873_v62, %v1118_v36  ;;  %v5323_v46 = vcombine.low %v521_v3, %v521_v3  ;;  %v1426_v9 = vshll.u32 %v1264_v5, 16  ;;  %v604_v35 = vld [vmem:[#allocation2 + $0x50] sm:$0x1]  ;;  %v469_v59 = vld [vmem:[%s5992_s9 + $0x88] sm:$0xff] }
  0x4c   : > { %v1430_v10 = vshrl.u32 %v1264_v5, 16  ;;  %v1390_v11 = vrot.slane %v1388_v1, 5  ;;  %v882_v57 = vsel %vm6017_vm12, %v874_v63, %v881_v2  ;;  %1120 = vst [vmem:[#allocation2 + $0x48] sm:$0xf] %v1119_v32  ;;  %v5324_v12 = vcombine.high %v521_v3, %v521_v3  ;;  %v1262_v40 = vld [vmem:[#allocation2 + $0x38] sm:$0x1] }
  0x4d   : > { %v1423_v49 = vor.u32 %v1422_v7, %v1419_v6  ;;  %1121 = vst.msk [vmem:[#allocation2 + $0x4c] sm:$0xf] %vm664_vm8, %v882_v57  ;;  %v885_v13 = vshrl.u32 %v5323_v46, 16  ;;  %v888_v14 = vshll.u32 %v5323_v46, 16  ;;  %v1428_v16 = vrot.slane %v1426_v9, 5 }
  0x4e   : > { %v1391_v17 = vsel %vm6080_vm1, %v1386_v58, %v1390_v11  ;;  %v1432_v50 = vrot.slane %v1430_v10, 4  ;;  %v5325_v26 = vcombine.low %v522_v4, %v522_v4  ;;  %v1412_v18 = vshll.u32 %v1262_v40, 16  ;;  %v1115_v21 = vld [vmem:[#allocation2 + $0x44] sm:$0x1]  ;;  %v560_v6 = vld [vmem:[#allocation2 + $0x6c] sm:$0x1] }
  0x4f   : > { %v1424_v51 = vrot.slane %v1423_v49, 4  ;;  %1670 = vrot.lane.b32.xlu1 %v1391_v17, %s5838_s10  ;;  %v887_v19 = vrot.slane %v885_v13, 7  ;;  %v893_v20 = vshrl.u32 %v5324_v12, 16  ;;  %vm508_vm6 = vcmp.gt.s32.totalorder %v5981_v15, 8  ;;  %v607_v7 = vld [vmem:[#allocation2 + $0x5c] sm:$0x1] }
  0x50   : > { %v896_v22 = vshll.u32 %v5324_v12, 16  ;;  %v1116_v25 = vsel %vm5949_vm2, %v866_v52, %v1115_v21  ;;  %v1433_v41 = vor.u32 %v1432_v50, %v1428_v16  ;;  %v5326_v42 = vcombine.high %v522_v4, %v522_v4  ;;  %v1132_v63 = vld [vmem:[#allocation2 + $0x60] sm:$0xf] }
  0x51   : > { %v1429_v27 = vsel %vm6080_vm1, %v1424_v51, %v1428_v16  ;;  %v1414_v28 = vrot.slane %v1412_v18, 5  ;;  %v890_v58 = vor.u32 %v888_v14, %v887_v19  ;;  %v891_v29 = vrot.slane %v887_v19, 4  ;;  %1117 = vst [vmem:[#allocation2 + $0x44] sm:$0x1] %v1116_v25  ;;  %v470_v14 = vld [vmem:[%s5992_s9 + $0x90] sm:$0xff]  ;;  %v471_v16 = vld [vmem:[%s5992_s9 + $0x98] sm:$0xff] }
  0x52   : > { %1676 = vrot.lane.b32.xlu0 %v1429_v27, %s5838_s10  ;;  %v6177_v30 = vrot.slane %v893_v20, 7  ;;  %v6179_v31 = vrot.slane %v1433_v41, 4  ;;  %v902_v33 = vshrl.u32 %v5325_v26, 16  ;;  %v905_v34 = vshll.u32 %v5325_v26, 16  ;;  %v563_v41 = vld [vmem:[#allocation2 + $0x78] sm:$0x1] }
  0x53   : > { %v1266_v36 = vld [vmem:[#allocation2 + $0x48] sm:$0xf]  ;;  %v1415_v37 = vsel %vm6080_vm1, %v6146_v48, %v1414_v28  ;;  %v1126_v47 = vsel %vm6023_vm13, %v890_v58, %v1125_v24  ;;  %v910_v38 = vshrl.u32 %v5326_v42, 16  ;;  %v913_v43 = vshll.u32 %v5326_v42, 16 }
  0x54   : > { %v1267_v45 = vld [vmem:[#allocation2 + $0x4c] sm:$0xf]  ;;  %v1441_v52 = vshrl.u32 %v1266_v36, 16  ;;  %v1444_v53 = vshll.u32 %v1266_v36, 16  ;;  %1674 = vrot.lane.b32.xlu1 %v1415_v37, %s5838_s10  ;;  %v898_v54 = vor.u32 %v896_v22, %v6177_v30  ;;  %1127 = vst [vmem:[#allocation2 + $0x54] sm:$0xf] %v1126_v47  ;;  %v490_v13 = vpack.c.bf16 %v469_v59, %v468_v44 }
  0x55   : > { %v904_v56 = vrot.slane %v902_v33, 7  ;;  %v1450_v48 = vshll.u32 %v1267_v45, 16  ;;  %v1454_v61 = vshrl.u32 %v1267_v45, 16  ;;  %v6195_v62 = vrot.slane %v910_v38, 7  ;;  %v2292_v55 = vld [vmem:[#allocation2 + $0x48] sm:$0xf] }
  0x56   : > { %v605_v1 = vsel %vm5969_vm4, 0, %v604_v35  ;;  %vm509_vm7 = vcmp.gt.s32.totalorder %v5981_v15, 9  ;;  %v1443_v2 = vrot.slane %v1441_v52, 4  ;;  %v1446_v3 = vrot.slane %v1444_v53, 5 }
  0x57   : > { %v899_v4 = vsel %vm6017_vm12, %v891_v29, %v898_v54  ;;  %v907_v5 = vor.u32 %v905_v34, %v904_v56  ;;  %606 = vst [vmem:[#allocation2 + $0x50] sm:$0x1] %v605_v1  ;;  %v1452_v32 = vrot.slane %v1450_v48, 5  ;;  %v908_v46 = vrot.slane %v904_v56, 4  ;;  %v610_v29 = vld [vmem:[#allocation2 + $0x68] sm:$0x1] }
  0x58   : > { %1128 = vst.msk [vmem:[#allocation2 + $0x58] sm:$0xf] %vm664_vm8, %v899_v4  ;;  %v915_v9 = vor.u32 %v913_v43, %v6195_v62  ;;  %v883_v10 = vrot.slane %v6139_v39, 4  ;;  %v1447_v11 = vor.u32 %v1446_v3, %v1443_v2  ;;  %v1265_v57 = vld [vmem:[#allocation2 + $0x44] sm:$0x1]  ;;  %v1456_v12 = vrot.slane %v1454_v61, 4 }
  0x59   : > { %v1133_v49 = vsel %vm6023_vm13, %v907_v5, %v1132_v63  ;;  %v1436_v17 = vshll.u32 %v1265_v57, 16  ;;  %v561_v50 = vsel %vm5949_vm2, 0, %v560_v6  ;;  %v608_v39 = vsel %vm5969_vm4, 0, %v607_v7 }
  0x5a   : > { %v916_v40 = vsel %vm6017_vm12, %v908_v46, %v915_v9  ;;  %1134 = vst [vmem:[#allocation2 + $0x60] sm:$0xf] %v1133_v49  ;;  %v1448_v26 = vrot.slane %v1447_v11, 4  ;;  %v1457_v51 = vor.u32 %v1456_v12, %v1452_v32  ;;  %v523_v18 = vsel %vm508_vm6, %v490_v13, 0  ;;  %562 = vst [vmem:[#allocation2 + $0x6c] sm:$0x1] %v561_v50 }
  0x5b   : > { %1135 = vst.msk [vmem:[#allocation2 + $0x64] sm:$0xf] %vm664_vm8, %v916_v40  ;;  %609 = vst [vmem:[#allocation2 + $0x5c] sm:$0x1] %v608_v39  ;;  %v900_v19 = vrot.slane %v6177_v30, 4  ;;  %v1438_v21 = vrot.slane %v1436_v17, 5  ;;  %v5327_v22 = vcombine.low %v523_v18, %v523_v18  ;;  %v5328_v24 = vcombine.high %v523_v18, %v523_v18 }
  0x5c   : > { %v1269_v20 = vld [vmem:[#allocation2 + $0x54] sm:$0xf]  ;;  %v491_v25 = vpack.c.bf16 %v471_v16, %v470_v14  ;;  %v1453_v42 = vsel %vm6080_vm1, %v1448_v26, %v1452_v32  ;;  %v6225_v58 = vrot.slane %v1457_v51, 4  ;;  %v564_v48 = vsel %vm5949_vm2, 0, %v563_v41  ;;  %v437_v12 = vld [vmem:[%s406_s7] sm:$0xff]  ;;  %v438_v13 = vld [vmem:[%s406_s7 + $0x8] sm:$0xff] }
  0x5d   : > { %v1465_v27 = vshrl.u32 %v1269_v20, 16  ;;  %v1468_v28 = vshll.u32 %v1269_v20, 16  ;;  %1680 = vrot.lane.b32.xlu0 %v1453_v42, %s5838_s10  ;;  %v1439_v30 = vsel %vm6080_vm1, %v6179_v31, %v1438_v21  ;;  %v919_v34 = vshrl.u32 %v5327_v22, 16  ;;  %565 = vst [vmem:[#allocation2 + $0x78] sm:$0x1] %v564_v48 }
  0x5e   : > { %v1122_v33 = vld [vmem:[#allocation2 + $0x50] sm:$0x1]  ;;  %v922_v35 = vshll.u32 %v5327_v22, 16  ;;  %v927_v36 = vshrl.u32 %v5328_v24, 16  ;;  %1678 = vrot.lane.b32.xlu1 %v1439_v30, %s5838_s10  ;;  %v930_v44 = vshll.u32 %v5328_v24, 16  ;;  %v524_v59 = vsel %vm509_vm7, %v491_v25, 0 }
  0x5f   : > { %v1270_v37 = vld [vmem:[#allocation2 + $0x58] sm:$0xf]  ;;  %v1467_v47 = vrot.slane %v1465_v27, 4  ;;  %v1470_v38 = vrot.slane %v1468_v28, 5  ;;  %v1123_v43 = vsel %vm5949_vm2, %v883_v10, %v1122_v33  ;;  %v921_v53 = vrot.slane %v919_v34, 7 }
  0x60   : > { %v1474_v45 = vshll.u32 %v1270_v37, 16  ;;  %v1478_v52 = vshrl.u32 %v1270_v37, 16  ;;  %1124 = vst [vmem:[#allocation2 + $0x50] sm:$0x1] %v1123_v43  ;;  %v6235_v31 = vrot.slane %v927_v36, 7  ;;  %v611_v61 = vsel %vm5969_vm4, 0, %v610_v29 }
  0x61   : > { %v1471_v54 = vor.u32 %v1470_v38, %v1467_v47  ;;  %v1272_v56 = vld [vmem:[#allocation2 + $0x60] sm:$0xf]  ;;  %v924_v4 = vor.u32 %v922_v35, %v921_v53  ;;  %612 = vst [vmem:[#allocation2 + $0x68] sm:$0x1] %v611_v61  ;;  %v925_v32 = vrot.slane %v921_v53, 4  ;;  %v5329_v26 = vcombine.low %v524_v59, %v524_v59 }
  0x62   : > { %v1476_v63 = vrot.slane %v1474_v45, 5  ;;  %v1273_v1 = vld [vmem:[#allocation2 + $0x64] sm:$0xf]  ;;  %v1489_v2 = vshrl.u32 %v1272_v56, 16  ;;  %v1492_v3 = vshll.u32 %v1272_v56, 16  ;;  %v932_v11 = vor.u32 %v930_v44, %v6235_v31 }
  0x63   : > { %v1472_v5 = vrot.slane %v1471_v54, 4  ;;  %v1498_v6 = vshll.u32 %v1273_v1, 16  ;;  %v1502_v7 = vshrl.u32 %v1273_v1, 16  ;;  %v1139_v46 = vld [vmem:[#allocation2 + $0x6c] sm:$0xf]  ;;  %v1480_v40 = vrot.slane %v1478_v52, 4 }
  0x64   : > { %v1491_v9 = vrot.slane %v1489_v2, 4  ;;  %v1494_v10 = vrot.slane %v1492_v3, 5  ;;  %v1140_v57 = vsel %vm6023_vm13, %v924_v4, %v1139_v46  ;;  %v1129_v49 = vld [vmem:[#allocation2 + $0x5c] sm:$0x1]  ;;  %v933_v39 = vsel %vm6017_vm12, %v925_v32, %v932_v11  ;;  %v1192_v27 = vld [vmem:[#allocation2 + $0x18] sm:$0xf] }
  0x65   : > { %v1477_v14 = vsel %vm6080_vm1, %v1472_v5, %v1476_v63  ;;  %v1500_v16 = vrot.slane %v1498_v6, 5  ;;  %1141 = vst [vmem:[#allocation2 + $0x6c] sm:$0xf] %v1140_v57  ;;  %v1130_v17 = vsel %vm5949_vm2, %v900_v19, %v1129_v49  ;;  %v5330_v51 = vcombine.high %v524_v59, %v524_v59  ;;  %1142 = vst.msk [vmem:[#allocation2 + $0x70] sm:$0xf] %vm664_vm8, %v933_v39 }
  0x66   : > { %1684 = vrot.lane.b32.xlu0 %v1477_v14, %s5838_s10  ;;  %v1495_v50 = vor.u32 %v1494_v10, %v1491_v9  ;;  %1131 = vst [vmem:[#allocation2 + $0x5c] sm:$0x1] %v1130_v17  ;;  %v1481_v20 = vor.u32 %v1480_v40, %v1476_v63  ;;  %v917_v21 = vrot.slane %v6195_v62, 4  ;;  %v1504_v22 = vrot.slane %v1502_v7, 4  ;;  %v533_v34 = vld [vmem:[#allocation2] sm:$0x1] }
  0x67   : > { %v1268_v18 = vld [vmem:[#allocation2 + $0x50] sm:$0x1]  ;;  %v439_v19 = vpack.c.bf16 %v438_v13, %v437_v12  ;;  %v936_v41 = vshrl.u32 %v5329_v26, 16  ;;  %v939_v42 = vshll.u32 %v5329_v26, 16  ;;  %v944_v29 = vshrl.u32 %v5330_v51, 16 }
  0x68   : > { %v1496_v24 = vrot.slane %v1495_v50, 4  ;;  %v1460_v25 = vshll.u32 %v1268_v18, 16  ;;  %v6261_v28 = vrot.slane %v1481_v20, 4  ;;  %v947_v30 = vshll.u32 %v5330_v51, 16  ;;  %1222 = vst.msk [vmem:[#allocation3 + $0x10] sm:$0xf] %vm664_vm8, %v1192_v27 }
  0x69   : > { %v1505_v33 = vor.u32 %v1504_v22, %v1500_v16  ;;  %v938_v62 = vrot.slane %v936_v41, 7  ;;  %v1136_v37 = vld [vmem:[#allocation2 + $0x68] sm:$0x1]  ;;  %v441_v47 = vstv %s440_s11  ;;  %v1190_v38 = vld [vmem:[#allocation2 + $0xc] sm:$0xf]  ;;  %v6267_v43 = vrot.slane %v944_v29, 7 }
  0x6a   : > { %v1501_v35 = vsel %vm6080_vm1, %v1496_v24, %v1500_v16  ;;  %v1462_v36 = vrot.slane %v1460_v25, 5  ;;  %v1146_v44 = vld [vmem:[#allocation2 + $0x78] sm:$0xf]  ;;  %v1137_v45 = vsel %vm5949_vm2, %v917_v21, %v1136_v37  ;;  %vm442_vm9 = vcmp.eq.s32.totalorder %v441_v47, 1  ;;  %1220 = vst.msk [vmem:[#allocation3 + $0x8] sm:$0xf] %vm664_vm8, %v1190_v38 }
  0x6b   : > { %1688 = vrot.lane.b32.xlu0 %v1501_v35, %s5838_s10  ;;  %v6271_v52 = vrot.slane %v1505_v33, 4  ;;  %v941_v56 = vor.u32 %v939_v42, %v938_v62  ;;  %v942_v59 = vrot.slane %v938_v62, 4  ;;  %1138 = vst [vmem:[#allocation2 + $0x68] sm:$0x1] %v1137_v45  ;;  %v443_v48 = vsel %vm442_vm9, %v439_v19, 0  ;;  %v472_v19 = vld [vmem:[%s5992_s9 + $0xa0] sm:$0xff] }
  0x6c   : > { %v1463_v53 = vsel %vm6080_vm1, %v6225_v58, %v1462_v36  ;;  %v1275_v54 = vld [vmem:[#allocation2 + $0x6c] sm:$0xf]  ;;  %v949_v2 = vor.u32 %v947_v30, %v6267_v43  ;;  %v534_v3 = vsel %vm5949_vm2, 0, %v533_v34  ;;  %v613_v4 = vld [vmem:[#allocation2 + $0x74] sm:$0x1]  ;;  %vm510_vm10 = vcmp.gt.s32.totalorder %v5981_v15, 10 }
  0x6d   : > { %1682 = vrot.lane.b32.xlu1 %v1463_v53, %s5838_s10  ;;  %v1513_v61 = vshrl.u32 %v1275_v54, 16  ;;  %v1516_v63 = vshll.u32 %v1275_v54, 16  ;;  %v1271_v1 = vld [vmem:[#allocation2 + $0x5c] sm:$0x1]  ;;  %v1276_v5 = vld [vmem:[#allocation2 + $0x70] sm:$0xf]  ;;  %v1147_v6 = vsel %vm6023_vm13, %v941_v56, %v1146_v44  ;;  %v5307_v7 = vcombine.low %v443_v48, %v443_v48 }
  0x6e   : > { %v1484_v58 = vshll.u32 %v1271_v1, 16  ;;  %535 = vst [vmem:[#allocation2] sm:$0x1] %v534_v3  ;;  %v5308_v32 = vcombine.high %v443_v48, %v443_v48  ;;  %v586_v46 = vld [vmem:[#allocation2 + $0x8] sm:$0x1]  ;;  %v1522_v11 = vshll.u32 %v1276_v5, 16  ;;  %v950_v13 = vsel %vm6017_vm12, %v942_v59, %v949_v2 }
  0x6f   : > { %v1515_v9 = vrot.slane %v1513_v61, 4  ;;  %v1518_v10 = vrot.slane %v1516_v63, 5  ;;  %v1526_v57 = vshrl.u32 %v1276_v5, 16  ;;  %1148 = vst [vmem:[#allocation2 + $0x78] sm:$0xf] %v1147_v6  ;;  %v645_v14 = vshrl.u32 %v5307_v7, 16 }
  0x70   : > { %v616_v49 = vld [vmem:[#allocation2 + $0x80] sm:$0x1]  ;;  %v1486_v12 = vrot.slane %v1484_v58, 5  ;;  %v648_v16 = vshll.u32 %v5307_v7, 16  ;;  %v1194_v17 = vld [vmem:[#allocation2 + $0x24] sm:$0xf] }
  0x71   : > { %v1519_v40 = vor.u32 %v1518_v10, %v1515_v9  ;;  %v1524_v50 = vrot.slane %v1522_v11, 5  ;;  %1149 = vst.msk [vmem:[#allocation2 + $0x7c] sm:$0xf] %vm664_vm8, %v950_v13  ;;  %v653_v39 = vshrl.u32 %v5308_v32, 16  ;;  %v656_v26 = vshll.u32 %v5308_v32, 16  ;;  %v473_v24 = vld [vmem:[%s5992_s9 + $0xa8] sm:$0xff] }
  0x72   : > { %1224 = vst.msk [vmem:[#allocation3 + $0x18] sm:$0xf] %vm664_vm8, %v1194_v17  ;;  %v1191_v51 = vld [vmem:[#allocation2 + $0x10] sm:$0xf]  ;;  %v1487_v18 = vsel %vm6080_vm1, %v6261_v28, %v1486_v12  ;;  %v647_v20 = vrot.slane %v645_v14, 7  ;;  %v614_v21 = vsel %vm5969_vm4, 0, %v613_v4  ;;  %v492_v56 = vpack.c.bf16 %v473_v24, %v472_v19 }
  0x73   : > { %v934_v22 = vrot.slane %v6235_v31, 4  ;;  %1221 = vst.msk [vmem:[#allocation3 + $0xc] sm:$0xf] %vm664_vm8, %v1191_v51  ;;  %v1520_v25 = vrot.slane %v1519_v40, 4  ;;  %1686 = vrot.lane.b32.xlu1 %v1487_v18, %s5838_s10  ;;  %v1274_v41 = vld [vmem:[#allocation2 + $0x68] sm:$0x1] }
  0x74   : > { %v655_v42 = vrot.slane %v653_v39, 7  ;;  %615 = vst [vmem:[#allocation2 + $0x74] sm:$0x1] %v614_v21  ;;  %v1528_v27 = vrot.slane %v1526_v57, 4  ;;  %v587_v28 = vsel %vm5969_vm4, 0, %v586_v46  ;;  %v1508_v29 = vshll.u32 %v1274_v41, 16 }
  0x75   : > { %v650_v30 = vor.u32 %v648_v16, %v647_v20  ;;  %v651_v33 = vrot.slane %v647_v20, 4  ;;  %588 = vst [vmem:[#allocation2 + $0x8] sm:$0x1] %v587_v28  ;;  %v617_v31 = vsel %vm5969_vm4, 0, %v616_v49  ;;  %v566_v34 = vld [vmem:[#allocation2 + $0x84] sm:$0x1]  ;;  %v1525_v35 = vsel %vm6080_vm1, %v1520_v25, %v1524_v50 }
  0x76   : > { %v658_v36 = vor.u32 %v656_v26, %v655_v42  ;;  %v666_v62 = vld [vmem:[#allocation2] sm:$0xf]  ;;  %v1529_v37 = vor.u32 %v1528_v27, %v1524_v50  ;;  %v660_v47 = vrot.slane %v655_v42, 4  ;;  %618 = vst [vmem:[#allocation2 + $0x80] sm:$0x1] %v617_v31  ;;  %1692 = vrot.lane.b32.xlu0 %v1525_v35, %s5838_s10  ;;  %v1510_v45 = vrot.slane %v1508_v29, 5 }
  0x77   : > { %v619_v38 = vld [vmem:[#allocation2 + $0x8c] sm:$0x1]  ;;  %v1278_v44 = vld [vmem:[#allocation2 + $0x78] sm:$0xf]  ;;  %v667_v53 = vsel %vm6023_vm13, %v650_v30, %v666_v62  ;;  %v951_v54 = vrot.slane %v6267_v43, 4  ;;  %v474_v59 = vld [vmem:[%s5992_s9 + $0xb0] sm:$0xff] }
  0x78   : > { %v1537_v48 = vshrl.u32 %v1278_v44, 16  ;;  %v1540_v61 = vshll.u32 %v1278_v44, 16  ;;  %v659_v63 = vsel %vm6017_vm12, %v651_v33, %v658_v36  ;;  %668 = vst [vmem:[#allocation2] sm:$0xf] %v667_v53  ;;  %v6311_v1 = vrot.slane %v1529_v37, 4  ;;  %v475_v2 = vld [vmem:[%s5992_s9 + $0xb8] sm:$0xff] }
  0x79   : > { %v1196_v3 = vld [vmem:[#allocation2 + $0x30] sm:$0xf]  ;;  %v1279_v4 = vld [vmem:[#allocation2 + $0x7c] sm:$0xf]  ;;  %v1511_v5 = vsel %vm6080_vm1, %v6271_v52, %v1510_v45  ;;  %670 = vst.msk [vmem:[#allocation2 + $0x4] sm:$0xf] %vm664_vm8, %v659_v63  ;;  %v493_v57 = vpack.c.bf16 %v475_v2, %v474_v59 }
  0x7a   : > { %v525_v43 = vsel %vm510_vm10, %v492_v56, 0  ;;  %v567_v58 = vsel %vm5949_vm2, 0, %v566_v34  ;;  %v620_v6 = vsel %vm5969_vm4, 0, %v619_v38  ;;  %1226 = vst.msk [vmem:[#allocation3 + $0x20] sm:$0xf] %vm664_vm8, %v1196_v3  ;;  %v1539_v7 = vrot.slane %v1537_v48, 4  ;;  %1690 = vrot.lane.b32.xlu1 %v1511_v5, %s5838_s10 }
  0x7b   : > { %v1542_v32 = vrot.slane %v1540_v61, 5  ;;  %v1546_v46 = vshll.u32 %v1279_v4, 16  ;;  %v1550_v9 = vshrl.u32 %v1279_v4, 16  ;;  %568 = vst [vmem:[#allocation2 + $0x84] sm:$0x1] %v567_v58  ;;  %v5331_v10 = vcombine.low %v525_v43, %v525_v43  ;;  %s5844_s11 = smov 24  }
  0x7c   : > { %621 = vst [vmem:[#allocation2 + $0x8c] sm:$0x1] %v620_v6  ;;  %v1143_v52 = vld [vmem:[#allocation2 + $0x74] sm:$0x1]  ;;  %v5332_v11 = vcombine.high %v525_v43, %v525_v43  ;;  %vm511_vm11 = vcmp.gt.s32.totalorder %v5981_v15, 11  ;;  %vm512_vm14 = vcmp.gt.s32.totalorder %v5981_v15, 12 }
  0x7d   : > { %v1193_v49 = vld [vmem:[#allocation2 + $0x1c] sm:$0xf]  ;;  %v1543_v12 = vor.u32 %v1542_v32, %v1539_v7  ;;  %v1548_v13 = vrot.slane %v1546_v46, 5  ;;  %v1144_v14 = vsel %vm5949_vm2, %v934_v22, %v1143_v52  ;;  %v671_v16 = vld [vmem:[#allocation2 + $0x8] sm:$0x1]  ;;  %v1552_v17 = vrot.slane %v1550_v9, 4 }
  0x7e   : > { %v569_v40 = vld [vmem:[#allocation2 + $0x90] sm:$0x1]  ;;  %1223 = vst.msk [vmem:[#allocation3 + $0x14] sm:$0xf] %vm664_vm8, %v1193_v49  ;;  %1145 = vst [vmem:[#allocation2 + $0x74] sm:$0x1] %v1144_v14  ;;  %v672_v50 = vsel %vm5949_vm2, %v660_v47, %v671_v16 }
  0x7f   : > { %v1150_v39 = vld [vmem:[#allocation2 + $0x80] sm:$0x1]  ;;  %v953_v26 = vshrl.u32 %v5331_v10, 16  ;;  %v956_v51 = vshll.u32 %v5331_v10, 16  ;;  %v961_v18 = vshrl.u32 %v5332_v11, 16  ;;  %v1544_v20 = vrot.slane %v1543_v12, 4 }
  0x80   : > { %673 = vst [vmem:[#allocation2 + $0x8] sm:$0x1] %v672_v50  ;;  %v1151_v21 = vsel %vm5949_vm2, %v951_v54, %v1150_v39  ;;  %v1553_v19 = vor.u32 %v1552_v17, %v1548_v13  ;;  %v964_v22 = vshll.u32 %v5332_v11, 16  ;;  %v1198_v24 = vld [vmem:[#allocation2 + $0x3c] sm:$0xf]  ;;  %v526_v27 = vsel %vm511_vm11, %v493_v57, 0 }
  0x81   : > { %v1248_v25 = vld [vmem:[#allocation2] sm:$0xf]  ;;  %1152 = vst [vmem:[#allocation2 + $0x80] sm:$0x1] %v1151_v21  ;;  %v955_v41 = vrot.slane %v953_v26, 7  ;;  %v963_v42 = vrot.slane %v961_v18, 7  ;;  %v1549_v29 = vsel %vm6080_vm1, %v1544_v20, %v1548_v13  ;;  %v5333_v61 = vcombine.low %v526_v27, %v526_v27 }
  0x82   : > { %v570_v28 = vsel %vm5949_vm2, 0, %v569_v40  ;;  %1228 = vst.msk [vmem:[#allocation3 + $0x28] sm:$0xf] %vm664_vm8, %v1198_v24  ;;  %v1249_v30 = vld [vmem:[#allocation2 + $0x4] sm:$0xf]  ;;  %v1297_v33 = vshrl.u32 %v1248_v25, 16  ;;  %1696 = vrot.lane.b32.xlu0 %v1549_v29, %s5838_s10  ;;  %v5334_v5 = vcombine.high %v526_v27, %v526_v27 }
  0x83   : > { %v1300_v31 = vshll.u32 %v1248_v25, 16  ;;  %v6341_v34 = vrot.slane %v1553_v19, 4  ;;  %571 = vst [vmem:[#allocation2 + $0x90] sm:$0x1] %v570_v28  ;;  %v1306_v35 = vshll.u32 %v1249_v30, 16  ;;  %v1310_v36 = vshrl.u32 %v1249_v30, 16 }
  0x84   : > { %v958_v62 = vor.u32 %v956_v51, %v955_v41  ;;  %v959_v37 = vrot.slane %v955_v41, 4  ;;  %v1153_v47 = vld [vmem:[#allocation2 + $0x84] sm:$0xf]  ;;  %v1299_v38 = vrot.slane %v1297_v33, 4  ;;  %v966_v45 = vor.u32 %v964_v22, %v963_v42  ;;  %v1157_v54 = vld [vmem:[#allocation2 + $0x8c] sm:$0x1] }
  0x85   : > { %v1302_v44 = vrot.slane %v1300_v31, 5  ;;  %v968_v53 = vrot.slane %v963_v42, 4  ;;  %v1308_v56 = vrot.slane %v1306_v35, 5  ;;  %v1312_v59 = vrot.slane %v1310_v36, 4  ;;  %v1277_v2 = vld [vmem:[#allocation2 + $0x74] sm:$0x1] }
  0x86   : > { %v1154_v48 = vsel %vm6023_vm13, %v958_v62, %v1153_v47  ;;  %v967_v3 = vsel %vm6017_vm12, %v959_v37, %v966_v45  ;;  %v622_v43 = vld [vmem:[#allocation2 + $0x98] sm:$0x1]  ;;  %v1195_v58 = vld [vmem:[#allocation2 + $0x28] sm:$0xf]  ;;  %v1532_v6 = vshll.u32 %v1277_v2, 16  ;;  %v970_v46 = vshrl.u32 %v5333_v61, 16 }
  0x87   : > { %v1303_v63 = vor.u32 %v1302_v44, %v1299_v38  ;;  %1155 = vst [vmem:[#allocation2 + $0x84] sm:$0xf] %v1154_v48  ;;  %v1158_v4 = vsel %vm5949_vm2, %v968_v53, %v1157_v54  ;;  %v1250_v7 = vld [vmem:[#allocation2 + $0x8] sm:$0x1]  ;;  %v1313_v32 = vor.u32 %v1312_v59, %v1308_v56  ;;  %1156 = vst.msk [vmem:[#allocation2 + $0x88] sm:$0xf] %vm664_vm8, %v967_v3 }
  0x88   : > { %1159 = vst [vmem:[#allocation2 + $0x8c] sm:$0x1] %v1158_v4  ;;  %v973_v9 = vshll.u32 %v5333_v61, 16  ;;  %v476_v52 = vld [vmem:[%s5992_s9 + $0xc0] sm:$0xff]  ;;  %v477_v10 = vld [vmem:[%s5992_s9 + $0xc8] sm:$0xff]  ;;  %v1316_v57 = vshll.u32 %v1250_v7, 16 }
  0x89   : > { %1225 = vst.msk [vmem:[#allocation3 + $0x1c] sm:$0xf] %vm664_vm8, %v1195_v58  ;;  %v1304_v11 = vrot.slane %v1303_v63, 4  ;;  %v1280_v49 = vld [vmem:[#allocation2 + $0x80] sm:$0x1]  ;;  %v978_v12 = vshrl.u32 %v5334_v5, 16  ;;  %v494_v29 = vpack.c.bf16 %v477_v10, %v476_v52 }
  0x8a   : > { %v981_v13 = vshll.u32 %v5334_v5, 16  ;;  %v1534_v14 = vrot.slane %v1532_v6, 5  ;;  %v1314_v16 = vrot.slane %v1313_v32, 4  ;;  %v1556_v17 = vshll.u32 %v1280_v49, 16  ;;  %v572_v50 = vld [vmem:[#allocation2 + $0x9c] sm:$0x1] }
  0x8b   : > { %v972_v40 = vrot.slane %v970_v46, 7  ;;  %v1309_v39 = vsel %vm6080_vm1, %v1304_v11, %v1308_v56  ;;  %v1318_v26 = vrot.slane %v1316_v57, 5  ;;  %v980_v51 = vrot.slane %v978_v12, 7  ;;  %v1160_v18 = vld [vmem:[#allocation2 + $0x90] sm:$0xf]  ;;  %v479_v41 = vld [vmem:[%s5992_s9 + $0xd8] sm:$0xff] }
  0x8c   : > { %v623_v20 = vsel %vm5969_vm4, 0, %v622_v43  ;;  %1656 = vrot.lane.b32.xlu0 %v1309_v39, %s5838_s10  ;;  %v1535_v21 = vsel %vm6080_vm1, %v6311_v1, %v1534_v14  ;;  %v1558_v19 = vrot.slane %v1556_v17, 5  ;;  %v478_v25 = vld [vmem:[%s5992_s9 + $0xd0] sm:$0xff]  ;;  %v1200_v30 = vld [vmem:[#allocation2 + $0x48] sm:$0xf]  ;;  %v573_v35 = vsel %vm5949_vm2, 0, %v572_v50 }
  0x8d   : > { %v975_v22 = vor.u32 %v973_v9, %v972_v40  ;;  %v976_v24 = vrot.slane %v972_v40, 4  ;;  %624 = vst [vmem:[#allocation2 + $0x98] sm:$0x1] %v623_v20  ;;  %1694 = vrot.lane.b32.xlu1 %v1535_v21, %s5838_s10  ;;  %v1319_v42 = vsel %vm6080_vm1, %v1314_v16, %v1318_v26  ;;  %v983_v27 = vor.u32 %v981_v13, %v980_v51  ;;  %v625_v36 = vld [vmem:[#allocation2 + $0xa4] sm:$0x1] }
  0x8e   : > { %v985_v28 = vrot.slane %v980_v51, 4  ;;  %v1559_v33 = vsel %vm6080_vm1, %v6341_v34, %v1558_v19  ;;  %v1281_v1 = vld [vmem:[#allocation2 + $0x84] sm:$0xf]  ;;  %1230 = vst.msk [vmem:[#allocation3 + $0x30] sm:$0xf] %vm664_vm8, %v1200_v30  ;;  %v495_v34 = vpack.c.bf16 %v479_v41, %v478_v25  ;;  %v527_v56 = vsel %vm512_vm14, %v494_v29, 0 }
  0x8f   : > { %v1161_v31 = vsel %vm6023_vm13, %v975_v22, %v1160_v18  ;;  %v1282_v62 = vld [vmem:[#allocation2 + $0x88] sm:$0xf]  ;;  %v1561_v37 = vshrl.u32 %v1281_v1, 16  ;;  %v1564_v47 = vshll.u32 %v1281_v1, 16  ;;  %v1283_v38 = vld [vmem:[#allocation2 + $0x8c] sm:$0x1]  ;;  %v984_v44 = vsel %vm6017_vm12, %v976_v24, %v983_v27 }
  0x90   : > { %1162 = vst [vmem:[#allocation2 + $0x90] sm:$0xf] %v1161_v31  ;;  %574 = vst [vmem:[#allocation2 + $0x9c] sm:$0x1] %v573_v35  ;;  %1658 = vrot.lane.b32.xlu0 %v1319_v42, %s5838_s10  ;;  %v1570_v45 = vshll.u32 %v1282_v62, 16  ;;  %v1574_v53 = vshrl.u32 %v1282_v62, 16  ;;  %v5335_v61 = vcombine.low %v527_v56, %v527_v56  ;;  %v5336_v63 = vcombine.high %v527_v56, %v527_v56 }
  0x91   : > { %v1580_v54 = vshll.u32 %v1283_v38, 16  ;;  %1163 = vst.msk [vmem:[#allocation2 + $0x94] sm:$0xf] %vm664_vm8, %v984_v44  ;;  %1698 = vrot.lane.b32.xlu1 %v1559_v33, %s5838_s10  ;;  %v1563_v59 = vrot.slane %v1561_v37, 4  ;;  %v1566_v48 = vrot.slane %v1564_v47, 5  ;;  %v626_v43 = vsel %vm5969_vm4, 0, %v625_v36 }
  0x92   : > { %v1197_v2 = vld [vmem:[#allocation2 + $0x34] sm:$0xf]  ;;  %v1572_v3 = vrot.slane %v1570_v45, 5  ;;  %v1576_v4 = vrot.slane %v1574_v53, 4  ;;  %v575_v58 = vld [vmem:[#allocation2 + $0xa8] sm:$0x1] }
  0x93   : > { %v1582_v5 = vrot.slane %v1580_v54, 5  ;;  %1227 = vst.msk [vmem:[#allocation3 + $0x24] sm:$0xf] %vm664_vm8, %v1197_v2  ;;  %v1567_v6 = vor.u32 %v1566_v48, %v1563_v59  ;;  %v987_v32 = vshrl.u32 %v5335_v61, 16  ;;  %v990_v46 = vshll.u32 %v5335_v61, 16 }
  0x94   : > { %v1164_v7 = vld [vmem:[#allocation2 + $0x98] sm:$0x1]  ;;  %v995_v9 = vshrl.u32 %v5336_v63, 16  ;;  %627 = vst [vmem:[#allocation2 + $0xa4] sm:$0x1] %v626_v43  ;;  %v1577_v52 = vor.u32 %v1576_v4, %v1572_v3  ;;  %v998_v11 = vshll.u32 %v5336_v63, 16 }
  0x95   : > { %v1165_v10 = vsel %vm5949_vm2, %v985_v28, %v1164_v7  ;;  %vm513_vm15 = vcmp.gt.s32.totalorder %v5981_v15, 13  ;;  %v1202_v57 = vld [vmem:[#allocation2 + $0x54] sm:$0xf]  ;;  %v1568_v49 = vrot.slane %v1567_v6, 4  ;;  %v989_v12 = vrot.slane %v987_v32, 7 }
  0x96   : > { %1166 = vst [vmem:[#allocation2 + $0x98] sm:$0x1] %v1165_v10  ;;  %v997_v13 = vrot.slane %v995_v9, 7  ;;  %v528_v14 = vsel %vm513_vm15, %v495_v34, 0  ;;  %1232 = vst.msk [vmem:[#allocation3 + $0x38] sm:$0xf] %vm664_vm8, %v1202_v57 }
  0x97   : > { %v1199_v16 = vld [vmem:[#allocation2 + $0x40] sm:$0xf]  ;;  %v1578_v17 = vrot.slane %v1577_v52, 4  ;;  %v1284_v40 = vld [vmem:[#allocation2 + $0x90] sm:$0xf]  ;;  %v576_v39 = vsel %vm5949_vm2, 0, %v575_v58  ;;  %v5337_v26 = vcombine.low %v528_v14, %v528_v14  ;;  %v5338_v51 = vcombine.high %v528_v14, %v528_v14 }
  0x98   : > { %v1167_v50 = vld [vmem:[#allocation2 + $0x9c] sm:$0xf]  ;;  %1229 = vst.msk [vmem:[#allocation3 + $0x2c] sm:$0xf] %vm664_vm8, %v1199_v16  ;;  %v1573_v18 = vsel %vm6080_vm1, %v1568_v49, %v1572_v3  ;;  %v1285_v20 = vld [vmem:[#allocation2 + $0x94] sm:$0xf]  ;;  %v992_v22 = vor.u32 %v990_v46, %v989_v12  ;;  %v1000_v29 = vor.u32 %v998_v11, %v997_v13 }
  0x99   : > { %v1585_v21 = vshrl.u32 %v1284_v40, 16  ;;  %v1588_v19 = vshll.u32 %v1284_v40, 16  ;;  %577 = vst [vmem:[#allocation2 + $0xa8] sm:$0x1] %v576_v39  ;;  %1700 = vrot.lane.b32.xlu0 %v1573_v18, %s5838_s10  ;;  %v1583_v24 = vsel %vm6080_vm1, %v1578_v17, %v1582_v5  ;;  %v1594_v25 = vshll.u32 %v1285_v20, 16 }
  0x9a   : > { %v1598_v41 = vshrl.u32 %v1285_v20, 16  ;;  %v993_v42 = vrot.slane %v989_v12, 4  ;;  %1702 = vrot.lane.b32.xlu1 %v1583_v24, %s5838_s10  ;;  %v1168_v30 = vsel %vm6023_vm13, %v992_v22, %v1167_v50  ;;  %v628_v33 = vld [vmem:[#allocation2 + $0xb0] sm:$0x1]  ;;  %v1002_v35 = vrot.slane %v997_v13, 4 }
  0x9b   : > { %v1587_v27 = vrot.slane %v1585_v21, 4  ;;  %v1590_v28 = vrot.slane %v1588_v19, 5  ;;  %v1596_v1 = vrot.slane %v1594_v25, 5  ;;  %1169 = vst [vmem:[#allocation2 + $0x9c] sm:$0xf] %v1168_v30  ;;  %v1004_v62 = vshrl.u32 %v5337_v26, 16 }
  0x9c   : > { %v1600_v31 = vrot.slane %v1598_v41, 4  ;;  %v1171_v36 = vld [vmem:[#allocation2 + $0xa4] sm:$0x1]  ;;  %v1001_v47 = vsel %vm6017_vm12, %v993_v42, %v1000_v29  ;;  %v1007_v38 = vshll.u32 %v5337_v26, 16  ;;  %v1012_v44 = vshrl.u32 %v5338_v51, 16 }
  0x9d   : > { %v1591_v37 = vor.u32 %v1590_v28, %v1587_v27  ;;  %v1204_v34 = vld [vmem:[#allocation2 + $0x60] sm:$0xf]  ;;  %v1201_v45 = vld [vmem:[#allocation2 + $0x4c] sm:$0xf]  ;;  %v1286_v53 = vld [vmem:[#allocation2 + $0x98] sm:$0x1]  ;;  %v1172_v56 = vsel %vm5949_vm2, %v1002_v35, %v1171_v36 }
  0x9e   : > { %v1601_v54 = vor.u32 %v1600_v31, %v1596_v1  ;;  %1170 = vst.msk [vmem:[#allocation2 + $0xa0] sm:$0xf] %vm664_vm8, %v1001_v47  ;;  %v1006_v59 = vrot.slane %v1004_v62, 7  ;;  %v1015_v48 = vshll.u32 %v5338_v51, 16  ;;  %1234 = vst.msk [vmem:[#allocation3 + $0x40] sm:$0xf] %vm664_vm8, %v1204_v34 }
  0x9f   : > { %1231 = vst.msk [vmem:[#allocation3 + $0x34] sm:$0xf] %vm664_vm8, %v1201_v45  ;;  %v1592_v61 = vrot.slane %v1591_v37, 4  ;;  %v1604_v63 = vshll.u32 %v1286_v53, 16  ;;  %1173 = vst [vmem:[#allocation2 + $0xa4] sm:$0x1] %v1172_v56 }
  0xa0   : > { %v1014_v2 = vrot.slane %v1012_v44, 7  ;;  %v629_v3 = vsel %vm5969_vm4, 0, %v628_v33  ;;  %v1602_v4 = vrot.slane %v1601_v54, 4  ;;  %v1009_v5 = vor.u32 %v1007_v38, %v1006_v59  ;;  %v1174_v58 = vld [vmem:[#allocation2 + $0xa8] sm:$0xf] }
  0xa1   : > { %v1010_v43 = vrot.slane %v1006_v59, 4  ;;  %630 = vst [vmem:[#allocation2 + $0xb0] sm:$0x1] %v629_v3  ;;  %v1597_v6 = vsel %vm6080_vm1, %v1592_v61, %v1596_v1  ;;  %v1606_v7 = vrot.slane %v1604_v63, 5  ;;  %v1206_v46 = vld [vmem:[#allocation2 + $0x6c] sm:$0xf] }
  0xa2   : > { %v1017_v32 = vor.u32 %v1015_v48, %v1014_v2  ;;  %1704 = vrot.lane.b32.xlu0 %v1597_v6, %s5838_s10  ;;  %v1175_v9 = vsel %vm6023_vm13, %v1009_v5, %v1174_v58  ;;  %1236 = vst.msk [vmem:[#allocation3 + $0x48] sm:$0xf] %vm664_vm8, %v1206_v46  ;;  %v1203_v52 = vld [vmem:[#allocation2 + $0x58] sm:$0xf]  ;;  %v1287_v11 = vld [vmem:[#allocation2 + $0x9c] sm:$0xf] }
  0xa3   : > { %v1607_v10 = vsel %vm6080_vm1, %v1602_v4, %v1606_v7  ;;  %1176 = vst [vmem:[#allocation2 + $0xa8] sm:$0xf] %v1175_v9  ;;  %1233 = vst.msk [vmem:[#allocation3 + $0x3c] sm:$0xf] %vm664_vm8, %v1203_v52  ;;  %v1609_v49 = vshrl.u32 %v1287_v11, 16  ;;  %v1612_v12 = vshll.u32 %v1287_v11, 16 }
  0xa4   : > { %v1018_v57 = vsel %vm6017_vm12, %v1010_v43, %v1017_v32  ;;  %1706 = vrot.lane.b32.xlu1 %v1607_v10, %s5838_s10  ;;  %v1019_v13 = vrot.slane %v1014_v2, 4  ;;  %v1208_v22 = vld [vmem:[#allocation2 + $0x78] sm:$0xf]  ;;  %v1205_v24 = vld [vmem:[#allocation2 + $0x64] sm:$0xf]  ;;  %vm1867_vm0 = vcmask 1042432  }
  0xa5   : > { %1177 = vst.msk [vmem:[#allocation2 + $0xac] sm:$0xf] %vm664_vm8, %v1018_v57  ;;  %v1288_v14 = vld [vmem:[#allocation2 + $0xa0] sm:$0xf]  ;;  %v1611_v16 = vrot.slane %v1609_v49, 4  ;;  %v1614_v17 = vrot.slane %v1612_v12, 5 }
  0xa6   : > { %v1618_v40 = vshll.u32 %v1288_v14, 16  ;;  %v1622_v50 = vshrl.u32 %v1288_v14, 16  ;;  %v1289_v39 = vld [vmem:[#allocation2 + $0xa4] sm:$0x1]  ;;  %1238 = vst.msk [vmem:[#allocation3 + $0x50] sm:$0xf] %vm664_vm8, %v1208_v22 }
  0xa7   : > { %v1628_v26 = vshll.u32 %v1289_v39, 16  ;;  %v1615_v18 = vor.u32 %v1614_v17, %v1611_v16  ;;  %1235 = vst.msk [vmem:[#allocation3 + $0x44] sm:$0xf] %vm664_vm8, %v1205_v24  ;;  %v1778_v36 = vld [vmem:[#allocation2 + $0x4] sm:$0xf]  ;;  %vm1868_vm3 = vcmask 1046532  }
  0xa8   : > { %v1178_v51 = vld [vmem:[#allocation2 + $0xb0] sm:$0x1]  ;;  %v1620_v20 = vrot.slane %v1618_v40, 5  ;;  %v1624_v21 = vrot.slane %v1622_v50, 4  ;;  %v1777_v34 = vld [vmem:[#allocation2] sm:$0xe]  ;;  %vm6434_vm5 = vmor %vm1867_vm0, %vm1868_vm3 }
  0xa9   : > { %v1179_v19 = vsel %vm5949_vm2, %v1019_v13, %v1178_v51  ;;  %v1616_v25 = vrot.slane %v1615_v18, 4  ;;  %v1630_v42 = vrot.slane %v1628_v26, 5  ;;  %v1779_v45 = vld [vmem:[#allocation2 + $0x8] sm:$0x1]  ;;  %v1872_v54 = vrot.slane %v1778_v36, 5 }
  0xaa   : > { %1180 = vst [vmem:[#allocation2 + $0xb0] sm:$0x1] %v1179_v19  ;;  %v1625_v41 = vor.u32 %v1624_v21, %v1620_v20  ;;  %v1290_v27 = vld [vmem:[#allocation2 + $0xa8] sm:$0xf]  ;;  %v1188_v56 = vld [vmem:[#allocation2] sm:$0xf] }
  0xab   : > { %v1633_v29 = vshrl.u32 %v1290_v27, 16  ;;  %v1636_v30 = vshll.u32 %v1290_v27, 16  ;;  %v1621_v33 = vsel %vm6080_vm1, %v1616_v25, %v1620_v20  ;;  %v1781_v61 = vld [vmem:[#allocation2 + $0x10] sm:$0xf]  ;;  %1218 = vst.msk [vmem:[#allocation3] sm:$0xf] %vm664_vm8, %v1188_v56 }
  0xac   : > { %v1291_v28 = vld [vmem:[#allocation2 + $0xac] sm:$0xf]  ;;  %v1626_v1 = vrot.slane %v1625_v41, 4  ;;  %1708 = vrot.lane.b32.xlu0 %v1621_v33, %s5838_s10  ;;  %v5341_v3 = vrot.slane %v1777_v34, 9  ;;  %v1207_v4 = vld [vmem:[#allocation2 + $0x70] sm:$0xf] }
  0xad   : > { %v1642_v31 = vshll.u32 %v1291_v28, 16  ;;  %v1646_v35 = vshrl.u32 %v1291_v28, 16  ;;  %v1635_v62 = vrot.slane %v1633_v29, 4  ;;  %v1638_v37 = vrot.slane %v1636_v30, 5  ;;  %v1780_v6 = vld [vmem:[#allocation2 + $0xc] sm:$0xe] }
  0xae   : > { %v1631_v47 = vsel %vm6080_vm1, %v1626_v1, %v1630_v42  ;;  %v1875_v58 = vrot.slane %v1779_v45, 5  ;;  %1237 = vst.msk [vmem:[#allocation3 + $0x4c] sm:$0xf] %vm664_vm8, %v1207_v4  ;;  %v1874_v46 = vrot.slane %v1872_v54, 4  ;;  %v1879_v9 = vrot.slane %v1781_v61, 5  ;;  %v1665_v16 = vpop.permute.xlu0 %1664 }
  0xaf   : > { %v1644_v38 = vrot.slane %v1642_v31, 5  ;;  %v1648_v44 = vrot.slane %v1646_v35, 4  ;;  %1710 = vrot.lane.b32.xlu1 %v1631_v47, %s5838_s10  ;;  %v1639_v53 = vor.u32 %v1638_v37, %v1635_v62  ;;  %v1782_v52 = vld [vmem:[#allocation2 + $0x14] sm:$0x1]  ;;  %v1784_v10 = vld [vmem:[#allocation2 + $0x1c] sm:$0xf]  ;;  %v1873_v49 = vsel %vm6434_vm5, %v5341_v3, %v1872_v54  ;;  %v1661_v51 = vpop.permute.xlu1 %1660 }
  0xb0   : > { %v1189_v11 = vld [vmem:[#allocation2 + $0x4] sm:$0xf]  ;;  %v5342_v12 = vrot.slane %v1780_v6, 9  ;;  %v1209_v13 = vld [vmem:[#allocation2 + $0x7c] sm:$0xf]  ;;  %v1876_v17 = vsel %vm6434_vm5, %v1874_v46, %v1875_v58  ;;  %v1881_v40 = vrot.slane %v1879_v9, 4 }
  0xb1   : > { %v1292_v59 = vld [vmem:[#allocation2 + $0xb0] sm:$0x1]  ;;  %v1649_v48 = vor.u32 %v1648_v44, %v1644_v38  ;;  %v1640_v63 = vrot.slane %v1639_v53, 4  ;;  %1219 = vst.msk [vmem:[#allocation3 + $0x4] sm:$0xf] %vm664_vm8, %v1189_v11  ;;  %v1882_v50 = vrot.slane %v1782_v52, 5 }
  0xb2   : > { %v1652_v2 = vshll.u32 %v1292_v59, 16  ;;  %v1783_v14 = vld [vmem:[#allocation2 + $0x18] sm:$0xe]  ;;  %1239 = vst.msk [vmem:[#allocation3 + $0x54] sm:$0xf] %vm664_vm8, %v1209_v13  ;;  %v1886_v39 = vrot.slane %v1784_v10, 5  ;;  %v1880_v21 = vsel %vm6434_vm5, %v5342_v12, %v1879_v9 }
  0xb3   : > { %v1650_v5 = vrot.slane %v1649_v48, 4  ;;  %v1645_v7 = vsel %vm6080_vm1, %v1640_v63, %v1644_v38  ;;  %v1787_v26 = vld [vmem:[#allocation2 + $0x28] sm:$0xf]  ;;  %v1785_v18 = vld [vmem:[#allocation2 + $0x20] sm:$0x1]  ;;  %v5343_v19 = vrot.slane %v1783_v14, 9  ;;  %v1669_v41 = vpop.permute.xlu0 %1668  ;;  %v1883_v42 = vsel %vm6434_vm5, %v1881_v40, %v1882_v50  ;;  %v1663_v30 = vpop.permute.xlu1 %1662 }
  0xb4   : > { %v1654_v32 = vrot.slane %v1652_v2, 5  ;;  %1712 = vrot.lane.b32.xlu0 %v1645_v7, %s5838_s10  ;;  %v1210_v20 = vld [vmem:[#allocation2 + $0x84] sm:$0xf]  ;;  %v1211_v22 = vld [vmem:[#allocation2 + $0x88] sm:$0xf]  ;;  %v1893_v25 = vrot.slane %v1787_v26, 5 }
  0xb5   : > { %1240 = vst.msk [vmem:[#allocation3 + $0x58] sm:$0xf] %vm664_vm8, %v1210_v20  ;;  %v1786_v24 = vld [vmem:[#allocation2 + $0x24] sm:$0xe]  ;;  %1241 = vst.msk [vmem:[#allocation3 + $0x5c] sm:$0xf] %vm664_vm8, %v1211_v22  ;;  %v1887_v35 = vsel %vm6434_vm5, %v5343_v19, %v1886_v39 }
  0xb6   : > { %v1655_v57 = vsel %vm6080_vm1, %v1650_v5, %v1654_v32  ;;  %v1888_v27 = vrot.slane %v1886_v39, 4  ;;  %v1889_v28 = vrot.slane %v1785_v18, 5  ;;  %v1788_v29 = vld [vmem:[#allocation2 + $0x2c] sm:$0x1]  ;;  %v1212_v33 = vld [vmem:[#allocation2 + $0x90] sm:$0xf] }
  0xb7   : > { %1714 = vrot.lane.b32.xlu1 %v1655_v57, %s5838_s10  ;;  %v1790_v1 = vld [vmem:[#allocation2 + $0x34] sm:$0xf]  ;;  %1242 = vst.msk [vmem:[#allocation3 + $0x60] sm:$0xf] %vm664_vm8, %v1212_v33  ;;  %v5344_v36 = vrot.slane %v1786_v24, 9  ;;  %v1895_v62 = vrot.slane %v1893_v25, 4  ;;  %v1667_v34 = vpop.permute.xlu1 %1666 }
  0xb8   : > { %1975 = vrot.lane.b32.xlu0 %v1873_v49, %s5839_s14  ;;  %v1213_v31 = vld [vmem:[#allocation2 + $0x94] sm:$0xf]  ;;  %v1896_v37 = vrot.slane %v1788_v29, 5  ;;  %v1789_v47 = vld [vmem:[#allocation2 + $0x30] sm:$0xe]  ;;  %v1890_v38 = vsel %vm6434_vm5, %v1888_v27, %v1889_v28  ;;  %v1900_v44 = vrot.slane %v1790_v1, 5 }
  0xb9   : > { %1243 = vst.msk [vmem:[#allocation3 + $0x64] sm:$0xf] %vm664_vm8, %v1213_v31  ;;  %vm1746_vm6 = vcmask 60448   ;;  %v1214_v45 = vld [vmem:[#allocation2 + $0x9c] sm:$0xf]  ;;  %v1673_v59 = vpop.permute.xlu0 %1672  ;;  %v1894_v48 = vsel %vm6434_vm5, %v5344_v36, %v1893_v25  ;;  %v5345_v61 = vrot.slane %v1789_v47, 9 }
  0xba   : > { %v1215_v53 = vld [vmem:[#allocation2 + $0xa0] sm:$0xf]  ;;  %v1791_v54 = vld [vmem:[#allocation2 + $0x38] sm:$0x1]  ;;  %1751 = vst.msk [vmem:[#allocation3 + $0x10] sm:$0xf] %vm1746_vm6, %v1665_v16  ;;  %v1897_v2 = vsel %vm6434_vm5, %v1895_v62, %v1896_v37 }
  0xbb   : > { %1977 = vrot.lane.b32.xlu1 %v1876_v17, %s5839_s14  ;;  %v1793_v56 = vld [vmem:[#allocation2 + $0x40] sm:$0xf]  ;;  %1749 = vst.msk [vmem:[#allocation3 + $0x8] sm:$0xf] %vm1746_vm6, %v1661_v51  ;;  %1753 = vst.msk [vmem:[#allocation3 + $0x18] sm:$0xf] %vm1746_vm6, %v1669_v41  ;;  %v1901_v46 = vsel %vm6434_vm5, %v5345_v61, %v1900_v44 }
  0xbc   : > { %1979 = vrot.lane.b32.xlu0 %v1880_v21, %s5839_s14  ;;  %1750 = vst.msk [vmem:[#allocation3 + $0xc] sm:$0xf] %vm1746_vm6, %v1663_v30  ;;  %1752 = vst.msk [vmem:[#allocation3 + $0x14] sm:$0xf] %vm1746_vm6, %v1667_v34  ;;  %v1792_v63 = vld [vmem:[#allocation2 + $0x3c] sm:$0xe] }
  0xbd   : > { %1244 = vst.msk [vmem:[#allocation3 + $0x68] sm:$0xf] %vm664_vm8, %v1214_v45  ;;  %1245 = vst.msk [vmem:[#allocation3 + $0x6c] sm:$0xf] %vm664_vm8, %v1215_v53  ;;  %v1902_v3 = vrot.slane %v1900_v44, 4  ;;  %v1903_v4 = vrot.slane %v1791_v54, 5 }
  0xbe   : > { %1755 = vst.msk [vmem:[#allocation3 + $0x20] sm:$0xf] %vm1746_vm6, %v1673_v59  ;;  %v1907_v5 = vrot.slane %v1793_v56, 5  ;;  %v1216_v58 = vld [vmem:[#allocation2 + $0xa8] sm:$0xf]  ;;  %v5346_v9 = vrot.slane %v1792_v63, 9 }
  0xbf   : > { %1981 = vrot.lane.b32.xlu1 %v1883_v42, %s5839_s14  ;;  %v1794_v6 = vld [vmem:[#allocation2 + $0x44] sm:$0x1]  ;;  %v1796_v7 = vld [vmem:[#allocation2 + $0x4c] sm:$0xf]  ;;  %1246 = vst.msk [vmem:[#allocation3 + $0x70] sm:$0xf] %vm664_vm8, %v1216_v58  ;;  %v1904_v10 = vsel %vm6434_vm5, %v1902_v3, %v1903_v4 }
  0xc0   : > { %1983 = vrot.lane.b32.xlu0 %v1887_v35, %s5839_s14  ;;  %v1217_v32 = vld [vmem:[#allocation2 + $0xac] sm:$0xf]  ;;  %v1795_v52 = vld [vmem:[#allocation2 + $0x48] sm:$0xe]  ;;  %v1909_v11 = vrot.slane %v1907_v5, 4  ;;  %v1910_v57 = vrot.slane %v1794_v6, 5  ;;  %v1908_v16 = vsel %vm6434_vm5, %v5346_v9, %v1907_v5 }
  0xc1   : > { %1247 = vst.msk [vmem:[#allocation3 + $0x74] sm:$0xf] %vm664_vm8, %v1217_v32  ;;  %v1914_v49 = vrot.slane %v1796_v7, 5  ;;  %v1797_v12 = vld [vmem:[#allocation2 + $0x50] sm:$0x1]  ;;  %v1671_v14 = vpop.permute.xlu1 %1670  ;;  %v5347_v17 = vrot.slane %v1795_v52, 9 }
  0xc2   : > { %v1799_v13 = vld [vmem:[#allocation2 + $0x58] sm:$0xf]  ;;  %1754 = vst.msk [vmem:[#allocation3 + $0x1c] sm:$0xf] %vm1746_vm6, %v1671_v14  ;;  %v1798_v40 = vld [vmem:[#allocation2 + $0x54] sm:$0xe]  ;;  %v1911_v50 = vsel %vm6434_vm5, %v1909_v11, %v1910_v57 }
  0xc3   : > { %1985 = vrot.lane.b32.xlu1 %v1890_v38, %s5839_s14  ;;  %v1916_v39 = vrot.slane %v1914_v49, 4  ;;  %v1917_v26 = vrot.slane %v1797_v12, 5  ;;  %v1921_v51 = vrot.slane %v1799_v13, 5  ;;  %v1800_v20 = vld [vmem:[#allocation2 + $0x5c] sm:$0x1]  ;;  %v1915_v19 = vsel %vm6434_vm5, %v5347_v17, %v1914_v49  ;;  %s5840_s10 = smov 12  }
  0xc4   : > { %1987 = vrot.lane.b32.xlu0 %v1894_v48, %s5839_s14  ;;  %v1677_v18 = vpop.permute.xlu0 %1676  ;;  %v1802_v21 = vld [vmem:[#allocation2 + $0x64] sm:$0xf]  ;;  %v5348_v22 = vrot.slane %v1798_v40, 9  ;;  %v1801_v25 = vld [vmem:[#allocation2 + $0x60] sm:$0xe]  ;;  %v1924_v27 = vrot.slane %v1800_v20, 5 }
  0xc5   : > { %1757 = vst.msk [vmem:[#allocation3 + $0x28] sm:$0xf] %vm1746_vm6, %v1677_v18  ;;  %v1918_v41 = vsel %vm6434_vm5, %v1916_v39, %v1917_v26  ;;  %v1923_v42 = vrot.slane %v1921_v51, 4  ;;  %v1928_v28 = vrot.slane %v1802_v21, 5  ;;  %v1803_v29 = vld [vmem:[#allocation2 + $0x68] sm:$0x1] }
  0xc6   : > { %v1675_v24 = vpop.permute.xlu1 %1674  ;;  %v1805_v30 = vld [vmem:[#allocation2 + $0x70] sm:$0xf]  ;;  %v1922_v33 = vsel %vm6434_vm5, %v5348_v22, %v1921_v51  ;;  %v5349_v1 = vrot.slane %v1801_v25, 9  ;;  %v1804_v31 = vld [vmem:[#allocation2 + $0x6c] sm:$0xe]  ;;  %v1931_v62 = vrot.slane %v1803_v29, 5 }
  0xc7   : > { %1989 = vrot.lane.b32.xlu1 %v1897_v2, %s5839_s14  ;;  %1756 = vst.msk [vmem:[#allocation3 + $0x24] sm:$0xf] %vm1746_vm6, %v1675_v24  ;;  %v1925_v35 = vsel %vm6434_vm5, %v1923_v42, %v1924_v27  ;;  %v1930_v36 = vrot.slane %v1928_v28, 4  ;;  %v1935_v37 = vrot.slane %v1805_v30, 5  ;;  %v1806_v47 = vld [vmem:[#allocation2 + $0x74] sm:$0x1] }
  0xc8   : > { %1991 = vrot.lane.b32.xlu0 %v1901_v46, %s5839_s14  ;;  %v1808_v38 = vld [vmem:[#allocation2 + $0x7c] sm:$0xf]  ;;  %v1929_v44 = vsel %vm6434_vm5, %v5349_v1, %v1928_v28  ;;  %v5350_v34 = vrot.slane %v1804_v31, 9  ;;  %v1807_v45 = vld [vmem:[#allocation2 + $0x78] sm:$0xe]  ;;  %v1938_v59 = vrot.slane %v1806_v47, 5 }
  0xc9   : > { %v1932_v54 = vsel %vm6434_vm5, %v1930_v36, %v1931_v62  ;;  %v1937_v56 = vrot.slane %v1935_v37, 4  ;;  %v1942_v48 = vrot.slane %v1808_v38, 5  ;;  %v1809_v63 = vld [vmem:[#allocation2 + $0x80] sm:$0x1]  ;;  %v1811_v2 = vld [vmem:[#allocation2 + $0x88] sm:$0xf] }
  0xca   : > { %v1936_v3 = vsel %vm6434_vm5, %v5350_v34, %v1935_v37  ;;  %v5351_v4 = vrot.slane %v1807_v45, 9  ;;  %v1810_v5 = vld [vmem:[#allocation2 + $0x84] sm:$0xe]  ;;  %v1945_v7 = vrot.slane %v1809_v63, 5  ;;  %v1949_v32 = vrot.slane %v1811_v2, 5 }
  0xcb   : > { %1993 = vrot.lane.b32.xlu1 %v1904_v10, %s5839_s14  ;;  %v1939_v58 = vsel %vm6434_vm5, %v1937_v56, %v1938_v59  ;;  %v1944_v6 = vrot.slane %v1942_v48, 4  ;;  %v1812_v46 = vld [vmem:[#allocation2 + $0x8c] sm:$0x1]  ;;  %v1814_v9 = vld [vmem:[#allocation2 + $0x94] sm:$0xf]  ;;  %v5352_v10 = vrot.slane %v1810_v5, 9 }
  0xcc   : > { %1995 = vrot.lane.b32.xlu0 %v1908_v16, %s5839_s14  ;;  %v1943_v52 = vsel %vm6434_vm5, %v5351_v4, %v1942_v48  ;;  %v1813_v11 = vld [vmem:[#allocation2 + $0x90] sm:$0xe]  ;;  %v1951_v12 = vrot.slane %v1949_v32, 4  ;;  %v1952_v13 = vrot.slane %v1812_v46, 5  ;;  %v1956_v14 = vrot.slane %v1814_v9, 5 }
  0xcd   : > { %v1946_v49 = vsel %vm6434_vm5, %v1944_v6, %v1945_v7  ;;  %v1815_v16 = vld [vmem:[#allocation2 + $0x98] sm:$0x1]  ;;  %v1817_v17 = vld [vmem:[#allocation2 + $0xa0] sm:$0xf]  ;;  %v1950_v40 = vsel %vm6434_vm5, %v5352_v10, %v1949_v32  ;;  %v1816_v39 = vld [vmem:[#allocation2 + $0x9c] sm:$0xe] }
  0xce   : > { %v1953_v26 = vsel %vm6434_vm5, %v1951_v12, %v1952_v13  ;;  %v1958_v51 = vrot.slane %v1956_v14, 4  ;;  %v1959_v18 = vrot.slane %v1815_v16, 5  ;;  %v1963_v20 = vrot.slane %v1817_v17, 5  ;;  %v1820_v22 = vld [vmem:[#allocation2 + $0xac] sm:$0xf] }
  0xcf   : > { %1997 = vrot.lane.b32.xlu1 %v1911_v50, %s5839_s14  ;;  %v1681_v53 = vpop.permute.xlu0 %1680  ;;  %v5353_v50 = vrot.slane %v1813_v11, 9  ;;  %v5354_v25 = vrot.slane %v1816_v39, 9  ;;  %v1819_v42 = vld [vmem:[#allocation2 + $0xa8] sm:$0xe]  ;;  %v1970_v30 = vrot.slane %v1820_v22, 5  ;;  %vm4321_vm7 = vcmask 1041408  }
  0xd0   : > { %1999 = vrot.lane.b32.xlu0 %v1915_v19, %s5839_s14  ;;  %1759 = vst.msk [vmem:[#allocation3 + $0x30] sm:$0xf] %vm1746_vm6, %v1681_v53  ;;  %v1679_v61 = vpop.permute.xlu1 %1678  ;;  %v1818_v19 = vld [vmem:[#allocation2 + $0xa4] sm:$0x1]  ;;  %v1960_v27 = vsel %vm6434_vm5, %v1958_v51, %v1959_v18  ;;  %v1965_v28 = vrot.slane %v1963_v20, 4  ;;  %v5355_v31 = vrot.slane %v1819_v42, 9 }
  0xd1   : > { %1758 = vst.msk [vmem:[#allocation3 + $0x2c] sm:$0xf] %vm1746_vm6, %v1679_v61  ;;  %v1957_v24 = vsel %vm6434_vm5, %v5353_v50, %v1956_v14  ;;  %v1966_v29 = vrot.slane %v1818_v19, 5  ;;  %v1964_v1 = vsel %vm6434_vm5, %v5354_v25, %v1963_v20  ;;  %v1972_v36 = vrot.slane %v1970_v30, 4  ;;  %v2096_v34 = vld [vmem:[#allocation2 + $0xc] sm:$0xf] }
  0xd2   : > { %v1971_v47 = vsel %vm6434_vm5, %v5355_v31, %v1970_v30  ;;  %v2097_v53 = vld [vmem:[#allocation2 + $0x10] sm:$0xf]  ;;  %v2099_v56 = vld [vmem:[#allocation2 + $0x1c] sm:$0xf]  ;;  %v2100_v48 = vld [vmem:[#allocation2 + $0x24] sm:$0xf] }
  0xd3   : > { %2001 = vrot.lane.b32.xlu1 %v1918_v41, %s5839_s14  ;;  %v2101_v61 = vld [vmem:[#allocation2 + $0x28] sm:$0xf]  ;;  %v2102_v63 = vld [vmem:[#allocation2 + $0x30] sm:$0xf]  ;;  %v2277_v2 = vld [vmem:[#allocation2 + $0xc] sm:$0xf] }
  0xd4   : > { %2003 = vrot.lane.b32.xlu0 %v1922_v33, %s5839_s14  ;;  %v1821_v33 = vld [vmem:[#allocation2 + $0xb0] sm:$0x1]  ;;  %v2323_v7 = vshrl.u32 %v2277_v2, 16  ;;  %v2326_v32 = vshll.u32 %v2277_v2, 16  ;;  %v2105_v46 = vld [vmem:[#allocation2 + $0x40] sm:$0xf] }
  0xd5   : > { %v1973_v62 = vrot.slane %v1821_v33, 5  ;;  %v2278_v5 = vld [vmem:[#allocation2 + $0x10] sm:$0xf]  ;;  %v2106_v11 = vld [vmem:[#allocation2 + $0x48] sm:$0xf]  ;;  %vm5846_vm9 = vmmov 0  }
  0xd6   : > { %v2332_v9 = vshll.u32 %v2278_v5, 16  ;;  %v2107_v13 = vld [vmem:[#allocation2 + $0x4c] sm:$0xf]  ;;  %v2279_v16 = vld [vmem:[#allocation2 + $0x14] sm:$0x1]  ;;  %vm2065_vm10 = vcmask 93248  }
  0xd7   : > { %2005 = vrot.lane.b32.xlu1 %v1925_v35, %s5839_s14  ;;  %v1967_v35 = vsel %vm6434_vm5, %v1965_v28, %v1966_v29  ;;  %v3301_v39 = vld [vmem:[#allocation2 + $0x18] sm:$0xf]  ;;  %v2804_v20 = vld [vmem:[#allocation2 + $0x10] sm:$0xf]  ;;  %v3302_v19 = vld [vmem:[#allocation2 + $0x1c] sm:$0xf] }
  0xd8   : > { %2007 = vrot.lane.b32.xlu0 %v1929_v44, %s5839_s14  ;;  %v1685_v57 = vpop.permute.xlu0 %1684  ;;  %v1974_v44 = vsel %vm6434_vm5, %v1972_v36, %v1973_v62  ;;  %v2334_v14 = vrot.slane %v2332_v9, 5  ;;  %v2109_v51 = vld [vmem:[#allocation2 + $0x58] sm:$0xf]  ;;  %v3347_v22 = vshrl.u32 %v3301_v39, 16  ;;  %v2110_v25 = vld [vmem:[#allocation2 + $0x60] sm:$0xf] }
  0xd9   : > { %1761 = vst.msk [vmem:[#allocation3 + $0x38] sm:$0xf] %vm1746_vm6, %v1685_v57  ;;  %v2325_v57 = vrot.slane %v2323_v7, 4  ;;  %v2803_v29 = vld [vmem:[#allocation2 + $0xc] sm:$0xe]  ;;  %v2895_v33 = vrot.slane %v2804_v20, 5 }
  0xda   : > { %v3356_v31 = vshll.u32 %v3302_v19, 16  ;;  %v3349_v36 = vrot.slane %v3347_v22, 4  ;;  %v2280_v2 = vld [vmem:[#allocation2 + $0x18] sm:$0xf]  ;;  %v3828_v7 = vld [vmem:[#allocation2 + $0x1c] sm:$0xf] }
  0xdb   : > { %2009 = vrot.lane.b32.xlu1 %v1932_v54, %s5839_s14  ;;  %v2098_v54 = vld [vmem:[#allocation2 + $0x18] sm:$0xf]  ;;  %v5698_v22 = vld [vmem:[%s7801_s3] sm:$0xff]   ;;  %vm2246_vm11 = vcmask 126048   ;;  %vm2772_vm14 = vcmask 158848   ;;  %vm3088_vm15 = vcmask 191648  }
  0xdc   : > { %2011 = vrot.lane.b32.xlu0 %v1936_v3, %s5839_s14  ;;  %v2103_v3 = vld [vmem:[#allocation2 + $0x34] sm:$0xf]  ;;  %vm3270_vm0 = vcmask 224448   ;;  %vm514_vm3 = vcmp.gt.s32.totalorder %v5981_v15, 14  ;;  %v7261_v43 = vld [vmem:[%s7802_s4] ss:$0 sm:$0xff] }
  0xdd   : > { %v1689_v21 = vpop.permute.xlu0 %1688 }
  0xde   : > { %1763 = vst.msk [vmem:[#allocation3 + $0x40] sm:$0xf] %vm1746_vm6, %v1689_v21 }
  0xdf   : > { %2013 = vrot.lane.b32.xlu1 %v1939_v58, %s5839_s14  ;;  %v1683_v41 = vpop.permute.xlu1 %1682  ;;  %v2104_v58 = vld [vmem:[#allocation2 + $0x3c] sm:$0xf] }
  0xe0   : > { %2015 = vrot.lane.b32.xlu0 %v1943_v52, %s5839_s14  ;;  %1760 = vst.msk [vmem:[#allocation3 + $0x34] sm:$0xf] %vm1746_vm6, %v1683_v41  ;;  %v2336_v52 = vshrl.u32 %v2278_v5, 16 }
  0xe2   : > { %v2338_v17 = vrot.slane %v2336_v52, 4  ;;  %v3827_v52 = vld [vmem:[#allocation2 + $0x18] sm:$0xe] }
  0xe3   : > { %2017 = vrot.lane.b32.xlu1 %v1946_v49, %s5839_s14  ;;  %v2328_v49 = vrot.slane %v2326_v32, 5  ;;  %v2281_v32 = vld [vmem:[#allocation2 + $0x1c] sm:$0xf] }
  0xe4   : > { %2019 = vrot.lane.b32.xlu0 %v1950_v40, %s5839_s14  ;;  %v2108_v40 = vld [vmem:[#allocation2 + $0x54] sm:$0xf]  ;;  %v2339_v18 = vor.u32 %v2338_v17, %v2334_v14 }
  0xe5   : > { %v1687_v37 = vpop.permute.xlu1 %1686  ;;  %v2329_v50 = vor.u32 %v2328_v49, %v2325_v57  ;;  %v5697_v57 = vld [vmem:[%s7801_s3 + $0x8] sm:$0xff]   ;;  %v3121_v49 = vld [vmem:[#allocation2 + $0x1c] sm:$0xf] }
  0xe6   : > { %1762 = vst.msk [vmem:[#allocation3 + $0x3c] sm:$0xf] %vm1746_vm6, %v1687_v37  ;;  %v2340_v30 = vrot.slane %v2339_v18, 4 }
  0xe7   : > { %2021 = vrot.lane.b32.xlu1 %v1953_v26, %s5839_s14  ;;  %v2342_v26 = vshll.u32 %v2279_v16, 16  ;;  %v2330_v41 = vrot.slane %v2329_v50, 4  ;;  %v2360_v50 = vshrl.u32 %v2281_v32, 16 }
  0xe8   : > { %2023 = vrot.lane.b32.xlu0 %v1957_v24, %s5839_s14  ;;  %v1693_v38 = vpop.permute.xlu0 %1692  ;;  %v3350_v24 = vshll.u32 %v3301_v39, 16 }
  0xe9   : > { %1765 = vst.msk [vmem:[#allocation3 + $0x48] sm:$0xf] %vm1746_vm6, %v1693_v38  ;;  %v2344_v28 = vrot.slane %v2342_v26, 5  ;;  %v2335_v37 = vsel %vm6080_vm1, %v2330_v41, %v2334_v14  ;;  %v2301_v14 = vld [vmem:[#allocation2 + $0x6c] sm:$0xf]  ;;  %v5371_v26 = vrot.slane %v3827_v52, 9 }
  0xea   : > { %v3352_v62 = vrot.slane %v3350_v24, 5 }
  0xeb   : > { %2025 = vrot.lane.b32.xlu1 %v1960_v27, %s5839_s14  ;;  %v2111_v27 = vld [vmem:[#allocation2 + $0x64] sm:$0xf] }
  0xec   : > { %2027 = vrot.lane.b32.xlu0 %v1964_v1, %s5839_s14  ;;  %v1691_v45 = vpop.permute.xlu1 %1690  ;;  %v2805_v1 = vld [vmem:[#allocation2 + $0x14] sm:$0x1] }
  0xed   : > { %1764 = vst.msk [vmem:[#allocation3 + $0x44] sm:$0xf] %vm1746_vm6, %v1691_v45  ;;  %v2898_v38 = vrot.slane %v2805_v1, 5  ;;  %v6589_v45 = vrot.slane %v3356_v31, 5 }
  0xef   : > { %2029 = vrot.lane.b32.xlu1 %v1967_v35, %s5839_s14  ;;  %v3360_v35 = vshrl.u32 %v3302_v19, 16  ;;  %v2518_v19 = vshll.u32 %v2301_v14, 16 }
  0xf0   : > { %2031 = vrot.lane.b32.xlu0 %v1971_v47, %s5839_s14  ;;  %v5356_v47 = vrot.slane %v2803_v29, 9 }
  0xf3   : > { %2033 = vrot.lane.b32.xlu1 %v1974_v44, %s5839_s14  ;;  %v2345_v44 = vsel %vm6080_vm1, %v2340_v30, %v2344_v28  ;;  %v2362_v28 = vrot.slane %v2360_v50, 4 }
  0xf4   : > { %2156 = vrot.lane.b32.xlu0 %v2096_v34, %s5840_s10  ;;  %v1697_v59 = vpop.permute.xlu0 %1696  ;;  %v2897_v34 = vrot.slane %v2895_v33, 4 }
  0xf5   : > { %1767 = vst.msk [vmem:[#allocation3 + $0x50] sm:$0xf] %vm1746_vm6, %v1697_v59  ;;  %v3303_v59 = vld [vmem:[#allocation2 + $0x20] sm:$0x1] }
  0xf6   : > { %v2899_v5 = vsel %vm6434_vm5, %v2897_v34, %v2898_v38 }
  0xf7   : > { %2158 = vrot.lane.b32.xlu1 %v2097_v53, %s5840_s10  ;;  %v3362_v53 = vrot.slane %v3360_v35, 4 }
  0xf8   : > { %2160 = vrot.lane.b32.xlu0 %v2098_v54, %s5840_s10 }
  0xfb   : > { %2162 = vrot.lane.b32.xlu1 %v2099_v56, %s5840_s10  ;;  %v3353_v56 = vor.u32 %v3352_v62, %v3349_v36  ;;  %v2520_v62 = vrot.slane %v2518_v19, 5  ;;  %v2829_v19 = vld [vmem:[#allocation2 + $0x74] sm:$0x1] }
  0xfc   : > { %2164 = vrot.lane.b32.xlu0 %v2100_v48, %s5840_s10  ;;  %v5696_v48 = vld [vmem:[%s7801_s3 + $0x10] ss:$0 sps:$4 sm:$0x33]  }
  0xfd   : > { %v3354_v9 = vrot.slane %v3353_v56, 4 }
  0xfe   : > { %v1657_v4 = vpop.permute.xlu0 %1656 }
  0xff   : > { %2166 = vrot.lane.b32.xlu1 %v2101_v61, %s5840_s10  ;;  %1747 = vst.msk [vmem:[#allocation3] sm:$0xf] %vm1746_vm6, %v1657_v4  ;;  %v1695_v6 = vpop.permute.xlu1 %1694  ;;  %v2896_v61 = vsel %vm6434_vm5, %v5356_v47, %v2895_v33  ;;  %v4323_v4 = vsel %vm4321_vm7, %v5696_v48, 0  ;;  %v3359_v39 = vsel %vm6080_vm1, %v3354_v9, %v6589_v45  ;;  %v2282_v33 = vld [vmem:[#allocation2 + $0x20] sm:$0x1]  ;;  %vm4112_vm7 = vcmask 290048  }
 0x100   : > { %2168 = vrot.lane.b32.xlu0 %v2102_v63, %s5840_s10  ;;  %1766 = vst.msk [vmem:[#allocation3 + $0x4c] sm:$0xf] %vm1746_vm6, %v1695_v6  ;;  %v3366_v6 = vshll.u32 %v3303_v59, 16  ;;  %v2366_v38 = vshll.u32 %v2282_v33, 16  ;;  %v2113_v48 = vld [vmem:[#allocation2 + $0x70] sm:$0xf] }
 0x102   : > { %v1659_v10 = vpop.permute.xlu0 %1658  ;;  %v3368_v17 = vrot.slane %v3366_v6, 5 }
 0x103   : > { %2170 = vrot.lane.b32.xlu1 %v2103_v3, %s5840_s10  ;;  %1748 = vst.msk [vmem:[#allocation3 + $0x4] sm:$0xf] %vm1746_vm6, %v1659_v10  ;;  %v1699_v12 = vpop.permute.xlu1 %1698  ;;  %v5842_v3 = vmov 0.0   ;;  %v2347_v10 = vshrl.u32 %v2280_v2, 16 }
 0x104   : > { %2172 = vrot.lane.b32.xlu0 %v2104_v58, %s5840_s10  ;;  %1768 = vst.msk [vmem:[#allocation3 + $0x54] sm:$0xf] %vm1746_vm6, %v1699_v12  ;;  %5491 = vmatprep.subr.bf16.mxu0 %v5842_v3  ;;  %v3363_v58 = vor.u32 %v3362_v53, %v6589_v45  ;;  %v3919_v12 = vrot.slane %v3828_v7, 5  ;;  %v2303_v45 = vld [vmem:[#allocation2 + $0x74] sm:$0x1] }
 0x105   : > { %5492 = vmatpush3.bf16.msra.mxu0 %v4323_v4  ;;  %5557 = vmatprep.subr.bf16.mxu1 %v5842_v3  ;;  %v2349_v18 = vrot.slane %v2347_v10, 4  ;;  %v2112_v53 = vld [vmem:[#allocation2 + $0x6c] sm:$0xf] }
 0x106   : > { %5493 = vmatprep.subr.bf16.mxu0 %v5842_v3  ;;  %5560 = vmatpush3.bf16.msra.mxu1 %v4323_v4  ;;  %v3364_v16 = vrot.slane %v3363_v58, 4  ;;  %v3921_v24 = vrot.slane %v3919_v12, 4  ;;  %v3920_v31 = vsel %vm6434_vm5, %v5371_v26, %v3919_v12  ;;  %v2534_v4 = vshll.u32 %v2303_v45, 16  ;;  %v2807_v58 = vld [vmem:[#allocation2 + $0x1c] sm:$0xf] }
 0x107   : > { %2174 = vrot.lane.b32.xlu1 %v2105_v46, %s5840_s10  ;;  %v3120_v46 = vld [vmem:[#allocation2 + $0x18] sm:$0xf]  ;;  %5558 = vmatprep.subr.bf16.mxu1 %v5842_v3  ;;  %v2828_v12 = vld [vmem:[#allocation2 + $0x70] sm:$0xf] }
 0x108   : > { %2176 = vrot.lane.b32.xlu0 %v2106_v11, %s5840_s10  ;;  %v2350_v11 = vshll.u32 %v2280_v2, 16  ;;  %5497 = vmatprep.mubr.msk.bf16.mxu0 %vm5846_vm9, %v5842_v3  ;;  %v2536_v10 = vrot.slane %v2534_v4, 5 }
 0x109   : > { %5494 = vmatpush3.bf16.msra.mxu0 %v5697_v57  ;;  %5529 = vmatprep.mubr.msk.bf16.mxu1 %vm5846_vm9, %v5842_v3 }
 0x10a   : > { %5495 = vmatprep.subr.bf16.mxu0 %v5842_v3  ;;  %v2352_v20 = vrot.slane %v2350_v11, 5  ;;  %5561 = vmatpush3.bf16.msra.mxu1 %v5697_v57  ;;  %v2902_v11 = vrot.slane %v2807_v58, 5 }
 0x10b   : > { %2178 = vrot.lane.b32.xlu1 %v2107_v13, %s5840_s10  ;;  %v1701_v21 = vpop.permute.xlu0 %1700  ;;  %v2356_v13 = vshll.u32 %v2281_v32, 16  ;;  %5559 = vmatprep.subr.bf16.mxu1 %v5842_v3 }
 0x10c   : > { %2180 = vrot.lane.b32.xlu0 %v2108_v40, %s5840_s10  ;;  %1769 = vst.msk [vmem:[#allocation3 + $0x58] sm:$0xf] %vm1746_vm6, %v1701_v21  ;;  %v1703_v42 = vpop.permute.xlu1 %1702  ;;  %v3829_v40 = vld [vmem:[#allocation2 + $0x20] sm:$0x1]  ;;  %v2515_v21 = vshrl.u32 %v2301_v14, 16  ;;  %v2353_v35 = vor.u32 %v2352_v20, %v2349_v18 }
 0x10d   : > { %1770 = vst.msk [vmem:[#allocation3 + $0x5c] sm:$0xf] %vm1746_vm6, %v1703_v42  ;;  %v2358_v41 = vrot.slane %v2356_v13, 5  ;;  %v3369_v42 = vsel %vm6080_vm1, %v3364_v16, %v3368_v17  ;;  %5496 = vmatpush3.bf16.msra.mxu0 %v5698_v22  ;;  %v2827_v16 = vld [vmem:[#allocation2 + $0x6c] sm:$0xe] }
 0x10e   : > { %v2517_v36 = vrot.slane %v2515_v21, 4  ;;  %5562 = vmatpush3.bf16.msra.mxu1 %v5698_v22  ;;  %v3305_v18 = vld [vmem:[#allocation2 + $0x28] sm:$0xf]  ;;  %v5364_v21 = vrot.slane %v2827_v16, 9 }
 0x10f   : > { %2182 = vrot.lane.b32.xlu1 %v2109_v51, %s5840_s10  ;;  %v2302_v51 = vld [vmem:[#allocation2 + $0x70] sm:$0xf]  ;;  %v2363_v47 = vor.u32 %v2362_v28, %v2358_v41  ;;  %v3384_v33 = vshrl.u32 %v3305_v18, 16 }
 0x110   : > { %2184 = vrot.lane.b32.xlu0 %v2110_v25, %s5840_s10  ;;  %v3922_v25 = vrot.slane %v3829_v40, 5  ;;  %v2524_v29 = vshll.u32 %v2302_v51, 16  ;;  %v2528_v30 = vshrl.u32 %v2302_v51, 16  ;;  %v2521_v56 = vor.u32 %v2520_v62, %v2517_v36  ;;  %v3304_v40 = vld [vmem:[#allocation2 + $0x24] sm:$0xf] }
 0x111   : > { %v2951_v51 = vrot.slane %v2828_v12, 5  ;;  %v3386_v45 = vrot.slane %v3384_v33, 4 }
 0x112   : > { %v2530_v34 = vrot.slane %v2528_v30, 4  ;;  %v2522_v7 = vrot.slane %v2521_v56, 4  ;;  %v2954_v30 = vrot.slane %v2829_v19, 5 }
 0x113   : > { %2186 = vrot.lane.b32.xlu1 %v2111_v27, %s5840_s10 }
 0x114   : > { %2682 = vrot.lane.b32.xlu0 %v2335_v37, %s5841_s17  ;;  %v1705_v54 = vpop.permute.xlu0 %1704  ;;  %v3923_v37 = vsel %vm6434_vm5, %v3921_v24, %v3922_v25  ;;  %v3371_v24 = vshrl.u32 %v3304_v40, 16  ;;  %v3374_v25 = vshll.u32 %v3304_v40, 16 }
 0x115   : > { %1771 = vst.msk [vmem:[#allocation3 + $0x60] sm:$0xf] %vm1746_vm6, %v1705_v54  ;;  %v2354_v54 = vrot.slane %v2353_v35, 4  ;;  %v3326_v35 = vld [vmem:[#allocation2 + $0x7c] sm:$0xf] }
 0x116   : > { %v1707_v63 = vpop.permute.xlu1 %1706  ;;  %v3373_v36 = vrot.slane %v3371_v24, 4  ;;  %v3376_v62 = vrot.slane %v3374_v25, 5  ;;  %v3832_v24 = vld [vmem:[#allocation2 + $0x2c] sm:$0x1]  ;;  %v3852_v25 = vld [vmem:[#allocation2 + $0x7c] sm:$0xf] }
 0x117   : > { %2684 = vrot.lane.b32.xlu1 %v2345_v44, %s5841_s17  ;;  %1772 = vst.msk [vmem:[#allocation3 + $0x64] sm:$0xf] %vm1746_vm6, %v1707_v63  ;;  %v2526_v44 = vrot.slane %v2524_v29, 5  ;;  %v2368_v63 = vrot.slane %v2366_v38, 5  ;;  %v2359_v6 = vsel %vm6080_vm1, %v2354_v54, %v2358_v41  ;;  %v2953_v29 = vrot.slane %v2951_v51, 4 }
 0x118   : > { %2998 = vrot.lane.b32.xlu0 %v2896_v61, %s5843_s20  ;;  %v2364_v61 = vrot.slane %v2363_v47, 4  ;;  %v3552_v54 = vshrl.u32 %v3326_v35, 16 }
 0x119   : > { %v2531_v2 = vor.u32 %v2530_v34, %v2526_v44  ;;  %v2527_v13 = vsel %vm6080_vm1, %v2522_v7, %v2526_v44  ;;  %v2955_v34 = vsel %vm6434_vm5, %v2953_v29, %v2954_v30  ;;  %v3851_v29 = vld [vmem:[#allocation2 + $0x78] sm:$0xe] }
 0x11a   : > { %v2369_v9 = vsel %vm6080_vm1, %v2364_v61, %v2368_v63  ;;  %v3377_v61 = vor.u32 %v3376_v62, %v3373_v36  ;;  %v3975_v36 = vrot.slane %v3852_v25, 5  ;;  %v2304_v62 = vld [vmem:[#allocation2 + $0x78] sm:$0xf] }
 0x11b   : > { %3000 = vrot.lane.b32.xlu1 %v2899_v5, %s5843_s20  ;;  %v2532_v52 = vrot.slane %v2531_v2, 4 }
 0x11c   : > { %3180 = vrot.lane.b32.xlu0 %v3120_v46, %s5844_s11  ;;  %v2806_v46 = vld [vmem:[#allocation2 + $0x18] sm:$0xe] }
 0x11d   : > { %v5357_v14 = vrot.slane %v2806_v46, 9  ;;  %v2537_v50 = vsel %vm6080_vm1, %v2532_v52, %v2536_v10  ;;  %v3136_v52 = vld [vmem:[#allocation2 + $0x78] sm:$0xf]  ;;  %v3378_v10 = vrot.slane %v3377_v61, 4  ;;  %v2542_v61 = vshll.u32 %v2304_v62, 16 }
 0x11e   : > { %v1709_v27 = vpop.permute.xlu0 %1708 }
 0x11f   : > { %3182 = vrot.lane.b32.xlu1 %v3121_v49, %s5844_s11  ;;  %1773 = vst.msk [vmem:[#allocation3 + $0x68] sm:$0xf] %vm1746_vm6, %v1709_v27  ;;  %v2808_v49 = vld [vmem:[#allocation2 + $0x20] sm:$0x1]  ;;  %v2903_v22 = vsel %vm6434_vm5, %v5357_v14, %v2902_v11  ;;  %v3325_v27 = vld [vmem:[#allocation2 + $0x78] sm:$0xf] }
 0x120   : > { %3706 = vrot.lane.b32.xlu0 %v3359_v39, %s5845_s19  ;;  %v2904_v39 = vrot.slane %v2902_v11, 4  ;;  %v2905_v26 = vrot.slane %v2808_v49, 5  ;;  %v3542_v47 = vshll.u32 %v3325_v27, 16  ;;  %v3137_v49 = vld [vmem:[#allocation2 + $0x7c] sm:$0xf] }
 0x121   : > { %v1711_v1 = vpop.permute.xlu1 %1710 }
 0x122   : > { %1774 = vst.msk [vmem:[#allocation3 + $0x6c] sm:$0xf] %vm1746_vm6, %v1711_v1  ;;  %v2906_v28 = vsel %vm6434_vm5, %v2904_v39, %v2905_v26  ;;  %v3544_v2 = vrot.slane %v3542_v47, 5  ;;  %v3830_v26 = vld [vmem:[#allocation2 + $0x24] sm:$0xe] }
 0x123   : > { %3708 = vrot.lane.b32.xlu1 %v3369_v42, %s5845_s19  ;;  %v3380_v42 = vshll.u32 %v3305_v18, 16  ;;  %v3853_v47 = vld [vmem:[#allocation2 + $0x80] sm:$0x1] }
 0x124   : > { %4022 = vrot.lane.b32.xlu0 %v3920_v31, %s5847_s30  ;;  %v2952_v31 = vsel %vm6434_vm5, %v5364_v21, %v2951_v51 }
 0x125   : > { %v3382_v44 = vrot.slane %v3380_v42, 5  ;;  %v5372_v42 = vrot.slane %v3830_v26, 9 }
 0x126   : > { %v1713_v59 = vpop.permute.xlu0 %1712 }
 0x127   : > { %4024 = vrot.lane.b32.xlu1 %v3923_v37, %s5847_s30  ;;  %1775 = vst.msk [vmem:[#allocation3 + $0x70] sm:$0xf] %vm1746_vm6, %v1713_v59  ;;  %v3539_v37 = vshrl.u32 %v3325_v27, 16  ;;  %v3306_v59 = vld [vmem:[#allocation2 + $0x2c] sm:$0x1]  ;;  %v3387_v58 = vor.u32 %v3386_v45, %v3382_v44 }
 0x128   : > { %2188 = vrot.lane.b32.xlu0 %v2112_v53, %s5840_s10  ;;  %v3548_v53 = vshll.u32 %v3326_v35, 16  ;;  %v2284_v27 = vld [vmem:[#allocation2 + $0x28] sm:$0xf]  ;;  %v3929_v35 = vrot.slane %v3832_v24, 5 }
 0x129   : > { %v1715_v5 = vpop.permute.xlu1 %1714  ;;  %v3541_v63 = vrot.slane %v3539_v37, 4  ;;  %v3388_v12 = vrot.slane %v3387_v58, 4 }
 0x12a   : > { %1776 = vst.msk [vmem:[#allocation3 + $0x74] sm:$0xf] %vm1746_vm6, %v1715_v5  ;;  %v1976_v32 = vpop.permute.xlu0 %1975  ;;  %v3123_v5 = vld [vmem:[#allocation2 + $0x28] sm:$0xf]  ;;  %v3550_v7 = vrot.slane %v3548_v53, 5  ;;  %v5379_v53 = vrot.slane %v3851_v29, 9 }
 0x12b   : > { %2190 = vrot.lane.b32.xlu1 %v2113_v48, %s5840_s10  ;;  %2066 = vst.msk [vmem:[#allocation3] sm:$0xf] %vm2065_vm10, %v1976_v32  ;;  %v3122_v48 = vld [vmem:[#allocation2 + $0x24] sm:$0xf]  ;;  %v3554_v32 = vrot.slane %v3552_v54, 4  ;;  %v3545_v11 = vor.u32 %v3544_v2, %v3541_v63  ;;  %vm3796_vm6 = vcmask 257248  }
 0x12c   : > { %2686 = vrot.lane.b32.xlu0 %v2359_v6, %s5841_s17  ;;  %v3390_v6 = vshll.u32 %v3306_v59, 16  ;;  %v2305_v54 = vld [vmem:[#allocation2 + $0x7c] sm:$0xf]  ;;  %v2809_v29 = vld [vmem:[#allocation2 + $0x24] sm:$0xe] }
 0x12d   : > { %v1978_v57 = vpop.permute.xlu1 %1977  ;;  %v3555_v14 = vor.u32 %v3554_v32, %v3550_v7  ;;  %v3546_v39 = vrot.slane %v3545_v11, 4  ;;  %v2552_v32 = vshrl.u32 %v2305_v54, 16 }
 0x12e   : > { %2067 = vst.msk [vmem:[#allocation3 + $0x4] sm:$0xf] %vm2065_vm10, %v1978_v57  ;;  %v1980_v17 = vpop.permute.xlu0 %1979 }
 0x12f   : > { %2688 = vrot.lane.b32.xlu1 %v2369_v9, %s5841_s17  ;;  %2068 = vst.msk [vmem:[#allocation3 + $0x8] sm:$0xf] %vm2065_vm10, %v1980_v17  ;;  %v3327_v9 = vld [vmem:[#allocation2 + $0x80] sm:$0x1]  ;;  %v3831_v17 = vld [vmem:[#allocation2 + $0x28] sm:$0xf] }
 0x130   : > { %2714 = vrot.lane.b32.xlu0 %v2527_v13, %s5841_s17  ;;  %v3392_v13 = vrot.slane %v3390_v6, 5  ;;  %v3558_v16 = vshll.u32 %v3327_v9, 16  ;;  %v3926_v18 = vrot.slane %v3831_v17, 5  ;;  %v3556_v19 = vrot.slane %v3555_v14, 4  ;;  %v2285_v9 = vld [vmem:[#allocation2 + $0x2c] sm:$0x1] }
 0x131   : > { %v1982_v20 = vpop.permute.xlu1 %1981  ;;  %v2390_v14 = vshll.u32 %v2285_v9, 16  ;;  %v2554_v17 = vrot.slane %v2552_v32, 4  ;;  %v3328_v32 = vld [vmem:[#allocation2 + $0x84] sm:$0xf] }
 0x132   : > { %2069 = vst.msk [vmem:[#allocation3 + $0xc] sm:$0xf] %vm2065_vm10, %v1982_v20  ;;  %v1984_v41 = vpop.permute.xlu0 %1983  ;;  %v2283_v20 = vld [vmem:[#allocation2 + $0x24] sm:$0xf]  ;;  %v3393_v21 = vsel %vm6080_vm1, %v3388_v12, %v3392_v13  ;;  %v3927_v45 = vsel %vm6434_vm5, %v5372_v42, %v3926_v18 }
 0x133   : > { %2716 = vrot.lane.b32.xlu1 %v2537_v50, %s5841_s17  ;;  %2070 = vst.msk [vmem:[#allocation3 + $0x10] sm:$0xf] %vm2065_vm10, %v1984_v41  ;;  %v3383_v50 = vsel %vm6080_vm1, %v3378_v10, %v3382_v44  ;;  %v2371_v30 = vshrl.u32 %v2283_v20, 16  ;;  %v2374_v33 = vshll.u32 %v2283_v20, 16  ;;  %v2384_v44 = vshrl.u32 %v2284_v27, 16 }
 0x134   : > { %3002 = vrot.lane.b32.xlu0 %v2903_v22, %s5843_s20  ;;  %v3560_v22 = vrot.slane %v3558_v16, 5  ;;  %v2115_v20 = vld [vmem:[#allocation2 + $0x7c] sm:$0xf] }
 0x135   : > { %v1986_v1 = vpop.permute.xlu1 %1985  ;;  %v2376_v59 = vrot.slane %v2374_v33, 5  ;;  %v2386_v6 = vrot.slane %v2384_v44, 4 }
 0x136   : > { %2071 = vst.msk [vmem:[#allocation3 + $0x14] sm:$0xf] %vm2065_vm10, %v1986_v1  ;;  %v1988_v38 = vpop.permute.xlu0 %1987  ;;  %v3561_v37 = vsel %vm6080_vm1, %v3556_v19, %v3560_v22  ;;  %v2392_v19 = vrot.slane %v2390_v14, 5  ;;  %v3566_v14 = vshll.u32 %v3328_v32, 16 }
 0x137   : > { %3004 = vrot.lane.b32.xlu1 %v2906_v28, %s5843_s20  ;;  %2072 = vst.msk [vmem:[#allocation3 + $0x18] sm:$0xf] %vm2065_vm10, %v1988_v38  ;;  %v3551_v28 = vsel %vm6080_vm1, %v3546_v39, %v3550_v7  ;;  %v2380_v38 = vshll.u32 %v2284_v27, 16  ;;  %v2548_v7 = vshll.u32 %v2305_v54, 16  ;;  %v2114_v39 = vld [vmem:[#allocation2 + $0x78] sm:$0xf] }
 0x138   : > { %3030 = vrot.lane.b32.xlu0 %v2952_v31, %s5843_s20  ;;  %v3928_v31 = vrot.slane %v3926_v18, 4 }
 0x139   : > { %v1990_v56 = vpop.permute.xlu1 %1989  ;;  %v2382_v58 = vrot.slane %v2380_v38, 5  ;;  %v2550_v16 = vrot.slane %v2548_v7, 5  ;;  %v2830_v38 = vld [vmem:[#allocation2 + $0x78] sm:$0xe] }
 0x13a   : > { %2073 = vst.msk [vmem:[#allocation3 + $0x1c] sm:$0xf] %vm2065_vm10, %v1990_v56  ;;  %v1992_v4 = vpop.permute.xlu0 %1991  ;;  %v2373_v56 = vrot.slane %v2371_v30, 4  ;;  %v3930_v2 = vsel %vm6434_vm5, %v3928_v31, %v3929_v35  ;;  %v2831_v35 = vld [vmem:[#allocation2 + $0x7c] sm:$0xf] }
 0x13b   : > { %3032 = vrot.lane.b32.xlu1 %v2955_v34, %s5843_s20  ;;  %2074 = vst.msk [vmem:[#allocation3 + $0x20] sm:$0xf] %vm2065_vm10, %v1992_v4  ;;  %v3977_v4 = vrot.slane %v3975_v36, 4  ;;  %v2387_v13 = vor.u32 %v2386_v6, %v2382_v58  ;;  %v2555_v22 = vor.u32 %v2554_v17, %v2550_v16 }
 0x13c   : > { %3184 = vrot.lane.b32.xlu0 %v3122_v48, %s5844_s11  ;;  %v2539_v48 = vshrl.u32 %v2304_v62, 16  ;;  %v2377_v10 = vor.u32 %v2376_v59, %v2373_v56  ;;  %v2811_v62 = vld [vmem:[#allocation2 + $0x2c] sm:$0x1]  ;;  %v2832_v59 = vld [vmem:[#allocation2 + $0x80] sm:$0x1] }
 0x13d   : > { %v1994_v46 = vpop.permute.xlu1 %1993  ;;  %v2556_v33 = vrot.slane %v2555_v22, 4  ;;  %v2912_v56 = vrot.slane %v2811_v62, 5  ;;  %v2961_v7 = vrot.slane %v2832_v59, 5  ;;  %v3568_v22 = vrot.slane %v3566_v14, 5  ;;  %v3856_v14 = vld [vmem:[#allocation2 + $0x8c] sm:$0x1] }
 0x13e   : > { %2075 = vst.msk [vmem:[#allocation3 + $0x24] sm:$0xf] %vm2065_vm10, %v1994_v46  ;;  %v1996_v57 = vpop.permute.xlu0 %1995  ;;  %v2541_v11 = vrot.slane %v2539_v48, 4  ;;  %v2378_v26 = vrot.slane %v2377_v10, 4 }
 0x13f   : > { %3186 = vrot.lane.b32.xlu1 %v3123_v5, %s5844_s11  ;;  %2076 = vst.msk [vmem:[#allocation3 + $0x28] sm:$0xf] %vm2065_vm10, %v1996_v57  ;;  %v3978_v5 = vrot.slane %v3853_v47, 5  ;;  %v2544_v57 = vrot.slane %v2542_v61, 5  ;;  %v5358_v47 = vrot.slane %v2809_v29, 9  ;;  %v5365_v61 = vrot.slane %v2830_v38, 9 }
 0x140   : > { %3212 = vrot.lane.b32.xlu0 %v3136_v52, %s5844_s11  ;;  %v3976_v52 = vsel %vm6434_vm5, %v5379_v53, %v3975_v36  ;;  %v2383_v42 = vsel %vm6080_vm1, %v2378_v26, %v2382_v58 }
 0x141   : > { %v1998_v40 = vpop.permute.xlu1 %1997  ;;  %v3979_v12 = vsel %vm6434_vm5, %v3977_v4, %v3978_v5 }
 0x142   : > { %2077 = vst.msk [vmem:[#allocation3 + $0x2c] sm:$0xf] %vm2065_vm10, %v1998_v40  ;;  %v2000_v51 = vpop.permute.xlu0 %1999 }
 0x143   : > { %3214 = vrot.lane.b32.xlu1 %v3137_v49, %s5844_s11  ;;  %2078 = vst.msk [vmem:[#allocation3 + $0x30] sm:$0xf] %vm2065_vm10, %v2000_v51  ;;  %v2545_v51 = vor.u32 %v2544_v57, %v2541_v11  ;;  %v3329_v57 = vld [vmem:[#allocation2 + $0x88] sm:$0xf] }
 0x144   : > { %3710 = vrot.lane.b32.xlu0 %v3383_v50, %s5845_s19  ;;  %v2306_v50 = vld [vmem:[#allocation2 + $0x80] sm:$0x1]  ;;  %v3576_v26 = vshrl.u32 %v3329_v57, 16 }
 0x145   : > { %v2002_v41 = vpop.permute.xlu1 %2001  ;;  %v2558_v24 = vshll.u32 %v2306_v50, 16  ;;  %v2546_v27 = vrot.slane %v2545_v51, 4 }
 0x146   : > { %2079 = vst.msk [vmem:[#allocation3 + $0x34] sm:$0xf] %vm2065_vm10, %v2002_v41  ;;  %v2004_v1 = vpop.permute.xlu0 %2003  ;;  %v2810_v41 = vld [vmem:[#allocation2 + $0x28] sm:$0xf] }
 0x147   : > { %3712 = vrot.lane.b32.xlu1 %v3393_v21, %s5845_s19  ;;  %2080 = vst.msk [vmem:[#allocation3 + $0x38] sm:$0xf] %vm2065_vm10, %v2004_v1  ;;  %v2388_v21 = vrot.slane %v2387_v13, 4  ;;  %v2560_v1 = vrot.slane %v2558_v24, 5  ;;  %v2909_v31 = vrot.slane %v2810_v41, 5  ;;  %v3563_v13 = vshrl.u32 %v3328_v32, 16 }
 0x148   : > { %3738 = vrot.lane.b32.xlu0 %v3551_v28, %s5845_s19 }
 0x149   : > { %v2006_v34 = vpop.permute.xlu1 %2005  ;;  %v2393_v30 = vsel %vm6080_vm1, %v2388_v21, %v2392_v19  ;;  %v2561_v53 = vsel %vm6080_vm1, %v2556_v33, %v2560_v1  ;;  %v2911_v54 = vrot.slane %v2909_v31, 4  ;;  %v3565_v19 = vrot.slane %v3563_v13, 4  ;;  %v3138_v33 = vld [vmem:[#allocation2 + $0x84] sm:$0xf] }
 0x14a   : > { %2081 = vst.msk [vmem:[#allocation3 + $0x3c] sm:$0xf] %vm2065_vm10, %v2006_v34  ;;  %v2008_v63 = vpop.permute.xlu0 %2007  ;;  %v2958_v34 = vrot.slane %v2831_v35, 5 }
 0x14b   : > { %3740 = vrot.lane.b32.xlu1 %v3561_v37, %s5845_s19  ;;  %2082 = vst.msk [vmem:[#allocation3 + $0x40] sm:$0xf] %vm2065_vm10, %v2008_v63  ;;  %v2551_v37 = vsel %vm6080_vm1, %v2546_v27, %v2550_v16  ;;  %v3308_v63 = vld [vmem:[#allocation2 + $0x34] sm:$0xf] }
 0x14c   : > { %4026 = vrot.lane.b32.xlu0 %v3927_v45, %s5847_s30  ;;  %v3307_v45 = vld [vmem:[#allocation2 + $0x30] sm:$0xf]  ;;  %v2960_v6 = vrot.slane %v2958_v34, 4  ;;  %v3404_v9 = vshll.u32 %v3308_v63, 16  ;;  %v2959_v11 = vsel %vm6434_vm5, %v5365_v61, %v2958_v34 }
 0x14d   : > { %v2010_v46 = vpop.permute.xlu1 %2009  ;;  %v3395_v4 = vshrl.u32 %v3307_v45, 16  ;;  %v3398_v5 = vshll.u32 %v3307_v45, 16 }
 0x14e   : > { %2083 = vst.msk [vmem:[#allocation3 + $0x44] sm:$0xf] %vm2065_vm10, %v2010_v46  ;;  %v2012_v49 = vpop.permute.xlu0 %2011  ;;  %v2913_v46 = vsel %vm6434_vm5, %v2911_v54, %v2912_v56  ;;  %v2962_v17 = vsel %vm6434_vm5, %v2960_v6, %v2961_v7  ;;  %v3833_v54 = vld [vmem:[#allocation2 + $0x30] sm:$0xe]  ;;  %v2287_v7 = vld [vmem:[#allocation2 + $0x34] sm:$0xf] }
 0x14f   : > { %4028 = vrot.lane.b32.xlu1 %v3930_v2, %s5847_s30  ;;  %2084 = vst.msk [vmem:[#allocation3 + $0x48] sm:$0xf] %vm2065_vm10, %v2012_v49  ;;  %v2910_v2 = vsel %vm6434_vm5, %v5358_v47, %v2909_v31  ;;  %v3397_v49 = vrot.slane %v3395_v4, 4  ;;  %v3569_v31 = vor.u32 %v3568_v22, %v3565_v19  ;;  %v3835_v4 = vld [vmem:[#allocation2 + $0x38] sm:$0x1]  ;;  %v5373_v6 = vrot.slane %v3833_v54, 9 }
 0x150   : > { %4054 = vrot.lane.b32.xlu0 %v3976_v52, %s5847_s30  ;;  %v3408_v52 = vshrl.u32 %v3308_v63, 16 }
 0x151   : > { %v2014_v40 = vpop.permute.xlu1 %2013 }
 0x152   : > { %2085 = vst.msk [vmem:[#allocation3 + $0x4c] sm:$0xf] %vm2065_vm10, %v2014_v40  ;;  %v2016_v18 = vpop.permute.xlu0 %2015  ;;  %v3406_v40 = vrot.slane %v3404_v9, 5  ;;  %v3410_v50 = vrot.slane %v3408_v52, 4 }
 0x153   : > { %4056 = vrot.lane.b32.xlu1 %v3979_v12, %s5847_s30  ;;  %2086 = vst.msk [vmem:[#allocation3 + $0x50] sm:$0xf] %vm2065_vm10, %v2016_v18  ;;  %v3400_v12 = vrot.slane %v3398_v5, 5  ;;  %v3309_v18 = vld [vmem:[#allocation2 + $0x38] sm:$0x1] }
 0x154   : > { %2192 = vrot.lane.b32.xlu0 %v2114_v39, %s5840_s10  ;;  %v3572_v39 = vshll.u32 %v3329_v57, 16  ;;  %v3411_v41 = vor.u32 %v3410_v50, %v3406_v40  ;;  %v3855_v5 = vld [vmem:[#allocation2 + $0x88] sm:$0xf]  ;;  %v3936_v57 = vrot.slane %v3835_v4, 5 }
 0x155   : > { %v2018_v25 = vpop.permute.xlu1 %2017  ;;  %v3401_v21 = vor.u32 %v3400_v12, %v3397_v49  ;;  %v3982_v49 = vrot.slane %v3855_v5, 5  ;;  %v2307_v12 = vld [vmem:[#allocation2 + $0x84] sm:$0xf]  ;;  %v2813_v5 = vld [vmem:[#allocation2 + $0x34] sm:$0xf] }
 0x156   : > { %2087 = vst.msk [vmem:[#allocation3 + $0x54] sm:$0xf] %vm2065_vm10, %v2018_v25  ;;  %v2020_v28 = vpop.permute.xlu0 %2019  ;;  %v3125_v25 = vld [vmem:[#allocation2 + $0x34] sm:$0xf]  ;;  %v3574_v27 = vrot.slane %v3572_v39, 5  ;;  %v3412_v62 = vrot.slane %v3411_v41, 4 }
 0x157   : > { %2194 = vrot.lane.b32.xlu1 %v2115_v20, %s5840_s10  ;;  %2088 = vst.msk [vmem:[#allocation3 + $0x58] sm:$0xf] %vm2065_vm10, %v2020_v28  ;;  %v3124_v20 = vld [vmem:[#allocation2 + $0x30] sm:$0xf]  ;;  %v3578_v28 = vrot.slane %v3576_v26, 4  ;;  %v3402_v1 = vrot.slane %v3401_v21, 4 }
 0x158   : > { %2690 = vrot.lane.b32.xlu0 %v2383_v42, %s5841_s17  ;;  %v3414_v42 = vshll.u32 %v3309_v18, 16  ;;  %v2308_v26 = vld [vmem:[#allocation2 + $0x88] sm:$0xf]  ;;  %v2566_v21 = vshll.u32 %v2307_v12, 16 }
 0x159   : > { %v2022_v36 = vpop.permute.xlu1 %2021  ;;  %v3579_v47 = vor.u32 %v3578_v28, %v3574_v27  ;;  %v3407_v45 = vsel %vm6080_vm1, %v3402_v1, %v3406_v40  ;;  %v2576_v28 = vshrl.u32 %v2308_v26, 16 }
 0x15a   : > { %2089 = vst.msk [vmem:[#allocation3 + $0x5c] sm:$0xf] %vm2065_vm10, %v2022_v36  ;;  %v2024_v44 = vpop.permute.xlu0 %2023  ;;  %v3139_v36 = vld [vmem:[#allocation2 + $0x88] sm:$0xf] }
 0x15b   : > { %2692 = vrot.lane.b32.xlu1 %v2393_v30, %s5841_s17  ;;  %2090 = vst.msk [vmem:[#allocation3 + $0x60] sm:$0xf] %vm2065_vm10, %v2024_v44  ;;  %v3330_v30 = vld [vmem:[#allocation2 + $0x8c] sm:$0x1]  ;;  %v3834_v44 = vld [vmem:[#allocation2 + $0x34] sm:$0xf] }
 0x15c   : > { %2718 = vrot.lane.b32.xlu0 %v2551_v37, %s5841_s17  ;;  %v3416_v37 = vrot.slane %v3414_v42, 5  ;;  %v3582_v38 = vshll.u32 %v3330_v30, 16  ;;  %v3933_v59 = vrot.slane %v3834_v44, 5  ;;  %v3580_v63 = vrot.slane %v3579_v47, 4  ;;  %v2288_v30 = vld [vmem:[#allocation2 + $0x38] sm:$0x1] }
 0x15d   : > { %v2026_v48 = vpop.permute.xlu1 %2025  ;;  %v2414_v47 = vshll.u32 %v2288_v30, 16  ;;  %v2578_v44 = vrot.slane %v2576_v28, 4 }
 0x15e   : > { %2091 = vst.msk [vmem:[#allocation3 + $0x64] sm:$0xf] %vm2065_vm10, %v2026_v48  ;;  %v2028_v58 = vpop.permute.xlu0 %2027  ;;  %v2286_v48 = vld [vmem:[#allocation2 + $0x30] sm:$0xf]  ;;  %v3417_v61 = vsel %vm6080_vm1, %v3412_v62, %v3416_v37  ;;  %v3934_v50 = vsel %vm6434_vm5, %v5373_v6, %v3933_v59 }
 0x15f   : > { %2720 = vrot.lane.b32.xlu1 %v2561_v53, %s5841_s17  ;;  %2092 = vst.msk [vmem:[#allocation3 + $0x68] sm:$0xf] %vm2065_vm10, %v2028_v58  ;;  %v3570_v53 = vrot.slane %v3569_v31, 4  ;;  %v2395_v9 = vshrl.u32 %v2286_v48, 16  ;;  %v2398_v52 = vshll.u32 %v2286_v48, 16 }
 0x160   : > { %3006 = vrot.lane.b32.xlu0 %v2910_v2, %s5843_s20  ;;  %v3584_v2 = vrot.slane %v3582_v38, 5  ;;  %v2117_v48 = vld [vmem:[#allocation2 + $0x88] sm:$0xf] }
 0x161   : > { %v2030_v10 = vpop.permute.xlu1 %2029  ;;  %v3575_v32 = vsel %vm6080_vm1, %v3570_v53, %v3574_v27  ;;  %v2400_v18 = vrot.slane %v2398_v52, 5  ;;  %v2572_v27 = vshll.u32 %v2308_v26, 16  ;;  %v2116_v53 = vld [vmem:[#allocation2 + $0x84] sm:$0xf]  ;;  %v2834_v52 = vld [vmem:[#allocation2 + $0x88] sm:$0xf] }
 0x162   : > { %2093 = vst.msk [vmem:[#allocation3 + $0x6c] sm:$0xf] %vm2065_vm10, %v2030_v10  ;;  %v2032_v16 = vpop.permute.xlu0 %2031  ;;  %v3585_v13 = vsel %vm6080_vm1, %v3580_v63, %v3584_v2  ;;  %v2416_v63 = vrot.slane %v2414_v47, 5 }
 0x163   : > { %3008 = vrot.lane.b32.xlu1 %v2913_v46, %s5843_s20  ;;  %2094 = vst.msk [vmem:[#allocation3 + $0x70] sm:$0xf] %vm2065_vm10, %v2032_v16  ;;  %v3854_v46 = vld [vmem:[#allocation2 + $0x84] sm:$0xe]  ;;  %v2404_v16 = vshll.u32 %v2287_v7, 16  ;;  %v2574_v38 = vrot.slane %v2572_v27, 5 }
 0x164   : > { %3034 = vrot.lane.b32.xlu0 %v2959_v11, %s5843_s20  ;;  %v3935_v11 = vrot.slane %v3933_v59, 4  ;;  %v5380_v39 = vrot.slane %v3854_v46, 9  ;;  %v2812_v46 = vld [vmem:[#allocation2 + $0x30] sm:$0xe]  ;;  %v481_v27 = vld [vmem:[%s5992_s9 + $0xe8] sm:$0xff] }
 0x165   : > { %v2034_v51 = vpop.permute.xlu1 %2033  ;;  %v2406_v41 = vrot.slane %v2404_v16, 5  ;;  %v2579_v2 = vor.u32 %v2578_v44, %v2574_v38  ;;  %v2833_v16 = vld [vmem:[#allocation2 + $0x84] sm:$0xe] }
 0x166   : > { %2095 = vst.msk [vmem:[#allocation3 + $0x74] sm:$0xf] %vm2065_vm10, %v2034_v51  ;;  %v2157_v24 = vpop.permute.xlu0 %2156  ;;  %v2397_v51 = vrot.slane %v2395_v9, 4  ;;  %v3937_v22 = vsel %vm6434_vm5, %v3935_v11, %v3936_v57  ;;  %v2916_v9 = vrot.slane %v2813_v5, 5  ;;  %vm4275_vm10 = vcmask 293888  }
 0x167   : > { %3036 = vrot.lane.b32.xlu1 %v2962_v17, %s5843_s20  ;;  %2247 = vst.msk [vmem:[#allocation3] sm:$0xf] %vm2246_vm11, %v2157_v24  ;;  %v2408_v17 = vshrl.u32 %v2287_v7, 16  ;;  %v3984_v24 = vrot.slane %v3982_v49, 4  ;;  %v2580_v11 = vrot.slane %v2579_v2, 4 }
 0x168   : > { %3188 = vrot.lane.b32.xlu0 %v3124_v20, %s5844_s11  ;;  %v2563_v20 = vshrl.u32 %v2307_v12, 16  ;;  %v2401_v1 = vor.u32 %v2400_v18, %v2397_v51  ;;  %v2835_v18 = vld [vmem:[#allocation2 + $0x8c] sm:$0x1] }
 0x169   : > { %v2159_v29 = vpop.permute.xlu1 %2158  ;;  %v2410_v42 = vrot.slane %v2408_v17, 4  ;;  %v2965_v17 = vrot.slane %v2834_v52, 5  ;;  %v2968_v30 = vrot.slane %v2835_v18, 5  ;;  %v3126_v52 = vld [vmem:[#allocation2 + $0x3c] sm:$0xf] }
 0x16a   : > { %2248 = vst.msk [vmem:[#allocation3 + $0x4] sm:$0xf] %vm2246_vm11, %v2159_v29  ;;  %v2161_v35 = vpop.permute.xlu0 %2160  ;;  %v2565_v31 = vrot.slane %v2563_v20, 4  ;;  %v2402_v54 = vrot.slane %v2401_v1, 4  ;;  %v3311_v20 = vld [vmem:[#allocation2 + $0x40] sm:$0xf] }
 0x16b   : > { %3190 = vrot.lane.b32.xlu1 %v3125_v25, %s5844_s11  ;;  %2249 = vst.msk [vmem:[#allocation3 + $0x8] sm:$0xf] %vm2246_vm11, %v2161_v35  ;;  %v3985_v25 = vrot.slane %v3856_v14, 5  ;;  %v2568_v35 = vrot.slane %v2566_v21, 5  ;;  %v2411_v37 = vor.u32 %v2410_v42, %v2406_v41  ;;  %v5359_v14 = vrot.slane %v2812_v46, 9 }
 0x16c   : > { %3216 = vrot.lane.b32.xlu0 %v3138_v33, %s5844_s11  ;;  %v3983_v33 = vsel %vm6434_vm5, %v5380_v39, %v3982_v49  ;;  %v2407_v6 = vsel %vm6080_vm1, %v2402_v54, %v2406_v41  ;;  %v2814_v49 = vld [vmem:[#allocation2 + $0x38] sm:$0x1]  ;;  %v2918_v39 = vrot.slane %v2916_v9, 4  ;;  %v2967_v42 = vrot.slane %v2965_v17, 4  ;;  %v3331_v1 = vld [vmem:[#allocation2 + $0x90] sm:$0xf] }
 0x16d   : > { %v2163_v34 = vpop.permute.xlu1 %2162  ;;  %v3986_v62 = vsel %vm6434_vm5, %v3984_v24, %v3985_v25  ;;  %v2919_v26 = vrot.slane %v2814_v49, 5  ;;  %v480_v25 = vld [vmem:[%s5992_s9 + $0xe0] sm:$0xff]  ;;  %v2917_v41 = vsel %vm6434_vm5, %v5359_v14, %v2916_v9  ;;  %v3590_v54 = vshll.u32 %v3331_v1, 16  ;;  %s412_s9 = sadd.s32 15, %s5944_s13 }
 0x16e   : > { %2250 = vst.msk [vmem:[#allocation3 + $0xc] sm:$0xf] %vm2246_vm11, %v2163_v34  ;;  %v2165_v56 = vpop.permute.xlu0 %2164  ;;  %p6892_p0 = scmp.lt.s32.totalorder %s412_s9, 15 }
 0x16f   : > { %3218 = vrot.lane.b32.xlu1 %v3139_v36, %s5844_s11  ;;  %2251 = vst.msk [vmem:[#allocation3 + $0x10] sm:$0xf] %vm2246_vm11, %v2165_v56  ;;  %v2569_v56 = vor.u32 %v2568_v35, %v2565_v31  ;;  %v496_v31 = vpack.c.bf16 %v481_v27, %v480_v25  ;;  %v578_v35 = vld [vmem:[#allocation2 + $0xb4] sm:$0x1] }
 0x170   : > { %3714 = vrot.lane.b32.xlu0 %v3407_v45, %s5845_s19  ;;  %v2309_v45 = vld [vmem:[#allocation2 + $0x8c] sm:$0x1]  ;;  %s7839_s9 = smov (!%p6892_p0, %s412_s9), 15 }
 0x171   : > { %v2167_v58 = vpop.permute.xlu1 %2166  ;;  %v2582_v4 = vshll.u32 %v2309_v45, 16  ;;  %v2570_v7 = vrot.slane %v2569_v56, 4  ;;  %v529_v45 = vsel %vm514_vm3, %v496_v31, 0  ;;  %s7841_s9 = smov (!%p6892_p0, %s7839_s9), 15 }
 0x172   : > { %2252 = vst.msk [vmem:[#allocation3 + $0x14] sm:$0xf] %vm2246_vm11, %v2167_v58  ;;  %v2169_v10 = vpop.permute.xlu0 %2168  ;;  %v5339_v56 = vcombine.low %v529_v45, %v529_v45  ;;  %v5340_v15 = vcombine.high %v529_v45, %v529_v45  ;;  %s5304_s13 = sshll.u32 %s7841_s9, 1  ;;  %s5456_s9 = sshll.u32 (%p5930_p5), %s5792_s24, 6 }
 0x173   : > { %3716 = vrot.lane.b32.xlu1 %v3417_v61, %s5845_s19  ;;  %2253 = vst.msk [vmem:[#allocation3 + $0x18] sm:$0xf] %vm2246_vm11, %v2169_v10  ;;  %v2412_v61 = vrot.slane %v2411_v37, 4  ;;  %v2584_v57 = vrot.slane %v2582_v4, 5  ;;  %s421_s14 = sadd.s32 %s5304_s13, %s5957_s15 }
 0x174   : > { %3742 = vrot.lane.b32.xlu0 %v3575_v32, %s5845_s19  ;;  %v1029_v46 = vshrl.u32 %v5340_v15, 16  ;;  %v1032_v9 = vshll.u32 %v5340_v15, 16  ;;  %v3838_v15 = vld [vmem:[#allocation2 + $0x44] sm:$0x1]  ;;  %s5306_s18 = sshll.u32 %s421_s14, 3 }
 0x175   : > { %v2171_v40 = vpop.permute.xlu1 %2170  ;;  %v2417_v10 = vsel %vm6080_vm1, %v2412_v61, %v2416_v63  ;;  %v2585_v51 = vsel %vm6080_vm1, %v2580_v11, %v2584_v57  ;;  %v3312_v63 = vld [vmem:[#allocation2 + $0x44] sm:$0x1]  ;;  %v3592_v57 = vrot.slane %v3590_v54, 5  ;;  %s423_s15 = scalar_lea.vmem %s7800_s2, %s5306_s18  ;;  %s5472_s18 = smul.u32 (%p5930_p5), 60, %s5788_s23 }
 0x176   : > { %2254 = vst.msk [vmem:[#allocation3 + $0x1c] sm:$0xf] %vm2246_vm11, %v2171_v40  ;;  %v2173_v19 = vpop.permute.xlu0 %2172  ;;  %v3310_v40 = vld [vmem:[#allocation2 + $0x3c] sm:$0xf]  ;;  %v1031_v14 = vrot.slane %v1029_v46, 7  ;;  %v3943_v46 = vrot.slane %v3838_v15, 5 }
 0x177   : > { %3744 = vrot.lane.b32.xlu1 %v3585_v13, %s5845_s19  ;;  %2255 = vst.msk [vmem:[#allocation3 + $0x20] sm:$0xf] %vm2246_vm11, %v2173_v19  ;;  %v2575_v13 = vsel %vm6080_vm1, %v2570_v7, %v2574_v38  ;;  %v5366_v19 = vrot.slane %v2833_v16, 9  ;;  %v3422_v24 = vshll.u32 %v3310_v40, 16  ;;  %s448_s13 = scalar_select %p444_p1, 1, 0 }
 0x178   : > { %4030 = vrot.lane.b32.xlu0 %v3934_v50, %s5847_s30  ;;  %s4774_s7 = sadd.s32 (%p5930_p5), %s5472_s18, %s5456_s9 }
 0x179   : > { %v2175_v29 = vpop.permute.xlu1 %2174  ;;  %v2966_v47 = vsel %vm6434_vm5, %v5366_v19, %v2965_v17  ;;  %v3424_v44 = vrot.slane %v3422_v24, 5  ;;  %v3127_v17 = vld [vmem:[#allocation2 + $0x40] sm:$0xf]  ;;  %v1034_v19 = vor.u32 %v1032_v9, %v1031_v14 }
 0x17a   : > { %2256 = vst.msk [vmem:[#allocation3 + $0x24] sm:$0xf] %vm2246_vm11, %v2175_v29  ;;  %v2177_v36 = vpop.permute.xlu0 %2176  ;;  %v2920_v29 = vsel %vm6434_vm5, %v2918_v39, %v2919_v26 }
 0x17b   : > { %4032 = vrot.lane.b32.xlu1 %v3937_v22, %s5847_s30  ;;  %2257 = vst.msk [vmem:[#allocation3 + $0x28] sm:$0xf] %vm2246_vm11, %v2177_v36  ;;  %v3419_v22 = vshrl.u32 %v3310_v40, 16  ;;  %v3432_v36 = vshrl.u32 %v3311_v20, 16 }
 0x17c   : > { %4058 = vrot.lane.b32.xlu0 %v3983_v33, %s5847_s30  ;;  %v3428_v33 = vshll.u32 %v3311_v20, 16  ;;  %v3333_v20 = vld [vmem:[#allocation2 + $0x98] sm:$0x1] }
 0x17d   : > { %v2179_v34 = vpop.permute.xlu1 %2178  ;;  %v3421_v38 = vrot.slane %v3419_v22, 4  ;;  %v3434_v2 = vrot.slane %v3432_v36, 4  ;;  %v3140_v22 = vld [vmem:[#allocation2 + $0x90] sm:$0xf]  ;;  %v3606_v31 = vshll.u32 %v3333_v20, 16 }
 0x17e   : > { %2258 = vst.msk [vmem:[#allocation3 + $0x2c] sm:$0xf] %vm2246_vm11, %v2179_v34  ;;  %v2181_v59 = vpop.permute.xlu0 %2180  ;;  %v3332_v34 = vld [vmem:[#allocation2 + $0x94] sm:$0xf]  ;;  %v6827_v61 = vrot.slane %v3428_v33, 5 }
 0x17f   : > { %4060 = vrot.lane.b32.xlu1 %v3986_v62, %s5847_s30  ;;  %2259 = vst.msk [vmem:[#allocation3 + $0x30] sm:$0xf] %vm2246_vm11, %v2181_v59  ;;  %v579_v62 = vsel %vm5949_vm2, 0, %v578_v35  ;;  %v3596_v4 = vshll.u32 %v3332_v34, 16  ;;  %v3600_v5 = vshrl.u32 %v3332_v34, 16  ;;  %v1036_v35 = vrot.slane %v1031_v14, 4 }
 0x180   : > { %2196 = vrot.lane.b32.xlu0 %v2116_v53, %s5840_s10  ;;  %580 = vst [vmem:[#allocation2 + $0xb4] sm:$0x1] %v579_v62  ;;  %v3587_v53 = vshrl.u32 %v3331_v1, 16  ;;  %v3435_v40 = vor.u32 %v3434_v2, %v6827_v61  ;;  %v2289_v34 = vld [vmem:[#allocation2 + $0x3c] sm:$0xf] }
 0x181   : > { %v2183_v58 = vpop.permute.xlu1 %2182  ;;  %v3602_v39 = vrot.slane %v3600_v5, 4  ;;  %v2290_v2 = vld [vmem:[#allocation2 + $0x40] sm:$0xf] }
 0x182   : > { %2260 = vst.msk [vmem:[#allocation3 + $0x34] sm:$0xf] %vm2246_vm11, %v2183_v58  ;;  %v2185_v32 = vpop.permute.xlu0 %2184  ;;  %v1021_v58 = vshrl.u32 %v5339_v56, 16  ;;  %v3589_v11 = vrot.slane %v3587_v53, 4  ;;  %v3436_v33 = vrot.slane %v3435_v40, 4 }
 0x183   : > { %2198 = vrot.lane.b32.xlu1 %v2117_v48, %s5840_s10  ;;  %2261 = vst.msk [vmem:[#allocation3 + $0x38] sm:$0xf] %vm2246_vm11, %v2185_v32  ;;  %v2969_v48 = vsel %vm6434_vm5, %v2967_v42, %v2968_v30  ;;  %v1024_v32 = vshll.u32 %v5339_v56, 16  ;;  %v3141_v30 = vld [vmem:[#allocation2 + $0x94] sm:$0xf]  ;;  %v3608_v56 = vrot.slane %v3606_v31, 5 }
 0x184   : > { %2694 = vrot.lane.b32.xlu0 %v2407_v6, %s5841_s17  ;;  %v631_v6 = vld [vmem:[#allocation2 + $0xbc] sm:$0x1]  ;;  %v1023_v49 = vrot.slane %v1021_v58, 7  ;;  %v3593_v25 = vor.u32 %v3592_v57, %v3589_v11  ;;  %v3857_v58 = vld [vmem:[#allocation2 + $0x90] sm:$0xe]  ;;  %v2428_v57 = vshll.u32 %v2290_v2, 16 }
 0x185   : > { %v2187_v12 = vpop.permute.xlu1 %2186  ;;  %v632_v16 = vsel %vm5969_vm4, 0, %v631_v6  ;;  %v2419_v6 = vshrl.u32 %v2289_v34, 16  ;;  %v3859_v11 = vld [vmem:[#allocation2 + $0x98] sm:$0x1] }
 0x186   : > { %2262 = vst.msk [vmem:[#allocation3 + $0x3c] sm:$0xf] %vm2246_vm11, %v2187_v12  ;;  %v2683_v50 = vpop.permute.xlu0 %2682  ;;  %v1026_v26 = vor.u32 %v1024_v32, %v1023_v49  ;;  %633 = vst [vmem:[#allocation2 + $0xbc] sm:$0x1] %v632_v16  ;;  %v5381_v16 = vrot.slane %v3857_v58, 9 }
 0x187   : > { %2696 = vrot.lane.b32.xlu1 %v2417_v10, %s5841_s17  ;;  %2773 = vst.msk [vmem:[#allocation3] sm:$0xf] %vm2772_vm14, %v2683_v50  ;;  %v3425_v10 = vor.u32 %v3424_v44, %v3421_v38  ;;  %v6837_v50 = vrot.slane %v3596_v4, 5  ;;  %v2421_v40 = vrot.slane %v2419_v6, 4  ;;  %v2837_v58 = vld [vmem:[#allocation2 + $0x94] sm:$0xf] }
 0x188   : > { %2722 = vrot.lane.b32.xlu0 %v2575_v13, %s5841_s17  ;;  %v3438_v13 = vshll.u32 %v3312_v63, 16 }
 0x189   : > { %v2685_v21 = vpop.permute.xlu1 %2684  ;;  %v3426_v24 = vrot.slane %v3425_v10, 4  ;;  %v3603_v1 = vor.u32 %v3602_v39, %v6837_v50 }
 0x18a   : > { %2774 = vst.msk [vmem:[#allocation3 + $0x4] sm:$0xf] %vm2772_vm14, %v2685_v21  ;;  %v2999_v28 = vpop.permute.xlu0 %2998  ;;  %v1027_v21 = vrot.slane %v1023_v49, 4  ;;  %v3440_v27 = vrot.slane %v3438_v13, 5  ;;  %v2432_v49 = vshrl.u32 %v2290_v2, 16 }
 0x18b   : > { %2724 = vrot.lane.b32.xlu1 %v2585_v51, %s5841_s17  ;;  %3089 = vst.msk [vmem:[#allocation3] sm:$0xf] %vm3088_vm15, %v2999_v28  ;;  %v1181_v51 = vld [vmem:[#allocation2 + $0xb4] sm:$0xf]  ;;  %v3837_v28 = vld [vmem:[#allocation2 + $0x40] sm:$0xf]  ;;  %v3431_v62 = vsel %vm6080_vm1, %v3426_v24, %v6827_v61 }
 0x18c   : > { %3010 = vrot.lane.b32.xlu0 %v2917_v41, %s5843_s20  ;;  %v1182_v41 = vsel %vm6023_vm13, %v1026_v26, %v1181_v51  ;;  %v3940_v38 = vrot.slane %v3837_v28, 5  ;;  %v3441_v53 = vsel %vm6080_vm1, %v3436_v33, %v3440_v27  ;;  %v3604_v54 = vrot.slane %v3603_v1, 4 }
 0x18d   : > { %v3001_v37 = vpop.permute.xlu1 %3000  ;;  %1183 = vst [vmem:[#allocation2 + $0xb4] sm:$0xf] %v1182_v41  ;;  %v1185_v45 = vld [vmem:[#allocation2 + $0xbc] sm:$0x1] }
 0x18e   : > { %3090 = vst.msk [vmem:[#allocation3 + $0x4] sm:$0xf] %vm3088_vm15, %v3001_v37  ;;  %v3181_v59 = vpop.permute.xlu0 %3180  ;;  %v3594_v37 = vrot.slane %v3593_v25, 4  ;;  %v3942_v5 = vrot.slane %v3940_v38, 4  ;;  %v3609_v10 = vsel %vm6080_vm1, %v3604_v54, %v3608_v56 }
 0x18f   : > { %3012 = vrot.lane.b32.xlu1 %v2920_v29, %s5843_s20  ;;  %3271 = vst.msk [vmem:[#allocation3] sm:$0xf] %vm3270_vm0, %v3181_v59  ;;  %v1035_v29 = vsel %vm6017_vm12, %v1027_v21, %v1034_v19  ;;  %v3858_v59 = vld [vmem:[#allocation2 + $0x94] sm:$0xf]  ;;  %v3992_v21 = vrot.slane %v3859_v11, 5  ;;  %v2430_v19 = vrot.slane %v2428_v57, 5 }
 0x190   : > { %3038 = vrot.lane.b32.xlu0 %v2966_v47, %s5843_s20  ;;  %1184 = vst.msk [vmem:[#allocation2 + $0xb8] sm:$0xf] %vm664_vm8, %v1035_v29  ;;  %v3836_v47 = vld [vmem:[#allocation2 + $0x3c] sm:$0xe]  ;;  %v3599_v4 = vsel %vm6080_vm1, %v3594_v37, %v6837_v50  ;;  %v3989_v9 = vrot.slane %v3858_v59, 5 }
 0x191   : > { %v3183_v7 = vpop.permute.xlu1 %3182  ;;  %v5374_v63 = vrot.slane %v3836_v47, 9  ;;  %v2312_v47 = vld [vmem:[#allocation2 + $0x98] sm:$0x1]  ;;  %v2836_v57 = vld [vmem:[#allocation2 + $0x90] sm:$0xe] }
 0x192   : > { %3272 = vst.msk [vmem:[#allocation3 + $0x4] sm:$0xf] %vm3270_vm0, %v3183_v7  ;;  %v3707_v12 = vpop.permute.xlu0 %3706  ;;  %v2422_v7 = vshll.u32 %v2289_v34, 16  ;;  %v3991_v20 = vrot.slane %v3989_v9, 4  ;;  %v3990_v27 = vsel %vm6434_vm5, %v5381_v16, %v3989_v9  ;;  %v2606_v59 = vshll.u32 %v2312_v47, 16 }
 0x193   : > { %3040 = vrot.lane.b32.xlu1 %v2969_v48, %s5843_s20  ;;  %3797 = vst.msk [vmem:[#allocation3] sm:$0xf] %vm3796_vm6, %v3707_v12  ;;  %v1186_v48 = vsel %vm5949_vm2, %v1036_v35, %v1185_v45  ;;  %v3941_v14 = vsel %vm6434_vm5, %v5374_v63, %v3940_v38  ;;  %v2118_v38 = vld [vmem:[#allocation2 + $0x90] sm:$0xf]  ;;  %v3314_v16 = vld [vmem:[#allocation2 + $0x4c] sm:$0xf] }
 0x194   : > { %3192 = vrot.lane.b32.xlu0 %v3126_v52, %s5844_s11  ;;  %1187 = vst [vmem:[#allocation2 + $0xbc] sm:$0x1] %v1186_v48  ;;  %v2310_v52 = vld [vmem:[#allocation2 + $0x90] sm:$0xf]  ;;  %v2424_v50 = vrot.slane %v2422_v7, 5  ;;  %v3993_v1 = vsel %vm6434_vm5, %v3991_v20, %v3992_v21 }
 0x195   : > { %v3709_v18 = vpop.permute.xlu1 %3708  ;;  %v2587_v39 = vshrl.u32 %v2310_v52, 16  ;;  %v2590_v26 = vshll.u32 %v2310_v52, 16 }
 0x196   : > { %3798 = vst.msk [vmem:[#allocation3 + $0x4] sm:$0xf] %vm3796_vm6, %v3709_v18  ;;  %v4023_v42 = vpop.permute.xlu0 %4022  ;;  %v3944_v18 = vsel %vm6434_vm5, %v3942_v5, %v3943_v46  ;;  %v2425_v28 = vor.u32 %v2424_v50, %v2421_v40 }
 0x197   : > { %3194 = vrot.lane.b32.xlu1 %v3127_v17, %s5844_s11  ;;  %4113 = vst.msk [vmem:[#allocation3] sm:$0xf] %vm4112_vm7, %v4023_v42  ;;  %v2311_v17 = vld [vmem:[#allocation2 + $0x94] sm:$0xf]  ;;  %v2291_v42 = vld [vmem:[#allocation2 + $0x44] sm:$0x1] }
 0x198   : > { %3220 = vrot.lane.b32.xlu0 %v3140_v22, %s5844_s11  ;;  %v2434_v22 = vrot.slane %v2432_v49, 4  ;;  %v2596_v24 = vshll.u32 %v2311_v17, 16  ;;  %v2600_v25 = vshrl.u32 %v2311_v17, 16  ;;  %v2589_v29 = vrot.slane %v2587_v39, 4 }
 0x199   : > { %v4025_v36 = vpop.permute.xlu1 %4024  ;;  %v2438_v35 = vshll.u32 %v2291_v42, 16  ;;  %v2972_v49 = vrot.slane %v2837_v58, 5  ;;  %v446_v42 = vld [vmem:[%s423_s15 + $0x8] sm:$0xff] }
 0x19a   : > { %4114 = vst.msk [vmem:[#allocation3 + $0x4] sm:$0xf] %vm4112_vm7, %v4025_v36  ;;  %v2189_v44 = vpop.permute.xlu0 %2188  ;;  %v2435_v31 = vor.u32 %v2434_v22, %v2430_v19  ;;  %v2598_v36 = vrot.slane %v2596_v24, 5  ;;  %v3452_v22 = vshll.u32 %v3314_v16, 16 }
 0x19b   : > { %3222 = vrot.lane.b32.xlu1 %v3141_v30, %s5844_s11  ;;  %2263 = vst.msk [vmem:[#allocation3 + $0x40] sm:$0xf] %vm2246_vm11, %v2189_v44  ;;  %v2592_v30 = vrot.slane %v2590_v26, 5  ;;  %v2426_v44 = vrot.slane %v2425_v28, 4  ;;  %v2440_v56 = vrot.slane %v2438_v35, 5  ;;  %v2974_v20 = vrot.slane %v2972_v49, 4 }
 0x19c   : > { %3718 = vrot.lane.b32.xlu0 %v3431_v62, %s5845_s19  ;;  %v2602_v62 = vrot.slane %v2600_v25, 4  ;;  %v2436_v54 = vrot.slane %v2435_v31, 4  ;;  %v3334_v25 = vld [vmem:[#allocation2 + $0x9c] sm:$0xf]  ;;  %v3456_v28 = vshrl.u32 %v3314_v16, 16 }
 0x19d   : > { %v2191_v61 = vpop.permute.xlu1 %2190  ;;  %v2593_v34 = vor.u32 %v2592_v30, %v2589_v29  ;;  %v2431_v63 = vsel %vm6080_vm1, %v2426_v44, %v2430_v19  ;;  %v581_v30 = vld [vmem:[#allocation2 + $0xc0] sm:$0x1]  ;;  %v3611_v47 = vshrl.u32 %v3334_v25, 16 }
 0x19e   : > { %2264 = vst.msk [vmem:[#allocation3 + $0x44] sm:$0xf] %vm2246_vm11, %v2191_v61  ;;  %v2687_v32 = vpop.permute.xlu0 %2686  ;;  %v2603_v15 = vor.u32 %v2602_v62, %v2598_v36  ;;  %v2816_v61 = vld [vmem:[#allocation2 + $0x40] sm:$0xf]  ;;  %v2441_v6 = vsel %vm6080_vm1, %v2436_v54, %v2440_v56  ;;  %v582_v62 = vsel %vm5949_vm2, 0, %v581_v30  ;;  %v3458_v56 = vrot.slane %v3456_v28, 4 }
 0x19f   : > { %3720 = vrot.lane.b32.xlu1 %v3441_v53, %s5845_s19  ;;  %2775 = vst.msk [vmem:[#allocation3 + $0x8] sm:$0xf] %vm2772_vm14, %v2687_v32  ;;  %v2119_v53 = vld [vmem:[#allocation2 + $0x94] sm:$0xf]  ;;  %v2594_v2 = vrot.slane %v2593_v34, 4  ;;  %v2608_v32 = vrot.slane %v2606_v59, 5 }
 0x1a0   : > { %3746 = vrot.lane.b32.xlu0 %v3599_v4, %s5845_s19  ;;  %v2815_v4 = vld [vmem:[#allocation2 + $0x3c] sm:$0xe]  ;;  %v2604_v7 = vrot.slane %v2603_v15, 4  ;;  %v2923_v46 = vrot.slane %v2816_v61, 5  ;;  %v3335_v35 = vld [vmem:[#allocation2 + $0xa0] sm:$0xf] }
 0x1a1   : > { %v2689_v12 = vpop.permute.xlu1 %2688  ;;  %v5699_v13 = vld [vmem:[#allocation3] sm:$0xff]   ;;  %v5360_v52 = vrot.slane %v2815_v4, 9  ;;  %v2599_v11 = vsel %vm6080_vm1, %v2594_v2, %v2598_v36  ;;  %v449_v36 = vstv %s448_s13  ;;  %583 = vst [vmem:[#allocation2 + $0xc0] sm:$0x1] %v582_v62  ;;  %v3620_v15 = vshll.u32 %v3335_v35, 16  ;;  %s5457_s13 = sshll.u32 (%p5930_p5), %s4774_s7, 3 }
 0x1a2   : > { %2776 = vst.msk [vmem:[#allocation3 + $0xc] sm:$0xf] %vm2772_vm14, %v2689_v12  ;;  %5498 = vmatmul.mubr.msk.bf16.vlgmr.msra.gmra.mxu0 %vm4275_vm10, %v5699_v13  ;;  %v2715_v51 = vpop.permute.xlu0 %2714  ;;  %v3313_v12 = vld [vmem:[#allocation2 + $0x48] sm:$0xf]  ;;  %v2609_v17 = vsel %vm6080_vm1, %v2604_v7, %v2608_v32  ;;  %v2925_v40 = vrot.slane %v2923_v46, 4  ;;  %vm450_vm3 = vcmp.eq.s32.totalorder %v449_v36, 1 }
 0x1a3   : > { %3748 = vrot.lane.b32.xlu1 %v3609_v10, %s5845_s19  ;;  %2789 = vst.msk [vmem:[#allocation3 + $0x40] sm:$0xf] %vm2772_vm14, %v2715_v51  ;;  %5501 = vmatprep.mubr.msk.bf16.mxu0 %vm5846_vm9, %v5842_v3  ;;  %v2817_v10 = vld [vmem:[#allocation2 + $0x44] sm:$0x1]  ;;  %v2924_v26 = vsel %vm6434_vm5, %v5360_v52, %v2923_v46  ;;  %v5367_v51 = vrot.slane %v2836_v57, 9  ;;  %v3446_v19 = vshll.u32 %v3313_v12, 16 }
 0x1a4   : > { %4034 = vrot.lane.b32.xlu0 %v3941_v14, %s5847_s30  ;;  %v2838_v14 = vld [vmem:[#allocation2 + $0x98] sm:$0x1]  ;;  %v2926_v50 = vrot.slane %v2817_v10, 5  ;;  %v3624_v59 = vshrl.u32 %v3335_v35, 16  ;;  %v634_v61 = vld [vmem:[#allocation2 + $0xc8] sm:$0x1] }
 0x1a5   : > { %v2717_v41 = vpop.permute.xlu1 %2716  ;;  %v2975_v21 = vrot.slane %v2838_v14, 5  ;;  %v635_v4 = vsel %vm5969_vm4, 0, %v634_v61  ;;  %v6951_v57 = vrot.slane %v3620_v15, 5  ;;  %v3336_v14 = vld [vmem:[#allocation2 + $0xa4] sm:$0x1]  ;;  %v2446_v61 = vshll.u32 %v2292_v55, 16 }
 0x1a6   : > { %2790 = vst.msk [vmem:[#allocation3 + $0x44] sm:$0xf] %vm2772_vm14, %v2717_v41  ;;  %v3003_v33 = vpop.permute.xlu0 %3002  ;;  %v445_v41 = vld [vmem:[%s423_s15] sm:$0xff]  ;;  %636 = vst [vmem:[#allocation2 + $0xc8] sm:$0x1] %v635_v4  ;;  %vm4575_vm4 = vcmask 64512  }
 0x1a7   : > { %4036 = vrot.lane.b32.xlu1 %v3944_v18, %s5847_s30  ;;  %3091 = vst.msk [vmem:[#allocation3 + $0x8] sm:$0xf] %vm3088_vm15, %v3003_v33  ;;  %v3443_v18 = vshrl.u32 %v3313_v12, 16  ;;  %v447_v29 = vpack.c.bf16 %v446_v42, %v445_v41  ;;  %v2976_v34 = vsel %vm6434_vm5, %v2974_v20, %v2975_v21  ;;  %v3839_v35 = vld [vmem:[#allocation2 + $0x48] sm:$0xe] }
 0x1a8   : > { %4062 = vrot.lane.b32.xlu0 %v3990_v27, %s5847_s30  ;;  %v2927_v27 = vsel %vm6434_vm5, %v2925_v40, %v2926_v50  ;;  %v700_v16 = vld [vmem:[#allocation2 + $0xc0] sm:$0xf]  ;;  %v3142_v50 = vld [vmem:[#allocation2 + $0x9c] sm:$0xf]  ;;  %v5375_v0 = vrot.slane %v3839_v35, 9 }
 0x1a9   : > { %v3005_v37 = vpop.permute.xlu1 %3004  ;;  %v3445_v31 = vrot.slane %v3443_v18, 4  ;;  %v451_v54 = vsel %vm450_vm3, %v447_v29, 0 }
 0x1aa   : > { %3092 = vst.msk [vmem:[#allocation3 + $0xc] sm:$0xf] %vm3088_vm15, %v3005_v37  ;;  %v3031_v45 = vpop.permute.xlu0 %3030  ;;  %v3448_v37 = vrot.slane %v3446_v19, 5  ;;  %v5310_v2 = vcombine.high %v451_v54, %v451_v54  ;;  %v3840_v19 = vld [vmem:[#allocation2 + $0x4c] sm:$0xf] }
 0x1ab   : > { %4064 = vrot.lane.b32.xlu1 %v3993_v1, %s5847_s30  ;;  %3105 = vst.msk [vmem:[#allocation3 + $0x40] sm:$0xf] %vm3088_vm15, %v3031_v45  ;;  %v2973_v1 = vsel %vm6434_vm5, %v5367_v51, %v2972_v49  ;;  %v6941_v45 = vrot.slane %v3452_v22, 5  ;;  %v3626_v49 = vrot.slane %v3624_v59, 4  ;;  %v3947_v36 = vrot.slane %v3840_v19, 5 }
 0x1ac   : > { %2200 = vrot.lane.b32.xlu0 %v2118_v38, %s5840_s10  ;;  %v3614_v38 = vshll.u32 %v3334_v25, 16  ;;  %v3449_v58 = vor.u32 %v3448_v37, %v3445_v31  ;;  %v688_v10 = vshrl.u32 %v5310_v2, 16  ;;  %v691_v40 = vshll.u32 %v5310_v2, 16  ;;  %v3143_v25 = vld [vmem:[#allocation2 + $0xa0] sm:$0xf] }
 0x1ad   : > { %v3033_v48 = vpop.permute.xlu1 %3032  ;;  %v3459_v8 = vor.u32 %v3458_v56, %v6941_v45  ;;  %v3627_v42 = vor.u32 %v3626_v49, %v6951_v57  ;;  %v3949_v15 = vrot.slane %v3947_v36, 4  ;;  %v3860_v59 = vld [vmem:[#allocation2 + $0x9c] sm:$0xe] }
 0x1ae   : > { %3106 = vst.msk [vmem:[#allocation3 + $0x44] sm:$0xf] %vm3088_vm15, %v3033_v48  ;;  %v3185_v5 = vpop.permute.xlu0 %3184  ;;  %v5309_v48 = vcombine.low %v451_v54, %v451_v54  ;;  %v3616_v7 = vrot.slane %v3614_v38, 5  ;;  %v2293_v54 = vld [vmem:[#allocation2 + $0x4c] sm:$0xf] }
 0x1af   : > { %2202 = vrot.lane.b32.xlu1 %v2119_v53, %s5840_s10  ;;  %3273 = vst.msk [vmem:[#allocation3 + $0x8] sm:$0xf] %vm3270_vm0, %v3185_v5  ;;  %v3315_v53 = vld [vmem:[#allocation2 + $0x50] sm:$0x1]  ;;  %v3128_v5 = vld [vmem:[#allocation2 + $0x48] sm:$0xf] }
 0x1b0   : > { %2698 = vrot.lane.b32.xlu0 %v2431_v63, %s5841_s17  ;;  %v680_v32 = vshrl.u32 %v5309_v48, 16  ;;  %v683_v52 = vshll.u32 %v5309_v48, 16  ;;  %v3460_v41 = vrot.slane %v3459_v8, 4  ;;  %v2443_v48 = vshrl.u32 %v2292_v55, 16 }
 0x1b1   : > { %v3187_v9 = vpop.permute.xlu1 %3186 }
 0x1b2   : > { %3274 = vst.msk [vmem:[#allocation3 + $0xc] sm:$0xf] %vm3270_vm0, %v3187_v9  ;;  %v3213_v13 = vpop.permute.xlu0 %3212  ;;  %v3462_v9 = vshll.u32 %v3315_v53, 16  ;;  %v682_v12 = vrot.slane %v680_v32, 7  ;;  %v2456_v32 = vshrl.u32 %v2293_v54, 16  ;;  %v2445_v8 = vrot.slane %v2443_v48, 4 }
 0x1b3   : > { %2700 = vrot.lane.b32.xlu1 %v2441_v6, %s5841_s17  ;;  %3287 = vst.msk [vmem:[#allocation3 + $0x40] sm:$0xf] %vm3270_vm0, %v3213_v13  ;;  %v3613_v6 = vrot.slane %v3611_v47, 4  ;;  %v3628_v47 = vrot.slane %v3627_v42, 4 }
 0x1b4   : > { %2726 = vrot.lane.b32.xlu0 %v2599_v11, %s5841_s17  ;;  %v3129_v11 = vld [vmem:[#allocation2 + $0x4c] sm:$0xf]  ;;  %v685_v51 = vor.u32 %v683_v52, %v682_v12  ;;  %v686_v18 = vrot.slane %v682_v12, 4  ;;  %v3464_v21 = vrot.slane %v3462_v9, 5  ;;  %v3948_v52 = vsel %vm6434_vm5, %v5375_v0, %v3947_v36  ;;  %v2121_v36 = vld [vmem:[#allocation2 + $0xa0] sm:$0xf] }
 0x1b5   : > { %v3215_v39 = vpop.permute.xlu1 %3214 }
 0x1b6   : > { %3288 = vst.msk [vmem:[#allocation3 + $0x44] sm:$0xf] %vm3270_vm0, %v3215_v39  ;;  %v3711_v24 = vpop.permute.xlu0 %3710  ;;  %v3450_v39 = vrot.slane %v3449_v58, 4  ;;  %v701_v28 = vsel %vm6023_vm13, %v685_v51, %v700_v16  ;;  %v3465_v37 = vsel %vm6080_vm1, %v3460_v41, %v3464_v21 }
 0x1b7   : > { %2728 = vrot.lane.b32.xlu1 %v2609_v17, %s5841_s17  ;;  %3799 = vst.msk [vmem:[#allocation3 + $0x8] sm:$0xf] %vm3796_vm6, %v3711_v24  ;;  %v690_v17 = vrot.slane %v688_v10, 7  ;;  %702 = vst [vmem:[#allocation2 + $0xc0] sm:$0xf] %v701_v28  ;;  %v5382_v10 = vrot.slane %v3860_v59, 9 }
 0x1b8   : > { %3014 = vrot.lane.b32.xlu0 %v2924_v26, %s5843_s20  ;;  %v3617_v26 = vor.u32 %v3616_v7, %v3613_v6  ;;  %v3862_v6 = vld [vmem:[#allocation2 + $0xa4] sm:$0x1]  ;;  %v2452_v7 = vshll.u32 %v2293_v54, 16  ;;  %v2840_v59 = vld [vmem:[#allocation2 + $0xa0] sm:$0xf] }
 0x1b9   : > { %v3713_v33 = vpop.permute.xlu1 %3712  ;;  %v693_v22 = vor.u32 %v691_v40, %v690_v17  ;;  %v695_v24 = vrot.slane %v690_v17, 4  ;;  %v3999_v17 = vrot.slane %v3862_v6, 5  ;;  %v3316_v6 = vld [vmem:[#allocation2 + $0x54] sm:$0xf] }
 0x1ba   : > { %3800 = vst.msk [vmem:[#allocation3 + $0xc] sm:$0xf] %vm3796_vm6, %v3713_v33  ;;  %v3739_v44 = vpop.permute.xlu0 %3738  ;;  %v704_v33 = vld [vmem:[#allocation2 + $0xc8] sm:$0x1]  ;;  %v3618_v31 = vrot.slane %v3617_v26, 4  ;;  %v2454_v40 = vrot.slane %v2452_v7, 5 }
 0x1bb   : > { %3016 = vrot.lane.b32.xlu1 %v2927_v27, %s5843_s20  ;;  %3813 = vst.msk [vmem:[#allocation3 + $0x40] sm:$0xf] %vm3796_vm6, %v3739_v44  ;;  %v3630_v27 = vshll.u32 %v3336_v14, 16  ;;  %v694_v30 = vsel %vm6017_vm12, %v686_v18, %v693_v22  ;;  %v705_v60 = vsel %vm5949_vm2, %v695_v24, %v704_v33  ;;  %v3841_v44 = vld [vmem:[#allocation2 + $0x50] sm:$0x1] }
 0x1bc   : > { %3042 = vrot.lane.b32.xlu0 %v2973_v1, %s5843_s20  ;;  %v3455_v1 = vsel %vm6080_vm1, %v3450_v39, %v6941_v45  ;;  %703 = vst.msk [vmem:[#allocation2 + $0xc4] sm:$0xf] %vm664_vm8, %v694_v30  ;;  %706 = vst [vmem:[#allocation2 + $0xc8] sm:$0x1] %v705_v60  ;;  %v3623_v56 = vsel %vm6080_vm1, %v3618_v31, %v6951_v57  ;;  %v3950_v2 = vrot.slane %v3841_v44, 5  ;;  %v2448_v57 = vrot.slane %v2446_v61, 5 }
 0x1bd   : > { %v3741_v63 = vpop.permute.xlu1 %3740  ;;  %v3632_v38 = vrot.slane %v3630_v27, 5  ;;  %v2294_v18 = vld [vmem:[#allocation2 + $0x50] sm:$0x1]  ;;  %v2315_v30 = vld [vmem:[#allocation2 + $0xa4] sm:$0x1] }
 0x1be   : > { %3814 = vst.msk [vmem:[#allocation3 + $0x44] sm:$0xf] %vm3796_vm6, %v3741_v63  ;;  %v4027_v46 = vpop.permute.xlu0 %4026  ;;  %v3951_v14 = vsel %vm6434_vm5, %v3949_v15, %v3950_v2  ;;  %v2449_v21 = vor.u32 %v2448_v57, %v2445_v8  ;;  %v2462_v42 = vshll.u32 %v2294_v18, 16  ;;  %v2120_v33 = vld [vmem:[#allocation2 + $0x9c] sm:$0xf]  ;;  %v3467_v57 = vshrl.u32 %v3316_v6, 16 }
 0x1bf   : > { %3044 = vrot.lane.b32.xlu1 %v2976_v34, %s5843_s20  ;;  %4115 = vst.msk [vmem:[#allocation3 + $0x8] sm:$0xf] %vm4112_vm7, %v4027_v46  ;;  %v3861_v34 = vld [vmem:[#allocation2 + $0xa0] sm:$0xf]  ;;  %v3633_v58 = vsel %vm6080_vm1, %v3628_v47, %v3632_v38  ;;  %v2819_v38 = vld [vmem:[#allocation2 + $0x4c] sm:$0xf] }
 0x1c0   : > { %3196 = vrot.lane.b32.xlu0 %v3128_v5, %s5844_s11  ;;  %v3996_v4 = vrot.slane %v3861_v34, 5  ;;  %v2313_v5 = vld [vmem:[#allocation2 + $0x9c] sm:$0xf]  ;;  %v2930_v15 = vrot.slane %v2819_v38, 5  ;;  %v2820_v61 = vld [vmem:[#allocation2 + $0x50] sm:$0x1] }
 0x1c1   : > { %v4029_v13 = vpop.permute.xlu1 %4028  ;;  %v2611_v49 = vshrl.u32 %v2313_v5, 16  ;;  %v2614_v12 = vshll.u32 %v2313_v5, 16  ;;  %v3469_v18 = vrot.slane %v3467_v57, 4  ;;  %v3339_v38 = vld [vmem:[#allocation2 + $0xb0] sm:$0x1] }
 0x1c2   : > { %4116 = vst.msk [vmem:[#allocation3 + $0xc] sm:$0xf] %vm4112_vm7, %v4029_v13  ;;  %v4055_v20 = vpop.permute.xlu0 %4054  ;;  %v3998_v16 = vrot.slane %v3996_v4, 4  ;;  %v2296_v57 = vld [vmem:[#allocation2 + $0x58] sm:$0xf] }
 0x1c3   : > { %3198 = vrot.lane.b32.xlu1 %v3129_v11, %s5844_s11  ;;  %4129 = vst.msk [vmem:[#allocation3 + $0x40] sm:$0xf] %vm4112_vm7, %v4055_v20  ;;  %v2314_v11 = vld [vmem:[#allocation2 + $0xa0] sm:$0xf]  ;;  %v3997_v20 = vsel %vm6434_vm5, %v5382_v10, %v3996_v4  ;;  %v2613_v19 = vrot.slane %v2611_v49, 4  ;;  %v2616_v22 = vrot.slane %v2614_v12, 5 }
 0x1c4   : > { %3224 = vrot.lane.b32.xlu0 %v3142_v50, %s5844_s11  ;;  %v2458_v50 = vrot.slane %v2456_v32, 4  ;;  %v2620_v39 = vshll.u32 %v2314_v11, 16  ;;  %v2624_v26 = vshrl.u32 %v2314_v11, 16  ;;  %v2839_v4 = vld [vmem:[#allocation2 + $0x9c] sm:$0xe]  ;;  %v2932_v32 = vrot.slane %v2930_v15, 4 }
 0x1c5   : > { %v4057_v29 = vpop.permute.xlu1 %4056  ;;  %v2617_v31 = vor.u32 %v2616_v22, %v2613_v19  ;;  %v5368_v10 = vrot.slane %v2839_v4, 9  ;;  %v3317_v11 = vld [vmem:[#allocation2 + $0x58] sm:$0xf]  ;;  %v3470_v49 = vshll.u32 %v3316_v6, 16  ;;  %v3842_v4 = vld [vmem:[#allocation2 + $0x54] sm:$0xe] }
 0x1c6   : > { %4130 = vst.msk [vmem:[#allocation3 + $0x44] sm:$0xf] %vm4112_vm7, %v4057_v29  ;;  %v2193_v62 = vpop.permute.xlu0 %2192  ;;  %v2459_v41 = vor.u32 %v2458_v50, %v2454_v40  ;;  %v2622_v27 = vrot.slane %v2620_v39, 5  ;;  %v2626_v28 = vrot.slane %v2624_v26, 4  ;;  %v3480_v50 = vshrl.u32 %v3317_v11, 16 }
 0x1c7   : > { %3226 = vrot.lane.b32.xlu1 %v3143_v25, %s5844_s11  ;;  %2265 = vst.msk [vmem:[#allocation3 + $0x48] sm:$0xf] %vm2246_vm11, %v2193_v62  ;;  %v4000_v25 = vsel %vm6434_vm5, %v3998_v16, %v3999_v17  ;;  %v2464_v62 = vrot.slane %v2462_v42, 5  ;;  %v2618_v34 = vrot.slane %v2617_v31, 4  ;;  %v3337_v16 = vld [vmem:[#allocation2 + $0xa8] sm:$0xf] }
 0x1c8   : > { %3722 = vrot.lane.b32.xlu0 %v3455_v1, %s5845_s19  ;;  %v2450_v1 = vrot.slane %v2449_v21, 4  ;;  %v2460_v60 = vrot.slane %v2459_v41, 4  ;;  %v2627_v55 = vor.u32 %v2626_v28, %v2622_v27  ;;  %v3635_v21 = vshrl.u32 %v3337_v16, 16  ;;  %v2295_v6 = vld [vmem:[#allocation2 + $0x54] sm:$0xf] }
 0x1c9   : > { %v2195_v45 = vpop.permute.xlu1 %2194  ;;  %v5700_v53 = vld [vmem:[#allocation3 + $0x8] sm:$0xff]   ;;  %v3638_v19 = vshll.u32 %v3337_v16, 16  ;;  %v3482_v41 = vrot.slane %v3480_v50, 4  ;;  %v2470_v16 = vshll.u32 %v2295_v6, 16 }
 0x1ca   : > { %2266 = vst.msk [vmem:[#allocation3 + $0x4c] sm:$0xf] %vm2246_vm11, %v2195_v45  ;;  %5502 = vmatmul.mubr.msk.bf16.gmra.mxu0 %vm4275_vm10, %v5700_v53  ;;  %v2691_v63 = vpop.permute.xlu0 %2690  ;;  %v2455_v44 = vsel %vm6080_vm1, %v2450_v1, %v2454_v40  ;;  %v2818_v53 = vld [vmem:[#allocation2 + $0x48] sm:$0xe]  ;;  %v2465_v0 = vsel %vm6080_vm1, %v2460_v60, %v2464_v62  ;;  %v2628_v54 = vrot.slane %v2627_v55, 4  ;;  %v3476_v40 = vshll.u32 %v3317_v11, 16 }
 0x1cb   : > { %3724 = vrot.lane.b32.xlu1 %v3465_v37, %s5845_s19  ;;  %2777 = vst.msk [vmem:[#allocation3 + $0x10] sm:$0xf] %vm2772_vm14, %v2691_v63  ;;  %5505 = vmatprep.mubr.msk.bf16.mxu0 %vm5846_vm9, %v5842_v3  ;;  %v2630_v37 = vshll.u32 %v2315_v30, 16  ;;  %v2623_v63 = vsel %vm6080_vm1, %v2618_v34, %v2622_v27  ;;  %v5361_v2 = vrot.slane %v2818_v53, 9  ;;  %v3130_v30 = vld [vmem:[#allocation2 + $0x54] sm:$0xf] }
 0x1cc   : > { %3750 = vrot.lane.b32.xlu0 %v3623_v56, %s5845_s19  ;;  %v3637_v1 = vrot.slane %v3635_v21, 4  ;;  %v3640_v31 = vrot.slane %v3638_v19, 5 }
 0x1cd   : > { %v2693_v46 = vpop.permute.xlu1 %2692  ;;  %v5701_v9 = vld [vmem:[#allocation3 + $0x40] sm:$0xff]   ;;  %v2632_v56 = vrot.slane %v2630_v37, 5  ;;  %v2931_v8 = vsel %vm6434_vm5, %v5361_v2, %v2930_v15 }
 0x1ce   : > { %2778 = vst.msk [vmem:[#allocation3 + $0x14] sm:$0xf] %vm2772_vm14, %v2693_v46  ;;  %5530 = vmatmul.mubr.msk.bf16.vlgmr.msra.gmra.mxu1 %vm4275_vm10, %v5701_v9  ;;  %v2719_v13 = vpop.permute.xlu0 %2718  ;;  %v2933_v46 = vrot.slane %v2820_v61, 5  ;;  %v2841_v9 = vld [vmem:[#allocation2 + $0xa4] sm:$0x1] }
 0x1cf   : > { %3752 = vrot.lane.b32.xlu1 %v3633_v58, %s5845_s19  ;;  %2791 = vst.msk [vmem:[#allocation3 + $0x48] sm:$0xf] %vm2772_vm14, %v2719_v13  ;;  %5533 = vmatprep.mubr.msk.bf16.mxu1 %vm5846_vm9, %v5842_v3  ;;  %v2979_v58 = vrot.slane %v2840_v59, 5  ;;  %v2633_v7 = vsel %vm6080_vm1, %v2628_v54, %v2632_v56  ;;  %v3145_v54 = vld [vmem:[#allocation2 + $0xac] sm:$0xf] }
 0x1d0   : > { %4038 = vrot.lane.b32.xlu0 %v3948_v52, %s5847_s30  ;;  %v2934_v17 = vsel %vm6434_vm5, %v2932_v32, %v2933_v46 }
 0x1d1   : > { %v2721_v51 = vpop.permute.xlu1 %2720  ;;  %v2981_v13 = vrot.slane %v2979_v58, 4  ;;  %v2980_v26 = vsel %vm6434_vm5, %v5368_v10, %v2979_v58 }
 0x1d2   : > { %2792 = vst.msk [vmem:[#allocation3 + $0x4c] sm:$0xf] %vm2772_vm14, %v2721_v51  ;;  %v3007_v24 = vpop.permute.xlu0 %3006  ;;  %v3338_v51 = vld [vmem:[#allocation2 + $0xac] sm:$0xf] }
 0x1d3   : > { %4040 = vrot.lane.b32.xlu1 %v3951_v14, %s5847_s30  ;;  %3093 = vst.msk [vmem:[#allocation3 + $0x10] sm:$0xf] %vm3088_vm15, %v3007_v24  ;;  %v2982_v14 = vrot.slane %v2841_v9, 5  ;;  %v3644_v42 = vshll.u32 %v3338_v51, 16  ;;  %v3648_v27 = vshrl.u32 %v3338_v51, 16 }
 0x1d4   : > { %4066 = vrot.lane.b32.xlu0 %v3997_v20, %s5847_s30  ;;  %v3472_v20 = vrot.slane %v3470_v49, 5  ;;  %v3844_v9 = vld [vmem:[#allocation2 + $0x5c] sm:$0x1]  ;;  %v3865_v51 = vld [vmem:[#allocation2 + $0xb0] sm:$0x1] }
 0x1d5   : > { %v3009_v29 = vpop.permute.xlu1 %3008  ;;  %v2983_v24 = vsel %vm6434_vm5, %v2981_v13, %v2982_v14  ;;  %v3646_v55 = vrot.slane %v3644_v42, 5  ;;  %v3650_v37 = vrot.slane %v3648_v27, 4  ;;  %v3863_v13 = vld [vmem:[#allocation2 + $0xa8] sm:$0xe]  ;;  %v2467_v14 = vshrl.u32 %v2295_v6, 16 }
 0x1d6   : > { %3094 = vst.msk [vmem:[#allocation3 + $0x14] sm:$0xf] %vm3088_vm15, %v3009_v29  ;;  %v3035_v35 = vpop.permute.xlu0 %3034  ;;  %v3318_v29 = vld [vmem:[#allocation2 + $0x5c] sm:$0x1]  ;;  %v2472_v42 = vrot.slane %v2470_v16, 5 }
 0x1d7   : > { %4068 = vrot.lane.b32.xlu1 %v4000_v25, %s5847_s30  ;;  %3107 = vst.msk [vmem:[#allocation3 + $0x48] sm:$0xf] %vm3088_vm15, %v3035_v35  ;;  %v3478_v25 = vrot.slane %v3476_v40, 5  ;;  %v3486_v62 = vshll.u32 %v3318_v29, 16  ;;  %v3651_v59 = vor.u32 %v3650_v37, %v3646_v55  ;;  %v3957_v40 = vrot.slane %v3844_v9, 5 }
 0x1d8   : > { %2204 = vrot.lane.b32.xlu0 %v2120_v33, %s5840_s10  ;;  %v3473_v33 = vor.u32 %v3472_v20, %v3469_v18  ;;  %v2476_v18 = vshll.u32 %v2296_v57, 16  ;;  %v2480_v20 = vshrl.u32 %v2296_v57, 16  ;;  %v2823_v16 = vld [vmem:[#allocation2 + $0x5c] sm:$0x1] }
 0x1d9   : > { %v3037_v47 = vpop.permute.xlu1 %3036  ;;  %v3483_v60 = vor.u32 %v3482_v41, %v3478_v25  ;;  %v3488_v15 = vrot.slane %v3486_v62, 5  ;;  %v3652_v32 = vrot.slane %v3651_v59, 4  ;;  %v2469_v41 = vrot.slane %v2467_v14, 4  ;;  %v2318_v59 = vld [vmem:[#allocation2 + $0xb0] sm:$0x1] }
 0x1da   : > { %3108 = vst.msk [vmem:[#allocation3 + $0x4c] sm:$0xf] %vm3088_vm15, %v3037_v47  ;;  %v3189_v45 = vpop.permute.xlu0 %3188  ;;  %v3474_v34 = vrot.slane %v3473_v33, 4 }
 0x1db   : > { %2206 = vrot.lane.b32.xlu1 %v2121_v36, %s5840_s10  ;;  %3275 = vst.msk [vmem:[#allocation3 + $0x10] sm:$0xf] %vm3270_vm0, %v3189_v45  ;;  %v3131_v36 = vld [vmem:[#allocation2 + $0x58] sm:$0xf]  ;;  %v3641_v45 = vor.u32 %v3640_v31, %v3637_v1  ;;  %v3484_v56 = vrot.slane %v3483_v60, 4  ;;  %v4006_v1 = vrot.slane %v3865_v51, 5 }
 0x1dc   : > { %2702 = vrot.lane.b32.xlu0 %v2455_v44, %s5841_s17  ;;  %v3144_v44 = vld [vmem:[#allocation2 + $0xa8] sm:$0xf]  ;;  %v2478_v31 = vrot.slane %v2476_v18, 5  ;;  %v3319_v51 = vld [vmem:[#allocation2 + $0x60] sm:$0xf] }
 0x1dd   : > { %v3191_v48 = vpop.permute.xlu1 %3190  ;;  %v3642_v2 = vrot.slane %v3641_v45, 4 }
 0x1de   : > { %3276 = vst.msk [vmem:[#allocation3 + $0x14] sm:$0xf] %vm3270_vm0, %v3191_v48  ;;  %v3217_v5 = vpop.permute.xlu0 %3216  ;;  %v3654_v48 = vshll.u32 %v3339_v38, 16 }
 0x1df   : > { %2704 = vrot.lane.b32.xlu1 %v2465_v0, %s5841_s17  ;;  %3289 = vst.msk [vmem:[#allocation3 + $0x48] sm:$0xf] %vm3270_vm0, %v3217_v5  ;;  %v3843_v0 = vld [vmem:[#allocation2 + $0x58] sm:$0xf]  ;;  %v3647_v49 = vsel %vm6080_vm1, %v3642_v2, %v3646_v55  ;;  %v2297_v55 = vld [vmem:[#allocation2 + $0x5c] sm:$0x1] }
 0x1e0   : > { %2730 = vrot.lane.b32.xlu0 %v2623_v63, %s5841_s17  ;;  %v3479_v63 = vsel %vm6080_vm1, %v3474_v34, %v3478_v25  ;;  %v3954_v5 = vrot.slane %v3843_v0, 5  ;;  %v3656_v46 = vrot.slane %v3654_v48, 5  ;;  %v2317_v25 = vld [vmem:[#allocation2 + $0xac] sm:$0xf]  ;;  %v2486_v0 = vshll.u32 %v2297_v55, 16 }
 0x1e1   : > { %v3219_v52 = vpop.permute.xlu1 %3218  ;;  %v2648_v60 = vshrl.u32 %v2317_v25, 16  ;;  %v2122_v48 = vld [vmem:[#allocation2 + $0xa8] sm:$0xf] }
 0x1e2   : > { %3290 = vst.msk [vmem:[#allocation3 + $0x4c] sm:$0xf] %vm3270_vm0, %v3219_v52  ;;  %v3715_v12 = vpop.permute.xlu0 %3714  ;;  %v3864_v52 = vld [vmem:[#allocation2 + $0xac] sm:$0xf] }
 0x1e3   : > { %2732 = vrot.lane.b32.xlu1 %v2633_v7, %s5841_s17  ;;  %3801 = vst.msk [vmem:[#allocation3 + $0x10] sm:$0xf] %vm3796_vm6, %v3715_v12  ;;  %v3489_v7 = vsel %vm6080_vm1, %v3484_v56, %v3488_v15  ;;  %v3956_v12 = vrot.slane %v3954_v5, 4  ;;  %v4003_v50 = vrot.slane %v3864_v52, 5  ;;  %v2650_v56 = vrot.slane %v2648_v60, 4 }
 0x1e4   : > { %3018 = vrot.lane.b32.xlu0 %v2931_v8, %s5843_s20  ;;  %v5376_v8 = vrot.slane %v3842_v4, 9  ;;  %v2123_v4 = vld [vmem:[#allocation2 + $0xac] sm:$0xf] }
 0x1e5   : > { %v3717_v39 = vpop.permute.xlu1 %3716  ;;  %v4005_v33 = vrot.slane %v4003_v50, 4 }
 0x1e6   : > { %3802 = vst.msk [vmem:[#allocation3 + $0x14] sm:$0xf] %vm3796_vm6, %v3717_v39  ;;  %v3743_v22 = vpop.permute.xlu0 %3742  ;;  %v2316_v39 = vld [vmem:[#allocation2 + $0xa8] sm:$0xf] }
 0x1e7   : > { %3020 = vrot.lane.b32.xlu1 %v2934_v17, %s5843_s20  ;;  %3815 = vst.msk [vmem:[#allocation3 + $0x48] sm:$0xf] %vm3796_vm6, %v3743_v22  ;;  %v3955_v22 = vsel %vm6434_vm5, %v5376_v8, %v3954_v5  ;;  %v2635_v27 = vshrl.u32 %v2316_v39, 16  ;;  %v4007_v45 = vsel %vm6434_vm5, %v4005_v33, %v4006_v1  ;;  %v3340_v33 = vld [vmem:[#allocation2 + $0xb4] sm:$0xf] }
 0x1e8   : > { %3046 = vrot.lane.b32.xlu0 %v2980_v26, %s5843_s20  ;;  %v3657_v26 = vsel %vm6080_vm1, %v3652_v32, %v3656_v46  ;;  %v2822_v46 = vld [vmem:[#allocation2 + $0x58] sm:$0xf] }
 0x1e9   : > { %v3745_v28 = vpop.permute.xlu1 %3744  ;;  %v2637_v38 = vrot.slane %v2635_v27, 4  ;;  %v3494_v27 = vshll.u32 %v3319_v51, 16 }
 0x1ea   : > { %3816 = vst.msk [vmem:[#allocation3 + $0x4c] sm:$0xf] %vm3796_vm6, %v3745_v28  ;;  %v4031_v35 = vpop.permute.xlu0 %4030  ;;  %v2638_v28 = vshll.u32 %v2316_v39, 16 }
 0x1eb   : > { %3048 = vrot.lane.b32.xlu1 %v2983_v24, %s5843_s20  ;;  %4117 = vst.msk [vmem:[#allocation3 + $0x10] sm:$0xf] %vm4112_vm7, %v4031_v35  ;;  %v5383_v24 = vrot.slane %v3863_v13, 9  ;;  %v2482_v35 = vrot.slane %v2480_v20, 4  ;;  %v2843_v13 = vld [vmem:[#allocation2 + $0xac] sm:$0xf] }
 0x1ec   : > { %3200 = vrot.lane.b32.xlu0 %v3130_v30, %s5844_s11  ;;  %v3958_v30 = vsel %vm6434_vm5, %v3956_v12, %v3957_v40  ;;  %v2937_v12 = vrot.slane %v2822_v46, 5  ;;  %v3342_v46 = vld [vmem:[#allocation2 + $0xbc] sm:$0x1] }
 0x1ed   : > { %v4033_v47 = vpop.permute.xlu1 %4032  ;;  %v4004_v37 = vsel %vm6434_vm5, %v5383_v24, %v4003_v50  ;;  %v2842_v50 = vld [vmem:[#allocation2 + $0xa8] sm:$0xe] }
 0x1ee   : > { %4118 = vst.msk [vmem:[#allocation3 + $0x14] sm:$0xf] %vm4112_vm7, %v4033_v47  ;;  %v4059_v53 = vpop.permute.xlu0 %4058  ;;  %v2473_v47 = vor.u32 %v2472_v42, %v2469_v41  ;;  %v2939_v20 = vrot.slane %v2937_v12, 4  ;;  %v5369_v24 = vrot.slane %v2842_v50, 9  ;;  %v3491_v42 = vshrl.u32 %v3319_v51, 16 }
 0x1ef   : > { %3202 = vrot.lane.b32.xlu1 %v3131_v36, %s5844_s11  ;;  %4131 = vst.msk [vmem:[#allocation3 + $0x48] sm:$0xf] %vm4112_vm7, %v4059_v53  ;;  %v2644_v36 = vshll.u32 %v2317_v25, 16  ;;  %v2483_v53 = vor.u32 %v2482_v35, %v2478_v31  ;;  %v3320_v25 = vld [vmem:[#allocation2 + $0x64] sm:$0xf] }
 0x1f0   : > { %3228 = vrot.lane.b32.xlu0 %v3144_v44, %s5844_s11  ;;  %v2640_v44 = vrot.slane %v2638_v28, 5  ;;  %v3504_v35 = vshrl.u32 %v3320_v25, 16  ;;  %v3493_v55 = vrot.slane %v3491_v42, 4  ;;  %v3845_v50 = vld [vmem:[#allocation2 + $0x60] sm:$0xe] }
 0x1f1   : > { %v4061_v61 = vpop.permute.xlu1 %4060  ;;  %v2484_v5 = vrot.slane %v2483_v53, 4  ;;  %v2298_v51 = vld [vmem:[#allocation2 + $0x60] sm:$0xf]  ;;  %v2299_v42 = vld [vmem:[#allocation2 + $0x64] sm:$0xf] }
 0x1f2   : > { %4132 = vst.msk [vmem:[#allocation3 + $0x4c] sm:$0xf] %vm4112_vm7, %v4061_v61  ;;  %v2197_v58 = vpop.permute.xlu0 %2196  ;;  %v2474_v61 = vrot.slane %v2473_v47, 4  ;;  %v3659_v47 = vshrl.u32 %v3340_v33, 16  ;;  %v3506_v53 = vrot.slane %v3504_v35, 4 }
 0x1f3   : > { %3230 = vrot.lane.b32.xlu1 %v3145_v54, %s5844_s11  ;;  %2267 = vst.msk [vmem:[#allocation3 + $0x50] sm:$0xf] %vm2246_vm11, %v2197_v58  ;;  %v2646_v54 = vrot.slane %v2644_v36, 5  ;;  %v2488_v58 = vrot.slane %v2486_v0, 5 }
 0x1f4   : > { %3726 = vrot.lane.b32.xlu0 %v3479_v63, %s5845_s19  ;;  %v2641_v63 = vor.u32 %v2640_v44, %v2637_v38  ;;  %v2479_v9 = vsel %vm6080_vm1, %v2474_v61, %v2478_v31  ;;  %v3500_v31 = vshll.u32 %v3320_v25, 16  ;;  %v3662_v38 = vshll.u32 %v3340_v33, 16 }
 0x1f5   : > { %v2199_v10 = vpop.permute.xlu1 %2198  ;;  %v5702_v11 = vld [vmem:[#allocation3 + $0x10] sm:$0xff]   ;;  %v2651_v6 = vor.u32 %v2650_v56, %v2646_v54  ;;  %v2489_v8 = vsel %vm6080_vm1, %v2484_v5, %v2488_v58  ;;  %v3661_v61 = vrot.slane %v3659_v47, 4  ;;  %v2494_v33 = vshll.u32 %v2298_v51, 16 }
 0x1f6   : > { %2268 = vst.msk [vmem:[#allocation3 + $0x54] sm:$0xf] %vm2246_vm11, %v2199_v10  ;;  %5506 = vmatmul.mubr.msk.bf16.gmra.mxu0 %vm4275_vm10, %v5702_v11  ;;  %v2695_v17 = vpop.permute.xlu0 %2694  ;;  %v2642_v52 = vrot.slane %v2641_v63, 4  ;;  %v2821_v11 = vld [vmem:[#allocation2 + $0x54] sm:$0xe]  ;;  %v3664_v63 = vrot.slane %v3662_v38, 5 }
 0x1f7   : > { %3728 = vrot.lane.b32.xlu1 %v3489_v7, %s5845_s19  ;;  %2779 = vst.msk [vmem:[#allocation3 + $0x18] sm:$0xf] %vm2772_vm14, %v2695_v17  ;;  %5509 = vmatprep.mubr.msk.bf16.mxu0 %vm5846_vm9, %v5842_v3  ;;  %v2654_v7 = vshll.u32 %v2318_v59, 16  ;;  %v2652_v57 = vrot.slane %v2651_v6, 4  ;;  %v5362_v40 = vrot.slane %v2821_v11, 9 }
 0x1f8   : > { %3754 = vrot.lane.b32.xlu0 %v3647_v49, %s5845_s19  ;;  %v2647_v17 = vsel %vm6080_vm1, %v2642_v52, %v2646_v54  ;;  %v3132_v59 = vld [vmem:[#allocation2 + $0x60] sm:$0xf] }
 0x1f9   : > { %v2697_v21 = vpop.permute.xlu1 %2696  ;;  %v5703_v19 = vld [vmem:[#allocation3 + $0x48] sm:$0xff]   ;;  %v2656_v49 = vrot.slane %v2654_v7, 5  ;;  %v2938_v41 = vsel %vm6434_vm5, %v5362_v40, %v2937_v12 }
 0x1fa   : > { %2780 = vst.msk [vmem:[#allocation3 + $0x1c] sm:$0xf] %vm2772_vm14, %v2697_v21  ;;  %5534 = vmatmul.mubr.msk.bf16.gmra.mxu1 %vm4275_vm10, %v5703_v19  ;;  %v2723_v29 = vpop.permute.xlu0 %2722  ;;  %v2940_v21 = vrot.slane %v2823_v16, 5  ;;  %v2844_v19 = vld [vmem:[#allocation2 + $0xb0] sm:$0x1] }
 0x1fb   : > { %3756 = vrot.lane.b32.xlu1 %v3657_v26, %s5845_s19  ;;  %2793 = vst.msk [vmem:[#allocation3 + $0x50] sm:$0xf] %vm2772_vm14, %v2723_v29  ;;  %5537 = vmatprep.mubr.msk.bf16.mxu1 %vm5846_vm9, %v5842_v3  ;;  %v2986_v26 = vrot.slane %v2843_v13, 5  ;;  %v2657_v18 = vsel %vm6080_vm1, %v2652_v57, %v2656_v49  ;;  %v3147_v57 = vld [vmem:[#allocation2 + $0xb8] sm:$0xf] }
 0x1fc   : > { %4042 = vrot.lane.b32.xlu0 %v3955_v22, %s5847_s30  ;;  %v2941_v1 = vsel %vm6434_vm5, %v2939_v20, %v2940_v21 }
 0x1fd   : > { %v2725_v62 = vpop.permute.xlu1 %2724  ;;  %v2988_v29 = vrot.slane %v2986_v26, 4  ;;  %v2987_v60 = vsel %vm6434_vm5, %v5369_v24, %v2986_v26 }
 0x1fe   : > { %2794 = vst.msk [vmem:[#allocation3 + $0x54] sm:$0xf] %vm2772_vm14, %v2725_v62  ;;  %v3011_v34 = vpop.permute.xlu0 %3010  ;;  %v3341_v62 = vld [vmem:[#allocation2 + $0xb8] sm:$0xf] }
 0x1ff   : > { %4044 = vrot.lane.b32.xlu1 %v3958_v30, %s5847_s30  ;;  %3095 = vst.msk [vmem:[#allocation3 + $0x18] sm:$0xf] %vm3088_vm15, %v3011_v34  ;;  %v2989_v30 = vrot.slane %v2844_v19, 5  ;;  %v3668_v0 = vshll.u32 %v3341_v62, 16  ;;  %v3672_v54 = vshrl.u32 %v3341_v62, 16 }
 0x200   : > { %4070 = vrot.lane.b32.xlu0 %v4004_v37, %s5847_s30  ;;  %v3496_v37 = vrot.slane %v3494_v27, 5  ;;  %v3847_v19 = vld [vmem:[#allocation2 + $0x68] sm:$0x1]  ;;  %v3868_v62 = vld [vmem:[#allocation2 + $0xbc] sm:$0x1] }
 0x201   : > { %v3013_v15 = vpop.permute.xlu1 %3012  ;;  %v2990_v34 = vsel %vm6434_vm5, %v2988_v29, %v2989_v30  ;;  %v3670_v6 = vrot.slane %v3668_v0, 5  ;;  %v3674_v7 = vrot.slane %v3672_v54, 4  ;;  %v3866_v29 = vld [vmem:[#allocation2 + $0xb4] sm:$0xe]  ;;  %v2491_v30 = vshrl.u32 %v2298_v51, 16 }
 0x202   : > { %3096 = vst.msk [vmem:[#allocation3 + $0x1c] sm:$0xf] %vm3088_vm15, %v3013_v15  ;;  %v3039_v2 = vpop.permute.xlu0 %3038  ;;  %v3321_v15 = vld [vmem:[#allocation2 + $0x68] sm:$0x1]  ;;  %v2496_v0 = vrot.slane %v2494_v33, 5 }
 0x203   : > { %4072 = vrot.lane.b32.xlu1 %v4007_v45, %s5847_s30  ;;  %3109 = vst.msk [vmem:[#allocation3 + $0x50] sm:$0xf] %vm3088_vm15, %v3039_v2  ;;  %v3502_v45 = vrot.slane %v3500_v31, 5  ;;  %v3510_v58 = vshll.u32 %v3321_v15, 16  ;;  %v3675_v13 = vor.u32 %v3674_v7, %v3670_v6  ;;  %v3964_v31 = vrot.slane %v3847_v19, 5 }
 0x204   : > { %2208 = vrot.lane.b32.xlu0 %v2122_v48, %s5840_s10  ;;  %v3497_v48 = vor.u32 %v3496_v37, %v3493_v55  ;;  %v2500_v55 = vshll.u32 %v2299_v42, 16  ;;  %v2504_v37 = vshrl.u32 %v2299_v42, 16  ;;  %v2826_v33 = vld [vmem:[#allocation2 + $0x68] sm:$0x1] }
 0x205   : > { %v3041_v32 = vpop.permute.xlu1 %3040  ;;  %v3507_v5 = vor.u32 %v3506_v53, %v3502_v45  ;;  %v3512_v12 = vrot.slane %v3510_v58, 5  ;;  %v3676_v20 = vrot.slane %v3675_v13, 4  ;;  %v2493_v53 = vrot.slane %v2491_v30, 4  ;;  %v2321_v13 = vld [vmem:[#allocation2 + $0xbc] sm:$0x1] }
 0x206   : > { %3110 = vst.msk [vmem:[#allocation3 + $0x54] sm:$0xf] %vm3088_vm15, %v3041_v32  ;;  %v3193_v10 = vpop.permute.xlu0 %3192  ;;  %v3498_v52 = vrot.slane %v3497_v48, 4 }
 0x207   : > { %2210 = vrot.lane.b32.xlu1 %v2123_v4, %s5840_s10  ;;  %3277 = vst.msk [vmem:[#allocation3 + $0x18] sm:$0xf] %vm3270_vm0, %v3193_v10  ;;  %v3133_v4 = vld [vmem:[#allocation2 + $0x64] sm:$0xf]  ;;  %v3665_v10 = vor.u32 %v3664_v63, %v3661_v61  ;;  %v3508_v49 = vrot.slane %v3507_v5, 4  ;;  %v4013_v61 = vrot.slane %v3868_v62, 5 }
 0x208   : > { %2706 = vrot.lane.b32.xlu0 %v2479_v9, %s5841_s17  ;;  %v3146_v9 = vld [vmem:[#allocation2 + $0xb4] sm:$0xf]  ;;  %v2502_v63 = vrot.slane %v2500_v55, 5  ;;  %v3322_v62 = vld [vmem:[#allocation2 + $0x6c] sm:$0xf] }
 0x209   : > { %v3195_v14 = vpop.permute.xlu1 %3194  ;;  %v3666_v40 = vrot.slane %v3665_v10, 4 }
 0x20a   : > { %3278 = vst.msk [vmem:[#allocation3 + $0x1c] sm:$0xf] %vm3270_vm0, %v3195_v14  ;;  %v3221_v39 = vpop.permute.xlu0 %3220  ;;  %v3678_v14 = vshll.u32 %v3342_v46, 16 }
 0x20b   : > { %2708 = vrot.lane.b32.xlu1 %v2489_v8, %s5841_s17  ;;  %3291 = vst.msk [vmem:[#allocation3 + $0x50] sm:$0xf] %vm3270_vm0, %v3221_v39  ;;  %v3846_v8 = vld [vmem:[#allocation2 + $0x64] sm:$0xf]  ;;  %v3671_v27 = vsel %vm6080_vm1, %v3666_v40, %v3670_v6  ;;  %v2300_v6 = vld [vmem:[#allocation2 + $0x68] sm:$0x1] }
 0x20c   : > { %2734 = vrot.lane.b32.xlu0 %v2647_v17, %s5841_s17  ;;  %v3503_v17 = vsel %vm6080_vm1, %v3498_v52, %v3502_v45  ;;  %v3961_v39 = vrot.slane %v3846_v8, 5  ;;  %v3680_v21 = vrot.slane %v3678_v14, 5  ;;  %v2320_v45 = vld [vmem:[#allocation2 + $0xb8] sm:$0xf]  ;;  %v2510_v8 = vshll.u32 %v2300_v6, 16 }
 0x20d   : > { %v3223_v22 = vpop.permute.xlu1 %3222  ;;  %v2672_v5 = vshrl.u32 %v2320_v45, 16  ;;  %v2124_v14 = vld [vmem:[#allocation2 + $0xb4] sm:$0xf] }
 0x20e   : > { %3292 = vst.msk [vmem:[#allocation3 + $0x54] sm:$0xf] %vm3270_vm0, %v3223_v22  ;;  %v3719_v28 = vpop.permute.xlu0 %3718  ;;  %v3867_v22 = vld [vmem:[#allocation2 + $0xb8] sm:$0xf] }
 0x20f   : > { %2736 = vrot.lane.b32.xlu1 %v2657_v18, %s5841_s17  ;;  %3803 = vst.msk [vmem:[#allocation3 + $0x18] sm:$0xf] %vm3796_vm6, %v3719_v28  ;;  %v3513_v18 = vsel %vm6080_vm1, %v3508_v49, %v3512_v12  ;;  %v3963_v28 = vrot.slane %v3961_v39, 4  ;;  %v4010_v35 = vrot.slane %v3867_v22, 5  ;;  %v2674_v49 = vrot.slane %v2672_v5, 4 }
 0x210   : > { %3022 = vrot.lane.b32.xlu0 %v2938_v41, %s5843_s20  ;;  %v5377_v41 = vrot.slane %v3845_v50, 9  ;;  %v2125_v50 = vld [vmem:[#allocation2 + $0xb8] sm:$0xf] }
 0x211   : > { %v3721_v36 = vpop.permute.xlu1 %3720  ;;  %v4012_v48 = vrot.slane %v4010_v35, 4 }
 0x212   : > { %3804 = vst.msk [vmem:[#allocation3 + $0x1c] sm:$0xf] %vm3796_vm6, %v3721_v36  ;;  %v3747_v44 = vpop.permute.xlu0 %3746  ;;  %v2319_v36 = vld [vmem:[#allocation2 + $0xb4] sm:$0xf] }
 0x213   : > { %3024 = vrot.lane.b32.xlu1 %v2941_v1, %s5843_s20  ;;  %3817 = vst.msk [vmem:[#allocation3 + $0x50] sm:$0xf] %vm3796_vm6, %v3747_v44  ;;  %v3962_v44 = vsel %vm6434_vm5, %v5377_v41, %v3961_v39  ;;  %v2659_v54 = vshrl.u32 %v2319_v36, 16  ;;  %v4014_v10 = vsel %vm6434_vm5, %v4012_v48, %v4013_v61  ;;  %v3343_v48 = vld [vmem:[#allocation2 + $0xc0] sm:$0xf] }
 0x214   : > { %3050 = vrot.lane.b32.xlu0 %v2987_v60, %s5843_s20  ;;  %v3681_v60 = vsel %vm6080_vm1, %v3676_v20, %v3680_v21  ;;  %v2825_v21 = vld [vmem:[#allocation2 + $0x64] sm:$0xf] }
 0x215   : > { %v3749_v56 = vpop.permute.xlu1 %3748  ;;  %v2661_v46 = vrot.slane %v2659_v54, 4  ;;  %v3518_v54 = vshll.u32 %v3322_v62, 16 }
 0x216   : > { %3818 = vst.msk [vmem:[#allocation3 + $0x54] sm:$0xf] %vm3796_vm6, %v3749_v56  ;;  %v4035_v2 = vpop.permute.xlu0 %4034  ;;  %v2662_v56 = vshll.u32 %v2319_v36, 16 }
 0x217   : > { %3052 = vrot.lane.b32.xlu1 %v2990_v34, %s5843_s20  ;;  %4119 = vst.msk [vmem:[#allocation3 + $0x18] sm:$0xf] %vm4112_vm7, %v4035_v2  ;;  %v5384_v34 = vrot.slane %v3866_v29, 9  ;;  %v2506_v2 = vrot.slane %v2504_v37, 4  ;;  %v2846_v29 = vld [vmem:[#allocation2 + $0xb8] sm:$0xf] }
 0x218   : > { %3204 = vrot.lane.b32.xlu0 %v3132_v59, %s5844_s11  ;;  %v3965_v59 = vsel %vm6434_vm5, %v3963_v28, %v3964_v31  ;;  %v2944_v28 = vrot.slane %v2825_v21, 5  ;;  %v3345_v21 = vld [vmem:[#allocation2 + $0xc8] sm:$0x1] }
 0x219   : > { %v4037_v32 = vpop.permute.xlu1 %4036  ;;  %v4011_v7 = vsel %vm6434_vm5, %v5384_v34, %v4010_v35  ;;  %v2845_v35 = vld [vmem:[#allocation2 + $0xb4] sm:$0xe] }
 0x21a   : > { %4120 = vst.msk [vmem:[#allocation3 + $0x1c] sm:$0xf] %vm4112_vm7, %v4037_v32  ;;  %v4063_v11 = vpop.permute.xlu0 %4062  ;;  %v2497_v32 = vor.u32 %v2496_v0, %v2493_v53  ;;  %v2946_v37 = vrot.slane %v2944_v28, 4  ;;  %v5370_v34 = vrot.slane %v2845_v35, 9  ;;  %v3515_v0 = vshrl.u32 %v3322_v62, 16 }
 0x21b   : > { %3206 = vrot.lane.b32.xlu1 %v3133_v4, %s5844_s11  ;;  %4133 = vst.msk [vmem:[#allocation3 + $0x50] sm:$0xf] %vm4112_vm7, %v4063_v11  ;;  %v2668_v4 = vshll.u32 %v2320_v45, 16  ;;  %v2507_v11 = vor.u32 %v2506_v2, %v2502_v63  ;;  %v3323_v45 = vld [vmem:[#allocation2 + $0x70] sm:$0xf] }
 0x21c   : > { %3232 = vrot.lane.b32.xlu0 %v3146_v9, %s5844_s11  ;;  %v2664_v9 = vrot.slane %v2662_v56, 5  ;;  %v3528_v2 = vshrl.u32 %v3323_v45, 16  ;;  %v3517_v6 = vrot.slane %v3515_v0, 4  ;;  %v3869_v0 = vld [vmem:[#allocation2 + $0xc0] sm:$0xe] }
 0x21d   : > { %v4065_v16 = vpop.permute.xlu1 %4064  ;;  %v2508_v39 = vrot.slane %v2507_v11, 4 }
 0x21e   : > { %4134 = vst.msk [vmem:[#allocation3 + $0x54] sm:$0xf] %vm4112_vm7, %v4065_v16  ;;  %v2201_v26 = vpop.permute.xlu0 %2200  ;;  %v2498_v16 = vrot.slane %v2497_v32, 4  ;;  %v3683_v32 = vshrl.u32 %v3343_v48, 16  ;;  %v3530_v11 = vrot.slane %v3528_v2, 4 }
 0x21f   : > { %3234 = vrot.lane.b32.xlu1 %v3147_v57, %s5844_s11  ;;  %2269 = vst.msk [vmem:[#allocation3 + $0x58] sm:$0xf] %vm2246_vm11, %v2201_v26  ;;  %v2670_v57 = vrot.slane %v2668_v4, 5  ;;  %v2512_v26 = vrot.slane %v2510_v8, 5 }
 0x220   : > { %3730 = vrot.lane.b32.xlu0 %v3503_v17, %s5845_s19  ;;  %v2665_v17 = vor.u32 %v2664_v9, %v2661_v46  ;;  %v2503_v19 = vsel %vm6080_vm1, %v2498_v16, %v2502_v63  ;;  %v3524_v63 = vshll.u32 %v3323_v45, 16  ;;  %v3686_v46 = vshll.u32 %v3343_v48, 16 }
 0x221   : > { %v2203_v24 = vpop.permute.xlu1 %2202  ;;  %v5704_v25 = vld [vmem:[#allocation3 + $0x18] sm:$0xff]   ;;  %v2675_v51 = vor.u32 %v2674_v49, %v2670_v57  ;;  %v2513_v41 = vsel %vm6080_vm1, %v2508_v39, %v2512_v26  ;;  %v3685_v16 = vrot.slane %v3683_v32, 4 }
 0x222   : > { %2270 = vst.msk [vmem:[#allocation3 + $0x5c] sm:$0xf] %vm2246_vm11, %v2203_v24  ;;  %5510 = vmatmul.mubr.msk.bf16.gmra.mxu0 %vm4275_vm10, %v5704_v25  ;;  %v2699_v1 = vpop.permute.xlu0 %2698  ;;  %v2666_v22 = vrot.slane %v2665_v17, 4  ;;  %v2824_v25 = vld [vmem:[#allocation2 + $0x60] sm:$0xe]  ;;  %v3688_v17 = vrot.slane %v3686_v46, 5 }
 0x223   : > { %3732 = vrot.lane.b32.xlu1 %v3513_v18, %s5845_s19  ;;  %2781 = vst.msk [vmem:[#allocation3 + $0x20] sm:$0xf] %vm2772_vm14, %v2699_v1  ;;  %5513 = vmatprep.mubr.msk.bf16.mxu0 %vm5846_vm9, %v5842_v3  ;;  %v2678_v18 = vshll.u32 %v2321_v13, 16  ;;  %v2676_v42 = vrot.slane %v2675_v51, 4  ;;  %v5363_v31 = vrot.slane %v2824_v25, 9 }
 0x224   : > { %3758 = vrot.lane.b32.xlu0 %v3671_v27, %s5845_s19  ;;  %v2671_v1 = vsel %vm6080_vm1, %v2666_v22, %v2670_v57  ;;  %v3134_v13 = vld [vmem:[#allocation2 + $0x6c] sm:$0xf] }
 0x225   : > { %v2701_v47 = vpop.permute.xlu1 %2700  ;;  %v5705_v38 = vld [vmem:[#allocation3 + $0x50] sm:$0xff]   ;;  %v2680_v27 = vrot.slane %v2678_v18, 5  ;;  %v2945_v53 = vsel %vm6434_vm5, %v5363_v31, %v2944_v28 }
 0x226   : > { %2782 = vst.msk [vmem:[#allocation3 + $0x24] sm:$0xf] %vm2772_vm14, %v2701_v47  ;;  %5538 = vmatmul.mubr.msk.bf16.gmra.mxu1 %vm4275_vm10, %v5705_v38  ;;  %v2727_v15 = vpop.permute.xlu0 %2726  ;;  %v2947_v47 = vrot.slane %v2826_v33, 5  ;;  %v2847_v38 = vld [vmem:[#allocation2 + $0xbc] sm:$0x1] }
 0x227   : > { %3760 = vrot.lane.b32.xlu1 %v3681_v60, %s5845_s19  ;;  %2795 = vst.msk [vmem:[#allocation3 + $0x58] sm:$0xf] %vm2772_vm14, %v2727_v15  ;;  %5541 = vmatprep.mubr.msk.bf16.mxu1 %vm5846_vm9, %v5842_v3  ;;  %v2993_v60 = vrot.slane %v2846_v29, 5  ;;  %v2681_v55 = vsel %vm6080_vm1, %v2676_v42, %v2680_v27  ;;  %v3702_v29 = vshll.u32 %v3345_v21, 16  ;;  %v3849_v33 = vld [vmem:[#allocation2 + $0x70] sm:$0xf] }
 0x228   : > { %4046 = vrot.lane.b32.xlu0 %v3962_v44, %s5847_s30  ;;  %v2948_v61 = vsel %vm6434_vm5, %v2946_v37, %v2947_v47  ;;  %v3968_v37 = vrot.slane %v3849_v33, 5 }
 0x229   : > { %v2729_v58 = vpop.permute.xlu1 %2728  ;;  %v2995_v15 = vrot.slane %v2993_v60, 4  ;;  %v2994_v5 = vsel %vm6434_vm5, %v5370_v34, %v2993_v60 }
 0x22a   : > { %2796 = vst.msk [vmem:[#allocation3 + $0x5c] sm:$0xf] %vm2772_vm14, %v2729_v58  ;;  %v3015_v52 = vpop.permute.xlu0 %3014  ;;  %v3344_v58 = vld [vmem:[#allocation2 + $0xc4] sm:$0xf] }
 0x22b   : > { %4048 = vrot.lane.b32.xlu1 %v3965_v59, %s5847_s30  ;;  %3097 = vst.msk [vmem:[#allocation3 + $0x20] sm:$0xf] %vm3088_vm15, %v3015_v52  ;;  %v2996_v59 = vrot.slane %v2847_v38, 5  ;;  %v3692_v8 = vshll.u32 %v3344_v58, 16  ;;  %v3696_v57 = vshrl.u32 %v3344_v58, 16 }
 0x22c   : > { %4074 = vrot.lane.b32.xlu0 %v4011_v7, %s5847_s30  ;;  %v3520_v7 = vrot.slane %v3518_v54, 5  ;;  %v3870_v54 = vld [vmem:[#allocation2 + $0xc4] sm:$0xf] }
 0x22d   : > { %v3017_v12 = vpop.permute.xlu1 %3016  ;;  %v2997_v52 = vsel %vm6434_vm5, %v2995_v15, %v2996_v59  ;;  %v3694_v51 = vrot.slane %v3692_v8, 5  ;;  %v3698_v18 = vrot.slane %v3696_v57, 4  ;;  %v3970_v15 = vrot.slane %v3968_v37, 4 }
 0x22e   : > { %3098 = vst.msk [vmem:[#allocation3 + $0x24] sm:$0xf] %vm3088_vm15, %v3017_v12  ;;  %v3043_v40 = vpop.permute.xlu0 %3042  ;;  %v3324_v12 = vld [vmem:[#allocation2 + $0x74] sm:$0x1] }
 0x22f   : > { %4076 = vrot.lane.b32.xlu1 %v4014_v10, %s5847_s30  ;;  %3111 = vst.msk [vmem:[#allocation3 + $0x58] sm:$0xf] %vm3088_vm15, %v3043_v40  ;;  %v3526_v10 = vrot.slane %v3524_v63, 5  ;;  %v3534_v26 = vshll.u32 %v3324_v12, 16  ;;  %v3699_v28 = vor.u32 %v3698_v18, %v3694_v51  ;;  %v3871_v63 = vld [vmem:[#allocation2 + $0xc8] sm:$0x1] }
 0x230   : > { %2212 = vrot.lane.b32.xlu0 %v2124_v14, %s5840_s10  ;;  %v3521_v14 = vor.u32 %v3520_v7, %v3517_v6  ;;  %v4020_v7 = vrot.slane %v3871_v63, 5 }
 0x231   : > { %v3045_v20 = vpop.permute.xlu1 %3044  ;;  %v3531_v39 = vor.u32 %v3530_v11, %v3526_v10  ;;  %v3536_v27 = vrot.slane %v3534_v26, 5  ;;  %v3700_v62 = vrot.slane %v3699_v28, 4 }
 0x232   : > { %3112 = vst.msk [vmem:[#allocation3 + $0x5c] sm:$0xf] %vm3088_vm15, %v3045_v20  ;;  %v3197_v24 = vpop.permute.xlu0 %3196  ;;  %v3522_v22 = vrot.slane %v3521_v14, 4 }
 0x233   : > { %2214 = vrot.lane.b32.xlu1 %v2125_v50, %s5840_s10  ;;  %3279 = vst.msk [vmem:[#allocation3 + $0x20] sm:$0xf] %vm3270_vm0, %v3197_v24  ;;  %v3135_v50 = vld [vmem:[#allocation2 + $0x70] sm:$0xf]  ;;  %v3689_v24 = vor.u32 %v3688_v17, %v3685_v16  ;;  %v3532_v42 = vrot.slane %v3531_v39, 4  ;;  %s370_s10 = sand.u32 1, %s5780_s21  }
 0x234   : > { %2710 = vrot.lane.b32.xlu0 %v2503_v19, %s5841_s17  ;;  %v3148_v19 = vld [vmem:[#allocation2 + $0xc0] sm:$0xf]  ;;  %s5848_s21 = smov 120  }
 0x235   : > { %v3199_v30 = vpop.permute.xlu1 %3198  ;;  %v3690_v31 = vrot.slane %v3689_v24, 4  ;;  %v3537_v60 = vsel %vm6080_vm1, %v3532_v42, %v3536_v27 }
 0x236   : > { %3280 = vst.msk [vmem:[#allocation3 + $0x24] sm:$0xf] %vm3270_vm0, %v3199_v30  ;;  %v3225_v36 = vpop.permute.xlu0 %3224 }
 0x237   : > { %2712 = vrot.lane.b32.xlu1 %v2513_v41, %s5841_s17  ;;  %3293 = vst.msk [vmem:[#allocation3 + $0x58] sm:$0xf] %vm3270_vm0, %v3225_v36  ;;  %v3149_v41 = vld [vmem:[#allocation2 + $0xc4] sm:$0xf]  ;;  %v3848_v36 = vld [vmem:[#allocation2 + $0x6c] sm:$0xe]  ;;  %v3695_v34 = vsel %vm6080_vm1, %v3690_v31, %v3694_v51 }
 0x238   : > { %2738 = vrot.lane.b32.xlu0 %v2671_v1, %s5841_s17  ;;  %v3527_v1 = vsel %vm6080_vm1, %v3522_v22, %v3526_v10  ;;  %v5378_v45 = vrot.slane %v3848_v36, 9 }
 0x239   : > { %v3227_v44 = vpop.permute.xlu1 %3226 }
 0x23a   : > { %3294 = vst.msk [vmem:[#allocation3 + $0x5c] sm:$0xf] %vm3270_vm0, %v3227_v44  ;;  %v3723_v56 = vpop.permute.xlu0 %3722  ;;  %v3850_v44 = vld [vmem:[#allocation2 + $0x74] sm:$0x1]  ;;  %v3969_v2 = vsel %vm6434_vm5, %v5378_v45, %v3968_v37 }
 0x23b   : > { %2740 = vrot.lane.b32.xlu1 %v2681_v55, %s5841_s17  ;;  %3805 = vst.msk [vmem:[#allocation3 + $0x20] sm:$0xf] %vm3796_vm6, %v3723_v56  ;;  %v3704_v55 = vrot.slane %v3702_v29, 5  ;;  %v3971_v59 = vrot.slane %v3850_v44, 5 }
 0x23c   : > { %3026 = vrot.lane.b32.xlu0 %v2945_v53, %s5843_s20 }
 0x23d   : > { %v3725_v4 = vpop.permute.xlu1 %3724  ;;  %v3705_v56 = vsel %vm6080_vm1, %v3700_v62, %v3704_v55  ;;  %v3972_v58 = vsel %vm6434_vm5, %v3970_v15, %v3971_v59 }
 0x23e   : > { %3806 = vst.msk [vmem:[#allocation3 + $0x24] sm:$0xf] %vm3796_vm6, %v3725_v4  ;;  %v3751_v9 = vpop.permute.xlu0 %3750  ;;  %v5385_v4 = vrot.slane %v3869_v0, 9 }
 0x23f   : > { %3028 = vrot.lane.b32.xlu1 %v2948_v61, %s5843_s20  ;;  %3819 = vst.msk [vmem:[#allocation3 + $0x58] sm:$0xf] %vm3796_vm6, %v3751_v9 }
 0x240   : > { %3054 = vrot.lane.b32.xlu0 %v2994_v5, %s5843_s20  ;;  %v4017_v5 = vrot.slane %v3870_v54, 5 }
 0x241   : > { %v3753_v49 = vpop.permute.xlu1 %3752 }
 0x242   : > { %3820 = vst.msk [vmem:[#allocation3 + $0x5c] sm:$0xf] %vm3796_vm6, %v3753_v49  ;;  %v4039_v40 = vpop.permute.xlu0 %4038  ;;  %v4019_v6 = vrot.slane %v4017_v5, 4  ;;  %v4018_v46 = vsel %vm6434_vm5, %v5385_v4, %v4017_v5 }
 0x243   : > { %3056 = vrot.lane.b32.xlu1 %v2997_v52, %s5843_s20  ;;  %4121 = vst.msk [vmem:[#allocation3 + $0x20] sm:$0xf] %vm4112_vm7, %v4039_v40  ;;  %s7601_s20 = scalar_lea.vmem (%p5930_p5), %s7804_s6, %s5457_s13  }
 0x244   : > { %3208 = vrot.lane.b32.xlu0 %v3134_v13, %s5844_s11  ;;  %v4021_v52 = vsel %vm6434_vm5, %v4019_v6, %v4020_v7  ;;  %v7267_v13 = vld [vmem:[%s7803_s5] ss:$0 sm:$0xff] }
 0x245   : > { %v4041_v20 = vpop.permute.xlu1 %4040 }
 0x246   : > { %4122 = vst.msk [vmem:[#allocation3 + $0x24] sm:$0xf] %vm4112_vm7, %v4041_v20  ;;  %v4067_v25 = vpop.permute.xlu0 %4066 }
 0x247   : > { %3210 = vrot.lane.b32.xlu1 %v3135_v50, %s5844_s11  ;;  %4135 = vst.msk [vmem:[#allocation3 + $0x58] sm:$0xf] %vm4112_vm7, %v4067_v25 }
 0x248   : > { %3236 = vrot.lane.b32.xlu0 %v3148_v19, %s5844_s11 }
 0x249   : > { %v4069_v30 = vpop.permute.xlu1 %4068 }
 0x24a   : > { %4136 = vst.msk [vmem:[#allocation3 + $0x5c] sm:$0xf] %vm4112_vm7, %v4069_v30  ;;  %v2205_v35 = vpop.permute.xlu0 %2204 }
 0x24b   : > { %3238 = vrot.lane.b32.xlu1 %v3149_v41, %s5844_s11  ;;  %2271 = vst.msk [vmem:[#allocation3 + $0x60] sm:$0xf] %vm2246_vm11, %v2205_v35  ;;  %s5563_s11 = smul.u32 480, %s370_s10 }
 0x24c   : > { %3734 = vrot.lane.b32.xlu0 %v3527_v1, %s5845_s19 }
 0x24d   : > { %v2207_v47 = vpop.permute.xlu1 %2206  ;;  %v5706_v38 = vld [vmem:[#allocation3 + $0x20] sm:$0xff]   ;;  %s7276_s14 = scalar_lea.vmem [#allocation4], %s5563_s11  }
 0x24e   : > { %2272 = vst.msk [vmem:[#allocation3 + $0x64] sm:$0xf] %vm2246_vm11, %v2207_v47  ;;  %5514 = vmatmul.mubr.msk.bf16.gmra.mxu0 %vm4275_vm10, %v5706_v38  ;;  %v2703_v53 = vpop.permute.xlu0 %2702 }
 0x24f   : > { %3736 = vrot.lane.b32.xlu1 %v3537_v60, %s5845_s19  ;;  %2783 = vst.msk [vmem:[#allocation3 + $0x28] sm:$0xf] %vm2772_vm14, %v2703_v53  ;;  %5517 = vmatprep.mubr.msk.bf16.mxu0 %vm5846_vm9, %v5842_v3 }
 0x250   : > { %3762 = vrot.lane.b32.xlu0 %v3695_v34, %s5845_s19 }
 0x251   : > { %v2705_v48 = vpop.permute.xlu1 %2704  ;;  %v5707_v61 = vld [vmem:[#allocation3 + $0x58] sm:$0xff]  }
 0x252   : > { %2784 = vst.msk [vmem:[#allocation3 + $0x2c] sm:$0xf] %vm2772_vm14, %v2705_v48  ;;  %5542 = vmatmul.mubr.msk.bf16.gmra.mxu1 %vm4275_vm10, %v5707_v61  ;;  %v2731_v23 = vpop.permute.xlu0 %2730 }
 0x253   : > { %3764 = vrot.lane.b32.xlu1 %v3705_v56, %s5845_s19  ;;  %2797 = vst.msk [vmem:[#allocation3 + $0x60] sm:$0xf] %vm2772_vm14, %v2731_v23  ;;  %5545 = vmatprep.mubr.msk.bf16.mxu1 %vm5846_vm9, %v5842_v3 }
 0x254   : > { %4050 = vrot.lane.b32.xlu0 %v3969_v2, %s5847_s30 }
 0x255   : > { %v2733_v32 = vpop.permute.xlu1 %2732 }
 0x256   : > { %2798 = vst.msk [vmem:[#allocation3 + $0x64] sm:$0xf] %vm2772_vm14, %v2733_v32  ;;  %v3019_v9 = vpop.permute.xlu0 %3018 }
 0x257   : > { %4052 = vrot.lane.b32.xlu1 %v3972_v58, %s5847_s30  ;;  %3099 = vst.msk [vmem:[#allocation3 + $0x28] sm:$0xf] %vm3088_vm15, %v3019_v9 }
 0x258   : > { %4078 = vrot.lane.b32.xlu0 %v4018_v46, %s5847_s30 }
 0x259   : > { %v3021_v10 = vpop.permute.xlu1 %3020 }
 0x25a   : > { %3100 = vst.msk [vmem:[#allocation3 + $0x2c] sm:$0xf] %vm3088_vm15, %v3021_v10  ;;  %v3047_v11 = vpop.permute.xlu0 %3046 }
 0x25b   : > { %4080 = vrot.lane.b32.xlu1 %v4021_v52, %s5847_s30  ;;  %3113 = vst.msk [vmem:[#allocation3 + $0x60] sm:$0xf] %vm3088_vm15, %v3047_v11 }
 0x25d   : > { %v3049_v8 = vpop.permute.xlu1 %3048 }
 0x25e   : > { %3114 = vst.msk [vmem:[#allocation3 + $0x64] sm:$0xf] %vm3088_vm15, %v3049_v8  ;;  %v3201_v57 = vpop.permute.xlu0 %3200 }
 0x25f   : > { %3281 = vst.msk [vmem:[#allocation3 + $0x28] sm:$0xf] %vm3270_vm0, %v3201_v57 }
 0x261   : > { %v3203_v49 = vpop.permute.xlu1 %3202 }
 0x262   : > { %3282 = vst.msk [vmem:[#allocation3 + $0x2c] sm:$0xf] %vm3270_vm0, %v3203_v49  ;;  %v4359_v12 = vpop.f32.mrf.mxu0  ;;  %v3229_v14 = vpop.permute.xlu0 %3228 }
 0x263   : > { %v4360_v16 = vadd.f32 %v7261_v43, %v4359_v12  ;;  %3295 = vst.msk [vmem:[#allocation3 + $0x60] sm:$0xf] %vm3270_vm0, %v3229_v14 }
 0x264   : > { %v5499_v40 = vpop.f32.mrf.mxu0 }
 0x265   : > { %v3231_v17 = vpop.permute.xlu1 %3230  ;;  %vm4478_vm2 = vcmp.ge.f32.partialorder %v4360_v16, 0.0  ;;  %v4515_v50 = vmul.f32 %v7267_v13, %v4360_v16 }
 0x266   : > { %3296 = vst.msk [vmem:[#allocation3 + $0x64] sm:$0xf] %vm3270_vm0, %v3231_v17  ;;  %v4362_v39 = vpop.f32.mrf.mxu0  ;;  %v3727_v26 = vpop.permute.xlu0 %3726 }
 0x267   : > { %v4363_v51 = vadd.f32 %v7261_v43, %v4362_v39  ;;  %3807 = vst.msk [vmem:[#allocation3 + $0x28] sm:$0xf] %vm3796_vm6, %v3727_v26  ;;  %v4545_v18 = vsel %vm4478_vm2, %v4360_v16, %v4515_v50 }
 0x268   : > { %4636 = vrot.lane.b32.xlu0 %v4545_v18, %s5848_s21  ;;  %4576 = vst.msk [vmem:[%s7276_s14] sm:$0xff] %vm4575_vm4, %v4545_v18  ;;  %v5500_v21 = vpop.f32.mrf.mxu0 }
 0x269   : > { %v3729_v20 = vpop.permute.xlu1 %3728  ;;  %vm4479_vm8 = vcmp.ge.f32.partialorder %v4363_v51, 0.0  ;;  %v4516_v19 = vmul.f32 %v7267_v13, %v4363_v51 }
 0x26a   : > { %3808 = vst.msk [vmem:[#allocation3 + $0x2c] sm:$0xf] %vm3796_vm6, %v3729_v20  ;;  %v3755_v22 = vpop.permute.xlu0 %3754 }
 0x26b   : > { %3821 = vst.msk [vmem:[#allocation3 + $0x60] sm:$0xf] %vm3796_vm6, %v3755_v22  ;;  %v4546_v24 = vsel %vm4479_vm8, %v4363_v51, %v4516_v19 }
 0x26c   : > { %4638 = vrot.lane.b32.xlu1 %v4546_v24, %s5848_s21  ;;  %4577 = vst.msk [vmem:[%s7276_s14 + $0x8] sm:$0xff] %vm4575_vm4, %v4546_v24 }
 0x26d   : > { %v3757_v25 = vpop.permute.xlu1 %3756 }
 0x26e   : > { %3822 = vst.msk [vmem:[#allocation3 + $0x64] sm:$0xf] %vm3796_vm6, %v3757_v25  ;;  %v4043_v41 = vpop.permute.xlu0 %4042 }
 0x26f   : > { %4123 = vst.msk [vmem:[#allocation3 + $0x28] sm:$0xf] %vm4112_vm7, %v4043_v41 }
 0x271   : > { %v4045_v42 = vpop.permute.xlu1 %4044 }
 0x272   : > { %4124 = vst.msk [vmem:[#allocation3 + $0x2c] sm:$0xf] %vm4112_vm7, %v4045_v42  ;;  %v4071_v27 = vpop.permute.xlu0 %4070 }
 0x273   : > { %4137 = vst.msk [vmem:[#allocation3 + $0x60] sm:$0xf] %vm4112_vm7, %v4071_v27 }
 0x275   : > { %v4073_v28 = vpop.permute.xlu1 %4072 }
 0x276   : > { %4138 = vst.msk [vmem:[#allocation3 + $0x64] sm:$0xf] %vm4112_vm7, %v4073_v28  ;;  %v2209_v29 = vpop.permute.xlu0 %2208 }
 0x277   : > { %2273 = vst.msk [vmem:[#allocation3 + $0x68] sm:$0xf] %vm2246_vm11, %v2209_v29 }
 0x279   : > { %v2211_v30 = vpop.permute.xlu1 %2210  ;;  %v5708_v33 = vld [vmem:[#allocation3 + $0x28] sm:$0xff]  }
 0x27a   : > { %2274 = vst.msk [vmem:[#allocation3 + $0x6c] sm:$0xf] %vm2246_vm11, %v2211_v30  ;;  %5518 = vmatmul.mubr.msk.bf16.gmra.mxu0 %vm4275_vm10, %v5708_v33  ;;  %v2707_v1 = vpop.permute.xlu0 %2706 }
 0x27b   : > { %2785 = vst.msk [vmem:[#allocation3 + $0x30] sm:$0xf] %vm2772_vm14, %v2707_v1  ;;  %5521 = vmatprep.mubr.msk.bf16.mxu0 %vm5846_vm9, %v5842_v3 }
 0x27d   : > { %v2709_v31 = vpop.permute.xlu1 %2708  ;;  %v5709_v35 = vld [vmem:[#allocation3 + $0x60] sm:$0xff]  }
 0x27e   : > { %2786 = vst.msk [vmem:[#allocation3 + $0x34] sm:$0xf] %vm2772_vm14, %v2709_v31  ;;  %5546 = vmatmul.mubr.msk.bf16.gmra.mxu1 %vm4275_vm10, %v5709_v35  ;;  %v2735_v36 = vpop.permute.xlu0 %2734 }
 0x27f   : > { %2799 = vst.msk [vmem:[#allocation3 + $0x68] sm:$0xf] %vm2772_vm14, %v2735_v36  ;;  %5549 = vmatprep.mubr.msk.bf16.mxu1 %vm5846_vm9, %v5842_v3 }
 0x281   : > { %v2737_v60 = vpop.permute.xlu1 %2736 }
 0x282   : > { %2800 = vst.msk [vmem:[#allocation3 + $0x6c] sm:$0xf] %vm2772_vm14, %v2737_v60  ;;  %v3023_v62 = vpop.permute.xlu0 %3022 }
 0x283   : > { %3101 = vst.msk [vmem:[#allocation3 + $0x30] sm:$0xf] %vm3088_vm15, %v3023_v62 }
 0x285   : > { %v3025_v55 = vpop.permute.xlu1 %3024 }
 0x286   : > { %3102 = vst.msk [vmem:[#allocation3 + $0x34] sm:$0xf] %vm3088_vm15, %v3025_v55  ;;  %v3051_v37 = vpop.permute.xlu0 %3050 }
 0x287   : > { %3115 = vst.msk [vmem:[#allocation3 + $0x68] sm:$0xf] %vm3088_vm15, %v3051_v37 }
 0x289   : > { %v3053_v47 = vpop.permute.xlu1 %3052 }
 0x28a   : > { %3116 = vst.msk [vmem:[#allocation3 + $0x6c] sm:$0xf] %vm3088_vm15, %v3053_v47  ;;  %v4367_v38 = vpop.f32.mrf.mxu0  ;;  %v3205_v44 = vpop.permute.xlu0 %3204 }
 0x28b   : > { %v4368_v34 = vadd.f32 %v7261_v43, %v4367_v38  ;;  %3283 = vst.msk [vmem:[#allocation3 + $0x30] sm:$0xf] %vm3270_vm0, %v3205_v44 }
 0x28c   : > { %v5503_v53 = vpop.f32.mrf.mxu0 }
 0x28d   : > { %v3207_v45 = vpop.permute.xlu1 %3206  ;;  %vm4480_vm12 = vcmp.ge.f32.partialorder %v4368_v34, 0.0  ;;  %v4517_v0 = vmul.f32 %v7267_v13, %v4368_v34 }
 0x28e   : > { %3284 = vst.msk [vmem:[#allocation3 + $0x34] sm:$0xf] %vm3270_vm0, %v3207_v45  ;;  %v4370_v54 = vpop.f32.mrf.mxu0  ;;  %v4423_v56 = vpop.f32.mrf.mxu1 }
 0x28f   : > { %v4371_v15 = vadd.f32 %v7261_v43, %v4370_v54  ;;  %v4424_v59 = vadd.f32 %v7261_v43, %v4423_v56  ;;  %v3233_v48 = vpop.permute.xlu0 %3232  ;;  %v4547_v61 = vsel %vm4480_vm12, %v4368_v34, %v4517_v0 }
 0x290   : > { %3297 = vst.msk [vmem:[#allocation3 + $0x68] sm:$0xf] %vm3270_vm0, %v3233_v48  ;;  %v5531_v2 = vpop.f32.mrf.mxu1  ;;  %4640 = vrot.lane.b32.xlu0 %v4547_v61, %s5848_s21  ;;  %v5504_v23 = vpop.f32.mrf.mxu0 }
 0x291   : > { %v3235_v63 = vpop.permute.xlu1 %3234  ;;  %4578 = vst.msk [vmem:[%s7276_s14 + $0x20] sm:$0xff] %vm4575_vm4, %v4547_v61  ;;  %vm4481_vm13 = vcmp.ge.f32.partialorder %v4371_v15, 0.0  ;;  %v4518_v4 = vmul.f32 %v7267_v13, %v4371_v15  ;;  %vm4494_vm1 = vcmp.ge.f32.partialorder %v4424_v59, 0.0  ;;  %v4531_v5 = vmul.f32 %v7267_v13, %v4424_v59 }
 0x292   : > { %3298 = vst.msk [vmem:[#allocation3 + $0x6c] sm:$0xf] %vm3270_vm0, %v3235_v63  ;;  %v4426_v58 = vpop.f32.mrf.mxu1 }
 0x293   : > { %v4427_v6 = vadd.f32 %v7261_v43, %v4426_v58  ;;  %v3731_v7 = vpop.permute.xlu0 %3730  ;;  %v4548_v32 = vsel %vm4481_vm13, %v4371_v15, %v4518_v4  ;;  %v7321_v46 = vsel %vm4494_vm1, %v4424_v59, %v4531_v5 }
 0x294   : > { %3809 = vst.msk [vmem:[#allocation3 + $0x30] sm:$0xf] %vm3796_vm6, %v3731_v7  ;;  %v5532_v52 = vpop.f32.mrf.mxu1  ;;  %4642 = vrot.lane.b32.xlu1 %v4548_v32, %s5848_s21 }
 0x295   : > { %v3733_v9 = vpop.permute.xlu1 %3732  ;;  %4579 = vst.msk [vmem:[%s7276_s14 + $0x28] sm:$0xff] %vm4575_vm4, %v4548_v32  ;;  %4592 = vst.msk [vmem:[%s7276_s14 + $0x100] sm:$0xff] %vm4575_vm4, %v7321_v46  ;;  %vm4495_vm5 = vcmp.ge.f32.partialorder %v4427_v6, 0.0  ;;  %v4532_v10 = vmul.f32 %v7267_v13, %v4427_v6 }
 0x296   : > { %3810 = vst.msk [vmem:[#allocation3 + $0x34] sm:$0xf] %vm3796_vm6, %v3733_v9 }
 0x297   : > { %v3759_v11 = vpop.permute.xlu0 %3758  ;;  %v7332_v8 = vsel %vm4495_vm5, %v4427_v6, %v4532_v10 }
 0x298   : > { %3823 = vst.msk [vmem:[#allocation3 + $0x68] sm:$0xf] %vm3796_vm6, %v3759_v11 }
 0x299   : > { %v3761_v57 = vpop.permute.xlu1 %3760  ;;  %4593 = vst.msk [vmem:[%s7276_s14 + $0x108] sm:$0xff] %vm4575_vm4, %v7332_v8 }
 0x29a   : > { %3824 = vst.msk [vmem:[#allocation3 + $0x6c] sm:$0xf] %vm3796_vm6, %v3761_v57 }
 0x29b   : > { %v4047_v49 = vpop.permute.xlu0 %4046 }
 0x29c   : > { %4125 = vst.msk [vmem:[#allocation3 + $0x30] sm:$0xf] %vm4112_vm7, %v4047_v49 }
 0x29d   : > { %v4049_v12 = vpop.permute.xlu1 %4048 }
 0x29e   : > { %4126 = vst.msk [vmem:[#allocation3 + $0x34] sm:$0xf] %vm4112_vm7, %v4049_v12 }
 0x29f   : > { %v4075_v14 = vpop.permute.xlu0 %4074 }
 0x2a0   : > { %4139 = vst.msk [vmem:[#allocation3 + $0x68] sm:$0xf] %vm4112_vm7, %v4075_v14 }
 0x2a1   : > { %v4077_v16 = vpop.permute.xlu1 %4076 }
 0x2a2   : > { %4140 = vst.msk [vmem:[#allocation3 + $0x6c] sm:$0xf] %vm4112_vm7, %v4077_v16 }
 0x2a3   : > { %v2213_v17 = vpop.permute.xlu0 %2212 }
 0x2a4   : > { %2275 = vst.msk [vmem:[#allocation3 + $0x70] sm:$0xf] %vm2246_vm11, %v2213_v17 }
 0x2a5   : > { %v2215_v40 = vpop.permute.xlu1 %2214  ;;  %v5710_v50 = vld [vmem:[#allocation3 + $0x30] sm:$0xff]  }
 0x2a6   : > { %2276 = vst.msk [vmem:[#allocation3 + $0x74] sm:$0xf] %vm2246_vm11, %v2215_v40  ;;  %5522 = vmatmul.mubr.msk.bf16.gmra.mxu0 %vm4275_vm10, %v5710_v50 }
 0x2a7   : > { %v2711_v39 = vpop.permute.xlu0 %2710  ;;  %5525 = vmatprep.mubr.msk.bf16.mxu0 %vm5846_vm9, %v5842_v3 }
 0x2a8   : > { %2787 = vst.msk [vmem:[#allocation3 + $0x38] sm:$0xf] %vm2772_vm14, %v2711_v39 }
 0x2a9   : > { %v2713_v26 = vpop.permute.xlu1 %2712  ;;  %v5711_v51 = vld [vmem:[#allocation3 + $0x68] sm:$0xff]  }
 0x2aa   : > { %2788 = vst.msk [vmem:[#allocation3 + $0x3c] sm:$0xf] %vm2772_vm14, %v2713_v26  ;;  %5550 = vmatmul.mubr.msk.bf16.gmra.mxu1 %vm4275_vm10, %v5711_v51 }
 0x2ab   : > { %v2739_v18 = vpop.permute.xlu0 %2738  ;;  %5553 = vmatprep.mubr.msk.bf16.mxu1 %vm5846_vm9, %v5842_v3 }
 0x2ac   : > { %2801 = vst.msk [vmem:[#allocation3 + $0x70] sm:$0xf] %vm2772_vm14, %v2739_v18 }
 0x2ad   : > { %v2741_v20 = vpop.permute.xlu1 %2740 }
 0x2ae   : > { %2802 = vst.msk [vmem:[#allocation3 + $0x74] sm:$0xf] %vm2772_vm14, %v2741_v20 }
 0x2af   : > { %v3027_v21 = vpop.permute.xlu0 %3026 }
 0x2b0   : > { %3103 = vst.msk [vmem:[#allocation3 + $0x38] sm:$0xf] %vm3088_vm15, %v3027_v21 }
 0x2b1   : > { %v3029_v19 = vpop.permute.xlu1 %3028 }
 0x2b2   : > { %3104 = vst.msk [vmem:[#allocation3 + $0x3c] sm:$0xf] %vm3088_vm15, %v3029_v19 }
 0x2b3   : > { %v3055_v22 = vpop.permute.xlu0 %3054 }
 0x2b4   : > { %3117 = vst.msk [vmem:[#allocation3 + $0x70] sm:$0xf] %vm3088_vm15, %v3055_v22 }
 0x2b5   : > { %v3057_v24 = vpop.permute.xlu1 %3056 }
 0x2b6   : > { %3118 = vst.msk [vmem:[#allocation3 + $0x74] sm:$0xf] %vm3088_vm15, %v3057_v24  ;;  %v4375_v25 = vpop.f32.mrf.mxu0 }
 0x2b7   : > { %v4376_v3 = vadd.f32 %v7261_v43, %v4375_v25  ;;  %v3209_v41 = vpop.permute.xlu0 %3208 }
 0x2b8   : > { %3285 = vst.msk [vmem:[#allocation3 + $0x38] sm:$0xf] %vm3270_vm0, %v3209_v41  ;;  %v5507_v27 = vpop.f32.mrf.mxu0 }
 0x2b9   : > { %v3211_v42 = vpop.permute.xlu1 %3210  ;;  %vm4482_vm9 = vcmp.ge.f32.partialorder %v4376_v3, 0.0  ;;  %v4519_v28 = vmul.f32 %v7267_v13, %v4376_v3 }
 0x2ba   : > { %3286 = vst.msk [vmem:[#allocation3 + $0x3c] sm:$0xf] %vm3270_vm0, %v3211_v42  ;;  %v4378_v29 = vpop.f32.mrf.mxu0  ;;  %v4431_v30 = vpop.f32.mrf.mxu1 }
 0x2bb   : > { %v4379_v33 = vadd.f32 %v7261_v43, %v4378_v29  ;;  %v4432_v1 = vadd.f32 %v7261_v43, %v4431_v30  ;;  %v3237_v31 = vpop.permute.xlu0 %3236  ;;  %v4549_v35 = vsel %vm4482_vm9, %v4376_v3, %v4519_v28 }
 0x2bc   : > { %3299 = vst.msk [vmem:[#allocation3 + $0x70] sm:$0xf] %vm3270_vm0, %v3237_v31  ;;  %v5535_v60 = vpop.f32.mrf.mxu1  ;;  %4644 = vrot.lane.b32.xlu0 %v4549_v35, %s5848_s21  ;;  %v5508_v37 = vpop.f32.mrf.mxu0 }
 0x2bd   : > { %v3239_v36 = vpop.permute.xlu1 %3238  ;;  %4580 = vst.msk [vmem:[%s7276_s14 + $0x40] sm:$0xff] %vm4575_vm4, %v4549_v35  ;;  %vm4483_vm11 = vcmp.ge.f32.partialorder %v4379_v33, 0.0  ;;  %v4520_v62 = vmul.f32 %v7267_v13, %v4379_v33  ;;  %vm4496_vm14 = vcmp.ge.f32.partialorder %v4432_v1, 0.0  ;;  %v4533_v55 = vmul.f32 %v7267_v13, %v4432_v1 }
 0x2be   : > { %3300 = vst.msk [vmem:[#allocation3 + $0x74] sm:$0xf] %vm3270_vm0, %v3239_v36  ;;  %v4434_v47 = vpop.f32.mrf.mxu1 }
 0x2bf   : > { %v4435_v38 = vadd.f32 %v7261_v43, %v4434_v47  ;;  %v3735_v44 = vpop.permute.xlu0 %3734  ;;  %v4550_v34 = vsel %vm4483_vm11, %v4379_v33, %v4520_v62  ;;  %v7373_v45 = vsel %vm4496_vm14, %v4432_v1, %v4533_v55 }
 0x2c0   : > { %3811 = vst.msk [vmem:[#allocation3 + $0x38] sm:$0xf] %vm3796_vm6, %v3735_v44  ;;  %v5536_v0 = vpop.f32.mrf.mxu1  ;;  %4646 = vrot.lane.b32.xlu1 %v4550_v34, %s5848_s21 }
 0x2c1   : > { %v3737_v53 = vpop.permute.xlu1 %3736  ;;  %4581 = vst.msk [vmem:[%s7276_s14 + $0x48] sm:$0xff] %vm4575_vm4, %v4550_v34  ;;  %4594 = vst.msk [vmem:[%s7276_s14 + $0x120] sm:$0xff] %vm4575_vm4, %v7373_v45  ;;  %vm4497_vm15 = vcmp.ge.f32.partialorder %v4435_v38, 0.0  ;;  %v4534_v54 = vmul.f32 %v7267_v13, %v4435_v38 }
 0x2c2   : > { %3812 = vst.msk [vmem:[#allocation3 + $0x3c] sm:$0xf] %vm3796_vm6, %v3737_v53 }
 0x2c3   : > { %v3763_v56 = vpop.permute.xlu0 %3762  ;;  %v7384_v15 = vsel %vm4497_vm15, %v4435_v38, %v4534_v54 }
 0x2c4   : > { %3825 = vst.msk [vmem:[#allocation3 + $0x70] sm:$0xf] %vm3796_vm6, %v3763_v56 }
 0x2c5   : > { %v3765_v59 = vpop.permute.xlu1 %3764  ;;  %4595 = vst.msk [vmem:[%s7276_s14 + $0x128] sm:$0xff] %vm4575_vm4, %v7384_v15 }
 0x2c6   : > { %3826 = vst.msk [vmem:[#allocation3 + $0x74] sm:$0xf] %vm3796_vm6, %v3765_v59 }
 0x2c7   : > { %v4051_v48 = vpop.permute.xlu0 %4050 }
 0x2c8   : > { %4127 = vst.msk [vmem:[#allocation3 + $0x38] sm:$0xf] %vm4112_vm7, %v4051_v48 }
 0x2c9   : > { %v4053_v61 = vpop.permute.xlu1 %4052 }
 0x2ca   : > { %4128 = vst.msk [vmem:[#allocation3 + $0x3c] sm:$0xf] %vm4112_vm7, %v4053_v61 }
 0x2cb   : > { %v4079_v63 = vpop.permute.xlu0 %4078 }
 0x2cc   : > { %4141 = vst.msk [vmem:[#allocation3 + $0x70] sm:$0xf] %vm4112_vm7, %v4079_v63 }
 0x2cd   : > { %v4081_v2 = vpop.permute.xlu1 %4080 }
 0x2ce   : > { %4142 = vst.msk [vmem:[#allocation3 + $0x74] sm:$0xf] %vm4112_vm7, %v4081_v2 }
 0x2d1   : > { %v5712_v4 = vld [vmem:[#allocation3 + $0x38] sm:$0xff]  }
 0x2d2   : > { %5526 = vmatmul.mubr.msk.bf16.gmra.mxu0 %vm4275_vm10, %v5712_v4 }
 0x2d5   : > { %v5713_v5 = vld [vmem:[#allocation3 + $0x70] sm:$0xff]  }
 0x2d6   : > { %5554 = vmatmul.mubr.msk.bf16.gmra.mxu1 %vm4275_vm10, %v5713_v5 }
 0x2da   : > { %v4637_v23 = vpop.permute.xlu0 %4636 }
 0x2db   : > { %5421 = vst.msk [vmem:[%s7276_s14 + $0x10] sm:$0xff] %vm4575_vm4, %v4637_v23 }
 0x2de   : > { %v4639_v58 = vpop.permute.xlu1 %4638 }
 0x2df   : > { %5422 = vst.msk [vmem:[%s7276_s14 + $0x18] sm:$0xff] %vm4575_vm4, %v4639_v58 }
 0x2e2   : > { %v4383_v6 = vpop.f32.mrf.mxu0 }
 0x2e3   : > { %v4384_v7 = vadd.f32 %v7261_v43, %v4383_v6 }
 0x2e4   : > { %v5511_v32 = vpop.f32.mrf.mxu0 }
 0x2e5   : > { %vm4484_vm0 = vcmp.ge.f32.partialorder %v4384_v7, 0.0  ;;  %v4521_v9 = vmul.f32 %v7267_v13, %v4384_v7 }
 0x2e6   : > { %v4386_v52 = vpop.f32.mrf.mxu0  ;;  %v4439_v10 = vpop.f32.mrf.mxu1 }
 0x2e7   : > { %v4387_v11 = vadd.f32 %v7261_v43, %v4386_v52  ;;  %v4440_v57 = vadd.f32 %v7261_v43, %v4439_v10  ;;  %v4551_v49 = vsel %vm4484_vm0, %v4384_v7, %v4521_v9 }
 0x2e8   : > { %v5539_v12 = vpop.f32.mrf.mxu1  ;;  %4648 = vrot.lane.b32.xlu0 %v4551_v49, %s5848_s21  ;;  %4582 = vst.msk [vmem:[%s7276_s14 + $0x60] sm:$0xff] %vm4575_vm4, %v4551_v49  ;;  %v5512_v14 = vpop.f32.mrf.mxu0 }
 0x2e9   : > { %vm4485_vm6 = vcmp.ge.f32.partialorder %v4387_v11, 0.0  ;;  %v4522_v16 = vmul.f32 %v7267_v13, %v4387_v11  ;;  %vm4498_vm7 = vcmp.ge.f32.partialorder %v4440_v57, 0.0  ;;  %v4535_v17 = vmul.f32 %v7267_v13, %v4440_v57 }
 0x2ea   : > { %v4442_v40 = vpop.f32.mrf.mxu1 }
 0x2eb   : > { %v4443_v50 = vadd.f32 %v7261_v43, %v4442_v40  ;;  %v4552_v39 = vsel %vm4485_vm6, %v4387_v11, %v4522_v16  ;;  %v7411_v26 = vsel %vm4498_vm7, %v4440_v57, %v4535_v17 }
 0x2ec   : > { %v5540_v51 = vpop.f32.mrf.mxu1  ;;  %4650 = vrot.lane.b32.xlu1 %v4552_v39, %s5848_s21  ;;  %4583 = vst.msk [vmem:[%s7276_s14 + $0x68] sm:$0xff] %vm4575_vm4, %v4552_v39  ;;  %4596 = vst.msk [vmem:[%s7276_s14 + $0x140] sm:$0xff] %vm4575_vm4, %v7411_v26 }
 0x2ed   : > { %vm4499_vm10 = vcmp.ge.f32.partialorder %v4443_v50, 0.0  ;;  %v4536_v18 = vmul.f32 %v7267_v13, %v4443_v50 }
 0x2ef   : > { %v7420_v20 = vsel %vm4499_vm10, %v4443_v50, %v4536_v18 }
 0x2f0   : > { %4597 = vst.msk [vmem:[%s7276_s14 + $0x148] sm:$0xff] %vm4575_vm4, %v7420_v20 }
 0x302   : > { %v4641_v21 = vpop.permute.xlu0 %4640 }
 0x303   : > { %5423 = vst.msk [vmem:[%s7276_s14 + $0x30] sm:$0xff] %vm4575_vm4, %v4641_v21 }
 0x306   : > { %v4643_v19 = vpop.permute.xlu1 %4642 }
 0x307   : > { %5424 = vst.msk [vmem:[%s7276_s14 + $0x38] sm:$0xff] %vm4575_vm4, %v4643_v19 }
 0x30e   : > { %v4391_v22 = vpop.f32.mrf.mxu0 }
 0x30f   : > { %v4392_v24 = vadd.f32 %v7261_v43, %v4391_v22 }
 0x310   : > { %v5515_v25 = vpop.f32.mrf.mxu0 }
 0x311   : > { %vm4486_vm3 = vcmp.ge.f32.partialorder %v4392_v24, 0.0  ;;  %v4523_v3 = vmul.f32 %v7267_v13, %v4392_v24 }
 0x312   : > { %v4394_v41 = vpop.f32.mrf.mxu0  ;;  %v4447_v42 = vpop.f32.mrf.mxu1 }
 0x313   : > { %v4395_v27 = vadd.f32 %v7261_v43, %v4394_v41  ;;  %v4448_v28 = vadd.f32 %v7261_v43, %v4447_v42  ;;  %v4553_v29 = vsel %vm4486_vm3, %v4392_v24, %v4523_v3 }
 0x314   : > { %v5543_v30 = vpop.f32.mrf.mxu1  ;;  %4652 = vrot.lane.b32.xlu0 %v4553_v29, %s5848_s21  ;;  %4584 = vst.msk [vmem:[%s7276_s14 + $0x80] sm:$0xff] %vm4575_vm4, %v4553_v29  ;;  %v5516_v33 = vpop.f32.mrf.mxu0 }
 0x315   : > { %vm4487_vm2 = vcmp.ge.f32.partialorder %v4395_v27, 0.0  ;;  %v4524_v1 = vmul.f32 %v7267_v13, %v4395_v27  ;;  %vm4500_vm8 = vcmp.ge.f32.partialorder %v4448_v28, 0.0  ;;  %v4537_v31 = vmul.f32 %v7267_v13, %v4448_v28 }
 0x316   : > { %v4450_v35 = vpop.f32.mrf.mxu1 }
 0x317   : > { %v4451_v36 = vadd.f32 %v7261_v43, %v4450_v35  ;;  %v4554_v60 = vsel %vm4487_vm2, %v4395_v27, %v4524_v1  ;;  %v7439_v62 = vsel %vm4500_vm8, %v4448_v28, %v4537_v31 }
 0x318   : > { %v5544_v55 = vpop.f32.mrf.mxu1  ;;  %4654 = vrot.lane.b32.xlu1 %v4554_v60, %s5848_s21  ;;  %4585 = vst.msk [vmem:[%s7276_s14 + $0x88] sm:$0xff] %vm4575_vm4, %v4554_v60  ;;  %4598 = vst.msk [vmem:[%s7276_s14 + $0x160] sm:$0xff] %vm4575_vm4, %v7439_v62 }
 0x319   : > { %vm4501_vm12 = vcmp.ge.f32.partialorder %v4451_v36, 0.0  ;;  %v4538_v37 = vmul.f32 %v7267_v13, %v4451_v36 }
 0x31b   : > { %v7448_v47 = vsel %vm4501_vm12, %v4451_v36, %v4538_v37 }
 0x31c   : > { %4599 = vst.msk [vmem:[%s7276_s14 + $0x168] sm:$0xff] %vm4575_vm4, %v7448_v47 }
 0x32e   : > { %v4645_v38 = vpop.permute.xlu0 %4644 }
 0x32f   : > { %5425 = vst.msk [vmem:[%s7276_s14 + $0x50] sm:$0xff] %vm4575_vm4, %v4645_v38 }
 0x332   : > { %v4647_v44 = vpop.permute.xlu1 %4646 }
 0x333   : > { %5426 = vst.msk [vmem:[%s7276_s14 + $0x58] sm:$0xff] %vm4575_vm4, %v4647_v44 }
 0x33a   : > { %v4399_v34 = vpop.f32.mrf.mxu0 }
 0x33b   : > { %v4400_v53 = vadd.f32 %v7261_v43, %v4399_v34 }
 0x33c   : > { %v5519_v0 = vpop.f32.mrf.mxu0 }
 0x33d   : > { %vm4488_vm13 = vcmp.ge.f32.partialorder %v4400_v53, 0.0  ;;  %v4525_v54 = vmul.f32 %v7267_v13, %v4400_v53 }
 0x33e   : > { %v4402_v56 = vpop.f32.mrf.mxu0  ;;  %v4455_v59 = vpop.f32.mrf.mxu1 }
 0x33f   : > { %v4403_v48 = vadd.f32 %v7261_v43, %v4402_v56  ;;  %v4456_v61 = vadd.f32 %v7261_v43, %v4455_v59  ;;  %v4555_v63 = vsel %vm4488_vm13, %v4400_v53, %v4525_v54 }
 0x340   : > { %v5547_v2 = vpop.f32.mrf.mxu1  ;;  %4656 = vrot.lane.b32.xlu0 %v4555_v63, %s5848_s21  ;;  %4586 = vst.msk [vmem:[%s7276_s14 + $0xa0] sm:$0xff] %vm4575_vm4, %v4555_v63  ;;  %v5520_v4 = vpop.f32.mrf.mxu0 }
 0x341   : > { %vm4489_vm1 = vcmp.ge.f32.partialorder %v4403_v48, 0.0  ;;  %v4526_v5 = vmul.f32 %v7267_v13, %v4403_v48  ;;  %vm4502_vm5 = vcmp.ge.f32.partialorder %v4456_v61, 0.0  ;;  %v4539_v23 = vmul.f32 %v7267_v13, %v4456_v61 }
 0x342   : > { %v4458_v58 = vpop.f32.mrf.mxu1 }
 0x343   : > { %v4459_v6 = vadd.f32 %v7261_v43, %v4458_v58  ;;  %v4556_v7 = vsel %vm4489_vm1, %v4403_v48, %v4526_v5  ;;  %v7467_v32 = vsel %vm4502_vm5, %v4456_v61, %v4539_v23 }
 0x344   : > { %v5548_v9 = vpop.f32.mrf.mxu1  ;;  %4658 = vrot.lane.b32.xlu1 %v4556_v7, %s5848_s21  ;;  %4587 = vst.msk [vmem:[%s7276_s14 + $0xa8] sm:$0xff] %vm4575_vm4, %v4556_v7  ;;  %4600 = vst.msk [vmem:[%s7276_s14 + $0x180] sm:$0xff] %vm4575_vm4, %v7467_v32 }
 0x345   : > { %vm4503_vm9 = vcmp.ge.f32.partialorder %v4459_v6, 0.0  ;;  %v4540_v52 = vmul.f32 %v7267_v13, %v4459_v6 }
 0x347   : > { %v7476_v10 = vsel %vm4503_vm9, %v4459_v6, %v4540_v52 }
 0x348   : > { %4601 = vst.msk [vmem:[%s7276_s14 + $0x188] sm:$0xff] %vm4575_vm4, %v7476_v10 }
 0x35a   : > { %v4649_v11 = vpop.permute.xlu0 %4648 }
 0x35b   : > { %5427 = vst.msk [vmem:[%s7276_s14 + $0x70] sm:$0xff] %vm4575_vm4, %v4649_v11 }
 0x35e   : > { %v4651_v57 = vpop.permute.xlu1 %4650 }
 0x35f   : > { %5428 = vst.msk [vmem:[%s7276_s14 + $0x78] sm:$0xff] %vm4575_vm4, %v4651_v57 }
 0x366   : > { %v4407_v49 = vpop.f32.mrf.mxu0 }
 0x367   : > { %v4408_v12 = vadd.f32 %v7261_v43, %v4407_v49 }
 0x368   : > { %v5523_v14 = vpop.f32.mrf.mxu0 }
 0x369   : > { %vm4490_vm11 = vcmp.ge.f32.partialorder %v4408_v12, 0.0  ;;  %v4527_v16 = vmul.f32 %v7267_v13, %v4408_v12 }
 0x36a   : > { %v4410_v17 = vpop.f32.mrf.mxu0  ;;  %v4463_v40 = vpop.f32.mrf.mxu1 }
 0x36b   : > { %v4411_v50 = vadd.f32 %v7261_v43, %v4410_v17  ;;  %v4464_v39 = vadd.f32 %v7261_v43, %v4463_v40  ;;  %v4557_v51 = vsel %vm4490_vm11, %v4408_v12, %v4527_v16 }
 0x36c   : > { %v5551_v18 = vpop.f32.mrf.mxu1  ;;  %4660 = vrot.lane.b32.xlu0 %v4557_v51, %s5848_s21  ;;  %4588 = vst.msk [vmem:[%s7276_s14 + $0xc0] sm:$0xff] %vm4575_vm4, %v4557_v51  ;;  %v5524_v21 = vpop.f32.mrf.mxu0 }
 0x36d   : > { %vm4491_vm14 = vcmp.ge.f32.partialorder %v4411_v50, 0.0  ;;  %v4528_v19 = vmul.f32 %v7267_v13, %v4411_v50  ;;  %vm4504_vm15 = vcmp.ge.f32.partialorder %v4464_v39, 0.0  ;;  %v4541_v22 = vmul.f32 %v7267_v13, %v4464_v39 }
 0x36e   : > { %v4466_v24 = vpop.f32.mrf.mxu1 }
 0x36f   : > { %v4467_v25 = vadd.f32 %v7261_v43, %v4466_v24  ;;  %v4558_v3 = vsel %vm4491_vm14, %v4411_v50, %v4528_v19  ;;  %v4571_v41 = vsel %vm4504_vm15, %v4464_v39, %v4541_v22 }
 0x370   : > { %v5552_v42 = vpop.f32.mrf.mxu1  ;;  %4662 = vrot.lane.b32.xlu1 %v4558_v3, %s5848_s21  ;;  %4589 = vst.msk [vmem:[%s7276_s14 + $0xc8] sm:$0xff] %vm4575_vm4, %v4558_v3  ;;  %4602 = vst.msk [vmem:[%s7276_s14 + $0x1a0] sm:$0xff] %vm4575_vm4, %v4571_v41 }
 0x371   : > { %vm4505_vm0 = vcmp.ge.f32.partialorder %v4467_v25, 0.0  ;;  %v4542_v27 = vmul.f32 %v7267_v13, %v4467_v25 }
 0x373   : > { %v4572_v28 = vsel %vm4505_vm0, %v4467_v25, %v4542_v27 }
 0x374   : > { %4603 = vst.msk [vmem:[%s7276_s14 + $0x1a8] sm:$0xff] %vm4575_vm4, %v4572_v28 }
 0x386   : > { %v4653_v29 = vpop.permute.xlu0 %4652 }
 0x387   : > { %5429 = vst.msk [vmem:[%s7276_s14 + $0x90] sm:$0xff] %vm4575_vm4, %v4653_v29 }
 0x38a   : > { %v4655_v30 = vpop.permute.xlu1 %4654 }
 0x38b   : > { %5430 = vst.msk [vmem:[%s7276_s14 + $0x98] sm:$0xff] %vm4575_vm4, %v4655_v30 }
 0x392   : > { %v4415_v33 = vpop.f32.mrf.mxu0 }
 0x393   : > { %v4416_v1 = vadd.f32 %v7261_v43, %v4415_v33 }
 0x394   : > { %v5527_v31 = vpop.f32.mrf.mxu0 }
 0x395   : > { %vm4492_vm6 = vcmp.ge.f32.partialorder %v4416_v1, 0.0  ;;  %v4529_v35 = vmul.f32 %v7267_v13, %v4416_v1 }
 0x396   : > { %v4418_v36 = vpop.f32.mrf.mxu0  ;;  %v4471_v60 = vpop.f32.mrf.mxu1 }
 0x397   : > { %v4419_v55 = vadd.f32 %v7261_v43, %v4418_v36  ;;  %v4559_v37 = vsel %vm4492_vm6, %v4416_v1, %v4529_v35  ;;  %v4472_v38 = vadd.f32 %v7261_v43, %v4471_v60 }
 0x398   : > { %4664 = vrot.lane.b32.xlu0 %v4559_v37, %s5848_s21  ;;  %4590 = vst.msk [vmem:[%s7276_s14 + $0xe0] sm:$0xff] %vm4575_vm4, %v4559_v37  ;;  %v5528_v44 = vpop.f32.mrf.mxu0  ;;  %v5555_v34 = vpop.f32.mrf.mxu1 }
 0x399   : > { %vm4493_vm7 = vcmp.ge.f32.partialorder %v4419_v55, 0.0  ;;  %v4530_v53 = vmul.f32 %v7267_v13, %v4419_v55  ;;  %vm4506_vm10 = vcmp.ge.f32.partialorder %v4472_v38, 0.0  ;;  %v4543_v0 = vmul.f32 %v7267_v13, %v4472_v38 }
 0x39a   : > { %v4474_v54 = vpop.f32.mrf.mxu1 }
 0x39b   : > { %v4560_v56 = vsel %vm4493_vm7, %v4419_v55, %v4530_v53  ;;  %v4475_v59 = vadd.f32 %v7261_v43, %v4474_v54  ;;  %v4573_v48 = vsel %vm4506_vm10, %v4472_v38, %v4543_v0 }
 0x39c   : > { %4668 = vrot.lane.b32.xlu0 %v7321_v46, %s5848_s21  ;;  %4666 = vrot.lane.b32.xlu1 %v4560_v56, %s5848_s21  ;;  %4591 = vst.msk [vmem:[%s7276_s14 + $0xe8] sm:$0xff] %vm4575_vm4, %v4560_v56  ;;  %v5556_v61 = vpop.f32.mrf.mxu1  ;;  %4604 = vst.msk [vmem:[%s7276_s14 + $0x1c0] sm:$0xff] %vm4575_vm4, %v4573_v48 }
 0x39d   : > { %vm4507_vm3 = vcmp.ge.f32.partialorder %v4475_v59, 0.0  ;;  %v4544_v63 = vmul.f32 %v7267_v13, %v4475_v59 }
 0x39f   : > { %v4574_v2 = vsel %vm4507_vm3, %v4475_v59, %v4544_v63 }
 0x3a0   : > { %4672 = vrot.lane.b32.xlu0 %v7373_v45, %s5848_s21  ;;  %4670 = vrot.lane.b32.xlu1 %v7332_v8, %s5848_s21  ;;  %4605 = vst.msk [vmem:[%s7276_s14 + $0x1c8] sm:$0xff] %vm4575_vm4, %v4574_v2 }
 0x3a4   : > { %4676 = vrot.lane.b32.xlu0 %v7411_v26, %s5848_s21  ;;  %4674 = vrot.lane.b32.xlu1 %v7384_v15, %s5848_s21 }
 0x3a8   : > { %4680 = vrot.lane.b32.xlu0 %v7439_v62, %s5848_s21  ;;  %4678 = vrot.lane.b32.xlu1 %v7420_v20, %s5848_s21 }
 0x3ac   : > { %4684 = vrot.lane.b32.xlu0 %v7467_v32, %s5848_s21  ;;  %4682 = vrot.lane.b32.xlu1 %v7448_v47, %s5848_s21 }
 0x3b0   : > { %4688 = vrot.lane.b32.xlu0 %v4571_v41, %s5848_s21  ;;  %4686 = vrot.lane.b32.xlu1 %v7476_v10, %s5848_s21 }
 0x3b2   : > { %v4657_v43 = vpop.permute.xlu0 %4656 }
 0x3b3   : > { %5431 = vst.msk [vmem:[%s7276_s14 + $0xb0] sm:$0xff] %vm4575_vm4, %v4657_v43 }
 0x3b4   : > { %4692 = vrot.lane.b32.xlu0 %v4573_v48, %s5848_s21  ;;  %4690 = vrot.lane.b32.xlu1 %v4572_v28, %s5848_s21 }
 0x3b6   : > { %v4659_v13 = vpop.permute.xlu1 %4658 }
 0x3b7   : > { %5432 = vst.msk [vmem:[%s7276_s14 + $0xb8] sm:$0xff] %vm4575_vm4, %v4659_v13 }
 0x3b8   : > { %4694 = vrot.lane.b32.xlu1 %v4574_v2, %s5848_s21 }
 0x3de   : > { %v4661_v46 = vpop.permute.xlu0 %4660 }
 0x3df   : > { %5433 = vst.msk [vmem:[%s7276_s14 + $0xd0] sm:$0xff] %vm4575_vm4, %v4661_v46 }
 0x3e2   : > { %v4663_v8 = vpop.permute.xlu1 %4662 }
 0x3e3   : > { %5434 = vst.msk [vmem:[%s7276_s14 + $0xd8] sm:$0xff] %vm4575_vm4, %v4663_v8 }
 0x40a   : > { %v4665_v45 = vpop.permute.xlu0 %4664 }
 0x40b   : > { %5435 = vst.msk [vmem:[%s7276_s14 + $0xf0] sm:$0xff] %vm4575_vm4, %v4665_v45 }
 0x40e   : > { %v4669_v15 = vpop.permute.xlu0 %4668  ;;  %v4667_v26 = vpop.permute.xlu1 %4666 }
 0x40f   : > { %5437 = vst.msk [vmem:[%s7276_s14 + $0x110] sm:$0xff] %vm4575_vm4, %v4669_v15  ;;  %5436 = vst.msk [vmem:[%s7276_s14 + $0xf8] sm:$0xff] %vm4575_vm4, %v4667_v26 }
 0x412   : > { %v4673_v20 = vpop.permute.xlu0 %4672  ;;  %v4671_v62 = vpop.permute.xlu1 %4670 }
 0x413   : > { %5439 = vst.msk [vmem:[%s7276_s14 + $0x130] sm:$0xff] %vm4575_vm4, %v4673_v20  ;;  %5438 = vst.msk [vmem:[%s7276_s14 + $0x118] sm:$0xff] %vm4575_vm4, %v4671_v62 }
 0x416   : > { %v4677_v47 = vpop.permute.xlu0 %4676  ;;  %v4675_v4 = vpop.permute.xlu1 %4674 }
 0x417   : > { %5441 = vst.msk [vmem:[%s7276_s14 + $0x150] sm:$0xff] %vm4575_vm4, %v4677_v47  ;;  %5440 = vst.msk [vmem:[%s7276_s14 + $0x138] sm:$0xff] %vm4575_vm4, %v4675_v4 }
 0x41a   : > { %v4681_v5 = vpop.permute.xlu0 %4680  ;;  %v4679_v23 = vpop.permute.xlu1 %4678 }
 0x41b   : > { %5443 = vst.msk [vmem:[%s7276_s14 + $0x170] sm:$0xff] %vm4575_vm4, %v4681_v5  ;;  %5442 = vst.msk [vmem:[%s7276_s14 + $0x158] sm:$0xff] %vm4575_vm4, %v4679_v23 }
 0x41e   : > { %v4685_v58 = vpop.permute.xlu0 %4684  ;;  %v4683_v6 = vpop.permute.xlu1 %4682 }
 0x41f   : > { %5445 = vst.msk [vmem:[%s7276_s14 + $0x190] sm:$0xff] %vm4575_vm4, %v4685_v58  ;;  %5444 = vst.msk [vmem:[%s7276_s14 + $0x178] sm:$0xff] %vm4575_vm4, %v4683_v6 }
 0x422   : > { %v4689_v7 = vpop.permute.xlu0 %4688  ;;  %v4687_v32 = vpop.permute.xlu1 %4686 }
 0x423   : > { %5447 = vst.msk [vmem:[%s7276_s14 + $0x1b0] sm:$0xff] %vm4575_vm4, %v4689_v7  ;;  %5446 = vst.msk [vmem:[%s7276_s14 + $0x198] sm:$0xff] %vm4575_vm4, %v4687_v32 }
 0x426   : > { %v4693_v9 = vpop.permute.xlu0 %4692  ;;  %v4691_v52 = vpop.permute.xlu1 %4690 }
 0x427   : > { %5449 = vst.msk [vmem:[%s7276_s14 + $0x1d0] sm:$0xff] %vm4575_vm4, %v4693_v9  ;;  %5448 = vst.msk [vmem:[%s7276_s14 + $0x1b8] sm:$0xff] %vm4575_vm4, %v4691_v52  ;;  %4763 = sbr.rel (!%p5930_p5) target bundleno = 1144 (0x478), region = 48 }
 0x42a   : > { %v4695_v10 = vpop.permute.xlu1 %4694 }
 0x42b   : > { %5450 = vst.msk [vmem:[%s7276_s14 + $0x1d8] sm:$0xff] %vm4575_vm4, %v4695_v10 }
 0x42c   : > { %s7843_s16 = smov (!%p4766_p2, %s5960_s16), 15 }
 0x42d   : > { %s5471_s15 = sshll.u32 %s7843_s16, 9  ;;  %s5458_s8 = sshll.u32 %s7843_s16, 2 }
 0x42e   : > { %p5459_p3 = scmp.eq.s32.totalorder %s5471_s15, 0 }
 0x42f   : > { %5714 = sdivrem.u32 (!%p5459_p3), %s5458_s8, 60 }
 0x430   : > { %4780 = sbr.rel (%p5459_p3) target bundleno = 1144 (0x478), region = 52 }
 0x438   : > { %s7606_s23 = spop.drf %5714 }
 0x439   : > { %p5460_p4 = scmp.le.s32.totalorder %s7606_s23, 0 }
 0x43a   : > { %s7819_s24 = smov (!%p5460_p4), %s7601_s20  ;;  %s7820_s11 = smov (!%p5460_p4), %s7276_s14 }
 0x43b   : > { %5215 = sbr.rel (%p5460_p4) target bundleno = 1119 (0x45f), region = 138  ;;  %s7615_s19 = smov (!%p5460_p4), 0  }
 0x43c   : > { %s7617_s30 = smov (!%p5460_p4), 0  }
 0x440 LB: >> { %v4963_v11 = vld [vmem:[%s5812_s11] sm:$0xff]  ;;  %v4965_v57 = vld [vmem:[%s5812_s11 + $0x8] sm:$0xff]  ;;  %v4967_v49 = vld [vmem:[%s5812_s11 + $0x10] sm:$0xff]  ;;  %s5083_s21 = sadd.s32 1, %s5816_s19  ;;  %s4957_s30 = sadd.s32 1, %s5820_s30   ;;  %s5820_s30 = sphi %s7617_s30, %s4957_s30   ;;  %s5816_s19 = sphi %s7615_s19, %s7823_s19   ;;  %s5812_s11 = sphi %s7820_s11, %s7822_s11   ;;  %s5808_s24 = sphi %s7819_s24, %s7821_s24  }
 0x441   : >> { %4964 = vst [vmem:[%s5808_s24] sm:$0xff] %v4963_v11  ;;  %4966 = vst [vmem:[%s5808_s24 + $0x8] sm:$0xff] %v4965_v57  ;;  %v4969_v12 = vld [vmem:[%s5812_s11 + $0x18] sm:$0xff]  ;;  %v4971_v14 = vld [vmem:[%s5812_s11 + $0x20] sm:$0xff]  ;;  %p5084_p5 = scmp.ge.s32.totalorder %s5083_s21, %s7606_s23  ;;  %p4956_p6 = scmp.ge.s32.totalorder %s4957_s30, %s7606_s23 }
 0x442   : >> { %4968 = vst [vmem:[%s5808_s24 + $0x10] sm:$0xff] %v4967_v49  ;;  %v4973_v16 = vld [vmem:[%s5812_s11 + $0x28] sm:$0xff]  ;;  %4970 = vst [vmem:[%s5808_s24 + $0x18] sm:$0xff] %v4969_v12  ;;  %v4975_v17 = vld [vmem:[%s5812_s11 + $0x30] sm:$0xff] }
 0x443   : >> { %4972 = vst [vmem:[%s5808_s24 + $0x20] sm:$0xff] %v4971_v14  ;;  %4974 = vst [vmem:[%s5808_s24 + $0x28] sm:$0xff] %v4973_v16  ;;  %v4977_v40 = vld [vmem:[%s5812_s11 + $0x38] sm:$0xff]  ;;  %v4979_v50 = vld [vmem:[%s5812_s11 + $0x40] sm:$0xff]  ;;  %s7845_s21 = smov (%p5084_p5, %s5083_s21), 0 }
 0x444   : >> { %4976 = vst [vmem:[%s5808_s24 + $0x30] sm:$0xff] %v4975_v17  ;;  %4978 = vst [vmem:[%s5808_s24 + $0x38] sm:$0xff] %v4977_v40  ;;  %v4981_v39 = vld [vmem:[%s5812_s11 + $0x48] sm:$0xff]  ;;  %v4983_v51 = vld [vmem:[%s5812_s11 + $0x50] sm:$0xff]  ;;  %s5086_s18 = smul.u32 480, %s7845_s21  ;;  %s7823_s19 = smov %s7845_s21 }
 0x445   : >> { %4980 = vst [vmem:[%s5808_s24 + $0x40] sm:$0xff] %v4979_v50  ;;  %v4985_v18 = vld [vmem:[%s5812_s11 + $0x58] sm:$0xff]  ;;  %4982 = vst [vmem:[%s5808_s24 + $0x48] sm:$0xff] %v4981_v39  ;;  %v4987_v21 = vld [vmem:[%s5812_s11 + $0x60] sm:$0xff] }
 0x446   : >> { %4984 = vst [vmem:[%s5808_s24 + $0x50] sm:$0xff] %v4983_v51  ;;  %4986 = vst [vmem:[%s5808_s24 + $0x58] sm:$0xff] %v4985_v18  ;;  %v4989_v19 = vld [vmem:[%s5812_s11 + $0x68] sm:$0xff]  ;;  %v4991_v22 = vld [vmem:[%s5812_s11 + $0x70] sm:$0xff]  ;;  %s7679_s9 = scalar_lea.vmem %s7276_s14, %s5086_s18 [#allocation4]   ;;  %s7682_s7 = scalar_lea.vmem %s7601_s20, %s5086_s18  }
 0x447   : >> { %4988 = vst [vmem:[%s5808_s24 + $0x60] sm:$0xff] %v4987_v21  ;;  %4990 = vst [vmem:[%s5808_s24 + $0x68] sm:$0xff] %v4989_v19  ;;  %v4993_v24 = vld [vmem:[%s5812_s11 + $0x78] sm:$0xff]  ;;  %v4995_v25 = vld [vmem:[%s5812_s11 + $0x80] sm:$0xff] }
 0x448   : >> { %4992 = vst [vmem:[%s5808_s24 + $0x70] sm:$0xff] %v4991_v22  ;;  %v4997_v3 = vld [vmem:[%s5812_s11 + $0x88] sm:$0xff]  ;;  %4994 = vst [vmem:[%s5808_s24 + $0x78] sm:$0xff] %v4993_v24  ;;  %v4999_v41 = vld [vmem:[%s5812_s11 + $0x90] sm:$0xff] }
 0x449   : >> { %4996 = vst [vmem:[%s5808_s24 + $0x80] sm:$0xff] %v4995_v25  ;;  %4998 = vst [vmem:[%s5808_s24 + $0x88] sm:$0xff] %v4997_v3  ;;  %v5001_v42 = vld [vmem:[%s5812_s11 + $0x98] sm:$0xff]  ;;  %v5003_v27 = vld [vmem:[%s5812_s11 + $0xa0] sm:$0xff] }
 0x44a   : >> { %5000 = vst [vmem:[%s5808_s24 + $0x90] sm:$0xff] %v4999_v41  ;;  %5002 = vst [vmem:[%s5808_s24 + $0x98] sm:$0xff] %v5001_v42  ;;  %v5005_v28 = vld [vmem:[%s5812_s11 + $0xa8] sm:$0xff]  ;;  %v5007_v29 = vld [vmem:[%s5812_s11 + $0xb0] sm:$0xff] }
 0x44b   : >> { %5004 = vst [vmem:[%s5808_s24 + $0xa0] sm:$0xff] %v5003_v27  ;;  %v5009_v30 = vld [vmem:[%s5812_s11 + $0xb8] sm:$0xff]  ;;  %5006 = vst [vmem:[%s5808_s24 + $0xa8] sm:$0xff] %v5005_v28  ;;  %v5011_v33 = vld [vmem:[%s5812_s11 + $0xc0] sm:$0xff] }
 0x44c   : >> { %5008 = vst [vmem:[%s5808_s24 + $0xb0] sm:$0xff] %v5007_v29  ;;  %5010 = vst [vmem:[%s5808_s24 + $0xb8] sm:$0xff] %v5009_v30  ;;  %v5013_v1 = vld [vmem:[%s5812_s11 + $0xc8] sm:$0xff]  ;;  %v5015_v31 = vld [vmem:[%s5812_s11 + $0xd0] sm:$0xff] }
 0x44d   : >> { %5012 = vst [vmem:[%s5808_s24 + $0xc0] sm:$0xff] %v5011_v33  ;;  %5014 = vst [vmem:[%s5808_s24 + $0xc8] sm:$0xff] %v5013_v1  ;;  %v5017_v35 = vld [vmem:[%s5812_s11 + $0xd8] sm:$0xff]  ;;  %v5019_v36 = vld [vmem:[%s5812_s11 + $0xe0] sm:$0xff] }
 0x44e   : >> { %5016 = vst [vmem:[%s5808_s24 + $0xd0] sm:$0xff] %v5015_v31  ;;  %v5021_v60 = vld [vmem:[%s5812_s11 + $0xe8] sm:$0xff]  ;;  %5018 = vst [vmem:[%s5808_s24 + $0xd8] sm:$0xff] %v5017_v35  ;;  %v5023_v55 = vld [vmem:[%s5812_s11 + $0xf0] sm:$0xff] }
 0x44f   : >> { %5020 = vst [vmem:[%s5808_s24 + $0xe0] sm:$0xff] %v5019_v36  ;;  %5022 = vst [vmem:[%s5808_s24 + $0xe8] sm:$0xff] %v5021_v60  ;;  %v5025_v37 = vld [vmem:[%s5812_s11 + $0xf8] sm:$0xff]  ;;  %v5027_v38 = vld [vmem:[%s5812_s11 + $0x100] sm:$0xff] }
 0x450   : >> { %5024 = vst [vmem:[%s5808_s24 + $0xf0] sm:$0xff] %v5023_v55  ;;  %5026 = vst [vmem:[%s5808_s24 + $0xf8] sm:$0xff] %v5025_v37  ;;  %v5029_v44 = vld [vmem:[%s5812_s11 + $0x108] sm:$0xff]  ;;  %v5031_v34 = vld [vmem:[%s5812_s11 + $0x110] sm:$0xff] }
 0x451   : >> { %5028 = vst [vmem:[%s5808_s24 + $0x100] sm:$0xff] %v5027_v38  ;;  %v5033_v53 = vld [vmem:[%s5812_s11 + $0x118] sm:$0xff]  ;;  %5030 = vst [vmem:[%s5808_s24 + $0x108] sm:$0xff] %v5029_v44  ;;  %v5035_v0 = vld [vmem:[%s5812_s11 + $0x120] sm:$0xff] }
 0x452   : >> { %5032 = vst [vmem:[%s5808_s24 + $0x110] sm:$0xff] %v5031_v34  ;;  %5034 = vst [vmem:[%s5808_s24 + $0x118] sm:$0xff] %v5033_v53  ;;  %v5037_v54 = vld [vmem:[%s5812_s11 + $0x128] sm:$0xff]  ;;  %v5039_v56 = vld [vmem:[%s5812_s11 + $0x130] sm:$0xff] }
 0x453   : >> { %5036 = vst [vmem:[%s5808_s24 + $0x120] sm:$0xff] %v5035_v0  ;;  %5038 = vst [vmem:[%s5808_s24 + $0x128] sm:$0xff] %v5037_v54  ;;  %v5041_v59 = vld [vmem:[%s5812_s11 + $0x138] sm:$0xff]  ;;  %v5043_v48 = vld [vmem:[%s5812_s11 + $0x140] sm:$0xff] }
 0x454   : >> { %5040 = vst [vmem:[%s5808_s24 + $0x130] sm:$0xff] %v5039_v56  ;;  %v5045_v61 = vld [vmem:[%s5812_s11 + $0x148] sm:$0xff]  ;;  %5042 = vst [vmem:[%s5808_s24 + $0x138] sm:$0xff] %v5041_v59  ;;  %v5047_v63 = vld [vmem:[%s5812_s11 + $0x150] sm:$0xff] }
 0x455   : >> { %5044 = vst [vmem:[%s5808_s24 + $0x140] sm:$0xff] %v5043_v48  ;;  %5046 = vst [vmem:[%s5808_s24 + $0x148] sm:$0xff] %v5045_v61  ;;  %v5049_v2 = vld [vmem:[%s5812_s11 + $0x158] sm:$0xff]  ;;  %v5051_v43 = vld [vmem:[%s5812_s11 + $0x160] sm:$0xff] }
 0x456   : >> { %5048 = vst [vmem:[%s5808_s24 + $0x150] sm:$0xff] %v5047_v63  ;;  %5050 = vst [vmem:[%s5808_s24 + $0x158] sm:$0xff] %v5049_v2  ;;  %v5053_v13 = vld [vmem:[%s5812_s11 + $0x168] sm:$0xff]  ;;  %v5055_v46 = vld [vmem:[%s5812_s11 + $0x170] sm:$0xff] }
 0x457   : >> { %5052 = vst [vmem:[%s5808_s24 + $0x160] sm:$0xff] %v5051_v43  ;;  %v5057_v8 = vld [vmem:[%s5812_s11 + $0x178] sm:$0xff]  ;;  %5054 = vst [vmem:[%s5808_s24 + $0x168] sm:$0xff] %v5053_v13  ;;  %v5059_v45 = vld [vmem:[%s5812_s11 + $0x180] sm:$0xff] }
 0x458   : >> { %5056 = vst [vmem:[%s5808_s24 + $0x170] sm:$0xff] %v5055_v46  ;;  %5058 = vst [vmem:[%s5808_s24 + $0x178] sm:$0xff] %v5057_v8  ;;  %v5061_v15 = vld [vmem:[%s5812_s11 + $0x188] sm:$0xff]  ;;  %v5063_v26 = vld [vmem:[%s5812_s11 + $0x190] sm:$0xff] }
 0x459   : >> { %5060 = vst [vmem:[%s5808_s24 + $0x180] sm:$0xff] %v5059_v45  ;;  %5062 = vst [vmem:[%s5808_s24 + $0x188] sm:$0xff] %v5061_v15  ;;  %v5065_v20 = vld [vmem:[%s5812_s11 + $0x198] sm:$0xff]  ;;  %v5067_v62 = vld [vmem:[%s5812_s11 + $0x1a0] sm:$0xff] }
 0x45a   : >> { %5064 = vst [vmem:[%s5808_s24 + $0x190] sm:$0xff] %v5063_v26  ;;  %v5069_v47 = vld [vmem:[%s5812_s11 + $0x1a8] sm:$0xff]  ;;  %5066 = vst [vmem:[%s5808_s24 + $0x198] sm:$0xff] %v5065_v20  ;;  %v5071_v4 = vld [vmem:[%s5812_s11 + $0x1b0] sm:$0xff]  ;;  %4959 = sbr.rel (!%p4956_p6) target bundleno = 1088 (0x440), region = 144 }
 0x45b   : >> { %5068 = vst [vmem:[%s5808_s24 + $0x1a0] sm:$0xff] %v5067_v62  ;;  %5070 = vst [vmem:[%s5808_s24 + $0x1a8] sm:$0xff] %v5069_v47  ;;  %v5073_v5 = vld [vmem:[%s5812_s11 + $0x1b8] sm:$0xff]  ;;  %v5075_v23 = vld [vmem:[%s5812_s11 + $0x1c0] sm:$0xff] }
 0x45c   : >> { %5072 = vst [vmem:[%s5808_s24 + $0x1b0] sm:$0xff] %v5071_v4  ;;  %5074 = vst [vmem:[%s5808_s24 + $0x1b8] sm:$0xff] %v5073_v5  ;;  %v5077_v58 = vld [vmem:[%s5812_s11 + $0x1c8] sm:$0xff]  ;;  %v5079_v6 = vld [vmem:[%s5812_s11 + $0x1d0] sm:$0xff] }
 0x45d   : >> { %5076 = vst [vmem:[%s5808_s24 + $0x1c0] sm:$0xff] %v5075_v23  ;;  %v5081_v7 = vld [vmem:[%s5812_s11 + $0x1d8] sm:$0xff]  ;;  %5078 = vst [vmem:[%s5808_s24 + $0x1c8] sm:$0xff] %v5077_v58  ;;  %s7822_s11 = smov %s7679_s9 }
 0x45e   : >> { %5080 = vst [vmem:[%s5808_s24 + $0x1d0] sm:$0xff] %v5079_v6  ;;  %5082 = vst [vmem:[%s5808_s24 + $0x1d8] sm:$0xff] %v5081_v7  ;;  %s7821_s24 = smov %s7682_s7 }
 0x45f PF: > { %5716 = sdivrem.u32 %s5458_s8, 60 }
 0x460   : > { %s5461_s15 = smul.u32 480, %s7606_s23 }
 0x462   : > { %s5094_s13 = scalar_lea.vmem %s7276_s14, %s5461_s15 [#allocation4]   ;;  %s5096_s10 = scalar_lea.vmem %s7601_s20, %s5461_s15  }
 0x468   : > { %s5717_s17 = spop.drf %5716 }
 0x469   : > { %p5463_p7 = scmp.le.s32.totalorder %s5717_s17, 0 }
 0x46a   : > { %s5822_s18 = smov (!%p5463_p7), %s5096_s10   ;;  %s5826_s9 = smov (!%p5463_p7), %s5094_s13  }
 0x46b   : > { %5229 = sbr.rel (%p5463_p7) target bundleno = 1144 (0x478), region = 149  ;;  %s5830_s7 = smov (!%p5463_p7), 0  }
 0x46c   : > { %s5834_s21 = smov (!%p5463_p7), 0  }
 0x470 LB: >> { %v5106_v32 = vld [vmem:[%s5828_s9] sm:$0xff]  ;;  %s5108_s16 = sadd.s32 1, %s5832_s7  ;;  %s5100_s21 = sadd.s32 1, %s5836_s21   ;;  %s5836_s21 = sphi %s5834_s21, %s5100_s21   ;;  %s5832_s7 = sphi %s5830_s7, %s5831_s7   ;;  %s5828_s9 = sphi %s5826_s9, %s5113_s9   ;;  %s5824_s18 = sphi %s5822_s18, %s5114_s18  }
 0x471   : >> { %5107 = vst [vmem:[%s5824_s18] sm:$0xff] %v5106_v32  ;;  %p5109_p8 = scmp.ge.s32.totalorder %s5108_s16, %s5717_s17  ;;  %p5099_p9 = scmp.ge.s32.totalorder %s5100_s21, %s5717_s17 }
 0x473   : >> { %s7847_s16 = smov (%p5109_p8, %s5108_s16), 0  ;;  %5102 = sbr.rel (!%p5099_p9) target bundleno = 1136 (0x470), region = 155 }
 0x474   : >> { %s5464_s14 = sshll.u32 %s7847_s16, 3  ;;  %s5831_s7 = smov %s7847_s16  }
 0x475   : >> { %s5113_s9 = scalar_lea.vmem %s5094_s13, %s5464_s14 [#allocation4]   ;;  %s5114_s18 = scalar_lea.vmem %s5096_s10, %s5464_s14  }
 0x478 PF: > { %s16_s27 = sadd.s32 1, %s5804_s27   ;;  %s7824_s21 = smov %s5784_s22 }
 0x479   : > { %p13_p10 = scmp.ge.s32.totalorder %s16_s27, 6   ;;  %s7825_s22 = smov %s5941_s12 }
 0x47a   : > { %s7826_s23 = smov %s5796_s25  ;;  %s7827_s24 = smov %s5800_s26 }
 0x47b   : > { %s7828_s25 = smov %s7831_s28  ;;  %s7829_s26 = smov %s7835_s29 }
 0x47c   :  { %15 = sbr.rel (!%p13_p10) target bundleno = 4 (0x4), region = 166 }

</bundles_post_ra>
